<compile_context>
chip_gen: v7x
topology: tpu7x:2x2x1
jax: 0.10.0
libtpu: 0.0.40
codegen_flags: <defaults>
</compile_context>

<pallas_src>
import functools

import jax
import jax.numpy as jnp
from jax.experimental import pallas as pl
from jax.experimental.pallas import tpu as pltpu

BN_EPS = 1e-5
LRELU_SLOPE = 0.01            # PyTorch nn.LeakyReLU default
MAX_ROW_TILE = 1024           # rows per grid step cap (tiny VMEM footprint at these widths)
VMEM_LIMIT = 32 * 1024 * 1024


# ----------------------------- helpers -------------------------------------

def _pick_row_tile(rows, cap=MAX_ROW_TILE):
    """Full R when it fits; otherwise the largest power-of-two divisor <= cap."""
    if rows <= cap:
        return rows
    for t in (1024, 512, 256, 128, 64, 32, 16, 8):
        if t <= cap and rows % t == 0:
            return t
    return rows


# ----------------------------- Pallas kernels ------------------------------

def fused_conv_bn_lrelu_kernel(p_ref, w_ref, gamma_ref, beta_ref, o_ref,
                               z_sc, sum_sc, sq_sc, *, inv_count, tile):
    """Fused: im2col matmul + batch-stat accumulation + BN (train mode) + LeakyReLU.

    z (unnormalized conv output) is kept resident in a VMEM scratch across the row-tile
    grid; the BN/LeakyReLU epilogue runs over the whole scratch in the final grid step
    and stores the true-width bf16 output.
    """
    i = pl.program_id(0)

    z = jnp.dot(p_ref[...], w_ref[...], preferred_element_type=jnp.float32)
    row0 = pl.multiple_of(i * tile, tile)
    z_sc[pl.ds(row0, tile), :] = z

    @pl.when(i == 0)
    def _init():
        sum_sc[...] = jnp.zeros_like(sum_sc)
        sq_sc[...] = jnp.zeros_like(sq_sc)

    sum_sc[...] += jnp.sum(z, axis=0, keepdims=True)
    sq_sc[...] += jnp.sum(z * z, axis=0, keepdims=True)

    @pl.when(i == pl.num_programs(0) - 1)
    def _finalize():
        mean = sum_sc[...] * inv_count                         # (1, cout)
        var = jnp.maximum(sq_sc[...] * inv_count - mean * mean, 0.0)
        scale = jax.lax.rsqrt(var + BN_EPS) * gamma_ref[...]   # fold gamma into scale
        shift = beta_ref[...] - mean * scale                   # fold mean/beta into shift
        y = z_sc[...] * scale + shift
        y = jnp.where(y > 0, y, LRELU_SLOPE * y)
        o_ref[...] = y.astype(o_ref.dtype)                     # bf16, true width


def linear_kernel(x_ref, w_ref, b_ref, o_ref):
    o_ref[...] = (
        jnp.dot(x_ref[...], w_ref[...], preferred_element_type=jnp.float32)
        + b_ref[...]
    )


# ----------------------------- kernel wrappers ------------------------------

def conv_bn_lrelu(patches, w, gamma, beta):
    """patches (R, K*K*Cin) bf16; w (K*K*Cin, cout) bf16; gamma/beta (1, cout) f32.

    Returns the post-BN/LeakyReLU activation as (R, cout) bf16.
    """
    R, KC = patches.shape
    cout = w.shape[1]
    tile = _pick_row_tile(R)
    n_tiles = R // tile

    return pl.pallas_call(
        functools.partial(fused_conv_bn_lrelu_kernel, inv_count=1.0 / R, tile=tile),
        grid=(n_tiles,),
        in_specs=[
            pl.BlockSpec((tile, KC), lambda i: (i, 0)),
            pl.BlockSpec((KC, cout), lambda i: (0, 0)),
            pl.BlockSpec((1, cout), lambda i: (0, 0)),
            pl.BlockSpec((1, cout), lambda i: (0, 0)),
        ],
        out_specs=pl.BlockSpec((R, cout), lambda i: (0, 0)),   # resident, written at end
        out_shape=jax.ShapeDtypeStruct((R, cout), jnp.bfloat16),
        scratch_shapes=[
            pltpu.VMEM((R, cout), jnp.float32),   # z, persistent across the grid
            pltpu.VMEM((1, cout), jnp.float32),   # per-channel sum
            pltpu.VMEM((1, cout), jnp.float32),   # per-channel sum of squares
        ],
        compiler_params=pltpu.CompilerParams(
            dimension_semantics=("arbitrary",),   # stats/output blocks are revisited
            vmem_limit_bytes=VMEM_LIMIT,
        ),
    )(patches, w, gamma, beta)


def linear(x, w, b):
    """x (N, feat) bf16; w (feat, n_classes) bf16; b (1, n_classes) f32 -> (N, n_classes) f32."""
    N, F = x.shape
    C = w.shape[1]
    return pl.pallas_call(
        linear_kernel,
        grid=(1,),
        in_specs=[
            pl.BlockSpec((N, F), lambda i: (0, 0)),
            pl.BlockSpec((F, C), lambda i: (0, 0)),
            pl.BlockSpec((1, C), lambda i: (0, 0)),
        ],
        out_specs=pl.BlockSpec((N, C), lambda i: (0, 0)),
        out_shape=jax.ShapeDtypeStruct((N, C), jnp.float32),
        compiler_params=pltpu.CompilerParams(vmem_limit_bytes=VMEM_LIMIT),
    )(x, w, b)


# ----------------------------- im2col (wrapper-side) ------------------------

def im2col(x_nhwc, k, stride, pad):
    """Extract (kh, kw, C)-ordered patches. Returns (N*Ho*Wo, k*k*C), Ho, Wo (same dtype)."""
    N, H, W, C = x_nhwc.shape
    xp = jnp.pad(x_nhwc, ((0, 0), (pad, pad), (pad, pad), (0, 0)))
    Ho = (H + 2 * pad - k) // stride + 1
    Wo = (W + 2 * pad - k) // stride + 1
    cols = []
    for kh in range(k):
        for kw in range(k):
            patch = xp[:, kh:kh + Ho * stride:stride, kw:kw + Wo * stride:stride, :]
            cols.append(patch)                       # (N, Ho, Wo, C)
    patches = jnp.concatenate(cols, axis=-1)         # (N, Ho, Wo, k*k*C)
    return patches.reshape(N * Ho * Wo, k * k * C), Ho, Wo


# ----------------------------- model ----------------------------------------

def init_params(key, channels, n_classes, dim_sizes, kernel_size, img_size,
                stride, padding):
    d_s = [channels] + list(dim_sizes)
    params = {"conv": []}
    h = w = img_size
    for i in range(len(d_s) - 1):
        cin, cout = d_s[i], d_s[i + 1]
        key, k1, k2, k3 = jax.random.split(key, 4)
        # PyTorch layout (Cout, Cin, K, K).  Conv bias omitted: BN's mean subtraction
        # cancels a per-channel bias exactly, so it has no effect on the output.
        wt = jax.random.normal(k1, (cout, cin, kernel_size, kernel_size),
                               jnp.float32) * 0.1
        gamma = 1.0 + 0.1 * jax.random.normal(k2, (cout,), jnp.float32)
        beta = 0.1 * jax.random.normal(k3, (cout,), jnp.float32)
        # Reorder weights to match the (kh, kw, cin) patch layout; cast to bf16 once
        # (MXU inputs; f32 accumulation in-kernel).  No lane padding.
        w_mat = jnp.transpose(wt, (2, 3, 1, 0)).reshape(-1, cout).astype(jnp.bfloat16)
        params["conv"].append((w_mat, gamma.reshape(1, cout), beta.reshape(1, cout)))
        h = (h + 2 * padding - kernel_size) // stride + 1
        w = (w + 2 * padding - kernel_size) // stride + 1
    f_h, f_w = h, w
    c_last = dim_sizes[-1]
    feat = c_last * f_h * f_w
    key, k1, k2 = jax.random.split(key, 3)
    fc_w = jax.random.normal(k1, (n_classes, feat), jnp.float32) * 0.05
    fc_b = jax.random.normal(k2, (n_classes,), jnp.float32) * 0.05
    # PyTorch feature order is NCHW-flatten (c, h, w); permute weight rows to NHWC
    # (h, w, c) order so the forward pass can flatten the NHWC activation directly
    # (no transpose), then pre-transpose + cast once.
    fc_w_nhwc = (fc_w.reshape(n_classes, c_last, f_h, f_w)
                     .transpose(0, 2, 3, 1)
                     .reshape(n_classes, feat))
    params["fc"] = (fc_w_nhwc.T.astype(jnp.bfloat16), fc_b.reshape(1, n_classes))
    return params, (f_h, f_w)


@functools.partial(jax.jit, static_argnames=("kernel_size", "stride", "padding"))
def base_model_forward(x_nchw, params, kernel_size, stride, padding):
    x = jnp.transpose(x_nchw, (0, 2, 3, 1)).astype(jnp.bfloat16)   # NCHW -> NHWC bf16
    N = x.shape[0]
    for (w, gamma, beta) in params["conv"]:
        cout = w.shape[1]
        patches, Ho, Wo = im2col(x, kernel_size, stride, padding)
        out = conv_bn_lrelu(patches, w, gamma, beta)               # (R, cout) bf16
        x = out.reshape(N, Ho, Wo, cout)
    feat = x.reshape(N, -1)          # NHWC flatten; FC weights were permuted to match
    fc_w, fc_b = params["fc"]
    return linear(feat, fc_w, fc_b)  # (N, n_classes) f32


# ----------------------------- demo ------------------------------------------

if __name__ == "__main__":
    # check_final_size() in the PyTorch module hardcodes a (1, 3, 32, 32) probe,
    # so channels=3 and IMG_SIZE=32 are the only consistent settings.
    channels, n_classes = 3, 10
    dim_sizes = (8, 16)
    kernel_size, stride, padding = 3, 2, 1
    img_size, batch = 32, 2

    key = jax.random.PRNGKey(0)
    key, pkey, xkey = jax.random.split(key, 3)
    params, (f_h, f_w) = init_params(pkey, channels, n_classes, list(dim_sizes),
                                     kernel_size, img_size, stride, padding)
    x = jax.random.normal(xkey, (batch, channels, img_size, img_size), jnp.float32)

    out = base_model_forward(x, params, kernel_size, stride, padding)
    out = jax.block_until_ready(out)
    assert out.shape == (batch, n_classes), out.shape
    assert bool(jnp.all(jnp.isfinite(out))), "non-finite output"
    print("KERNEL_OK")
</pallas_src>

<mosaic_0001>
module attributes {stable_mosaic.version = 11 : i64} {
  func.func @fused_conv_bn_lrelu_kernel(%arg0: i32, %arg1: memref<512x27xbf16, #tpu.memory_space<vmem>>, %arg2: memref<27x8xbf16, #tpu.memory_space<vmem>>, %arg3: memref<1x8xf32, #tpu.memory_space<vmem>>, %arg4: memref<1x8xf32, #tpu.memory_space<vmem>>, %arg5: memref<512x8xbf16, #tpu.memory_space<vmem>>, %arg6: memref<512x8xf32, #tpu.memory_space<vmem>>, %arg7: memref<1x8xf32, #tpu.memory_space<vmem>>, %arg8: memref<1x8xf32, #tpu.memory_space<vmem>>) attributes {dimension_semantics = [#tpu.dimension_semantics<arbitrary>], iteration_bounds = array<i64: 1>, scalar_prefetch = 0 : i64, scratch_operands = 3 : i64, tpu.core_type = #tpu.core_type<tc>, window_params = [{transform_indices = @transform_0, window_bounds = array<i64: 512, 27>}, {pipeline_mode = #tpu.pipeline_mode<synchronous>, transform_indices = @transform_1, window_bounds = array<i64: 27, 8>}, {pipeline_mode = #tpu.pipeline_mode<synchronous>, transform_indices = @transform_2, window_bounds = array<i64: 1, 8>}, {pipeline_mode = #tpu.pipeline_mode<synchronous>, transform_indices = @transform_3, window_bounds = array<i64: 1, 8>}, {pipeline_mode = #tpu.pipeline_mode<synchronous>, transform_indices = @transform_4, window_bounds = array<i64: 512, 8>}]} {
    %c0 = arith.constant 0 : index
    %c0_0 = arith.constant 0 : index
    %0 = vector.load %arg1[%c0, %c0_0] : memref<512x27xbf16, #tpu.memory_space<vmem>>, vector<512x27xbf16>
    %c0_1 = arith.constant 0 : index
    %c0_2 = arith.constant 0 : index
    %1 = vector.load %arg2[%c0_1, %c0_2] : memref<27x8xbf16, #tpu.memory_space<vmem>>, vector<27x8xbf16>
    %cst = arith.constant dense<0.000000e+00> : vector<512x8xf32>
    %2 = tpu.matmul %0, %1, %cst {dimension_numbers = #tpu.dot_dimension_numbers<[1], [0], [0], [1], [0, 0, 1, 1], [], []>} : vector<512x27xbf16>, vector<27x8xbf16>, vector<512x8xf32> -> vector<512x8xf32>
    %c512_i32 = arith.constant 512 : i32
    %3 = arith.muli %arg0, %c512_i32 : i32
    %4 = tpu.assume_multiple %3, 512 : i32
    %5 = arith.index_cast %4 : i32 to index
    %c0_3 = arith.constant 0 : index
    %6 = vector.load %arg6[%5, %c0_3] : memref<512x8xf32, #tpu.memory_space<vmem>>, vector<512x8xf32>
    tpu.vector_store %arg6[%5, %c0_3], %2 {strides = array<i32>} : memref<512x8xf32, #tpu.memory_space<vmem>>, vector<512x8xf32>,
    %c0_i32 = arith.constant 0 : i32
    %7 = arith.cmpi eq, %arg0, %c0_i32 : i32
    %8 = arith.extui %7 : i1 to i32
    %c0_i32_4 = arith.constant 0 : i32
    %9 = arith.cmpi ne, %8, %c0_i32_4 : i32
    scf.if %9 {
      %cst_17 = arith.constant 0.000000e+00 : f32
      %24 = vector.broadcast %cst_17 : f32 to vector<1x8xf32>
      %c0_18 = arith.constant 0 : index
      %c0_19 = arith.constant 0 : index
      %25 = vector.load %arg7[%c0_18, %c0_19] : memref<1x8xf32, #tpu.memory_space<vmem>>, vector<1x8xf32>
      tpu.vector_store %arg7[%c0_18, %c0_19], %24 {strides = array<i32>} : memref<1x8xf32, #tpu.memory_space<vmem>>, vector<1x8xf32>,
      %cst_20 = arith.constant 0.000000e+00 : f32
      %26 = vector.broadcast %cst_20 : f32 to vector<1x8xf32>
      %c0_21 = arith.constant 0 : index
      %c0_22 = arith.constant 0 : index
      %27 = vector.load %arg8[%c0_21, %c0_22] : memref<1x8xf32, #tpu.memory_space<vmem>>, vector<1x8xf32>
      tpu.vector_store %arg8[%c0_21, %c0_22], %26 {strides = array<i32>} : memref<1x8xf32, #tpu.memory_space<vmem>>, vector<1x8xf32>,
    } else {
    }
    %c0_5 = arith.constant 0 : index
    %c0_6 = arith.constant 0 : index
    %10 = vector.load %arg7[%c0_5, %c0_6] : memref<1x8xf32, #tpu.memory_space<vmem>>, vector<1x8xf32>
    %cst_7 = arith.constant dense<0.000000e+00> : vector<8xf32>
    %11 = vector.multi_reduction <add>, %2, %cst_7 [0] : vector<512x8xf32> to vector<8xf32>
    %12 = vector.shape_cast %11 : vector<8xf32> to vector<1x8xf32>
    %13 = arith.addf %10, %12 : vector<1x8xf32>
    %c0_8 = arith.constant 0 : index
    %c0_9 = arith.constant 0 : index
    %14 = vector.load %arg7[%c0_8, %c0_9] : memref<1x8xf32, #tpu.memory_space<vmem>>, vector<1x8xf32>
    tpu.vector_store %arg7[%c0_8, %c0_9], %13 {strides = array<i32>} : memref<1x8xf32, #tpu.memory_space<vmem>>, vector<1x8xf32>,
    %c0_10 = arith.constant 0 : index
    %c0_11 = arith.constant 0 : index
    %15 = vector.load %arg8[%c0_10, %c0_11] : memref<1x8xf32, #tpu.memory_space<vmem>>, vector<1x8xf32>
    %16 = arith.mulf %2, %2 : vector<512x8xf32>
    %cst_12 = arith.constant dense<0.000000e+00> : vector<8xf32>
    %17 = vector.multi_reduction <add>, %16, %cst_12 [0] : vector<512x8xf32> to vector<8xf32>
    %18 = vector.shape_cast %17 : vector<8xf32> to vector<1x8xf32>
    %19 = arith.addf %15, %18 : vector<1x8xf32>
    %c0_13 = arith.constant 0 : index
    %c0_14 = arith.constant 0 : index
    %20 = vector.load %arg8[%c0_13, %c0_14] : memref<1x8xf32, #tpu.memory_space<vmem>>, vector<1x8xf32>
    tpu.vector_store %arg8[%c0_13, %c0_14], %19 {strides = array<i32>} : memref<1x8xf32, #tpu.memory_space<vmem>>, vector<1x8xf32>,
    %c0_i32_15 = arith.constant 0 : i32
    %21 = arith.cmpi eq, %arg0, %c0_i32_15 : i32
    %22 = arith.extui %21 : i1 to i32
    %c0_i32_16 = arith.constant 0 : i32
    %23 = arith.cmpi ne, %22, %c0_i32_16 : i32
    scf.if %23 {
      %c0_17 = arith.constant 0 : index
      %c0_18 = arith.constant 0 : index
      %24 = vector.load %arg7[%c0_17, %c0_18] : memref<1x8xf32, #tpu.memory_space<vmem>>, vector<1x8xf32>
      %cst_19 = arith.constant 0.001953125 : f32
      %25 = vector.broadcast %cst_19 : f32 to vector<1x8xf32>
      %26 = arith.mulf %24, %25 : vector<1x8xf32>
      %c0_20 = arith.constant 0 : index
      %c0_21 = arith.constant 0 : index
      %27 = vector.load %arg8[%c0_20, %c0_21] : memref<1x8xf32, #tpu.memory_space<vmem>>, vector<1x8xf32>
      %cst_22 = arith.constant 0.001953125 : f32
      %28 = vector.broadcast %cst_22 : f32 to vector<1x8xf32>
      %29 = arith.mulf %27, %28 : vector<1x8xf32>
      %30 = arith.mulf %26, %26 : vector<1x8xf32>
      %31 = arith.subf %29, %30 : vector<1x8xf32>
      %cst_23 = arith.constant 0.000000e+00 : f32
      %32 = vector.broadcast %cst_23 : f32 to vector<1x8xf32>
      %33 = arith.maximumf %31, %32 : vector<1x8xf32>
      %cst_24 = arith.constant 9.99999974E-6 : f32
      %34 = vector.broadcast %cst_24 : f32 to vector<1x8xf32>
      %35 = arith.addf %33, %34 : vector<1x8xf32>
      %36 = math.rsqrt %35 : vector<1x8xf32>
      %c0_25 = arith.constant 0 : index
      %c0_26 = arith.constant 0 : index
      %37 = vector.load %arg3[%c0_25, %c0_26] : memref<1x8xf32, #tpu.memory_space<vmem>>, vector<1x8xf32>
      %38 = arith.mulf %36, %37 : vector<1x8xf32>
      %c0_27 = arith.constant 0 : index
      %c0_28 = arith.constant 0 : index
      %39 = vector.load %arg4[%c0_27, %c0_28] : memref<1x8xf32, #tpu.memory_space<vmem>>, vector<1x8xf32>
      %40 = arith.mulf %26, %38 : vector<1x8xf32>
      %41 = arith.subf %39, %40 : vector<1x8xf32>
      %c0_29 = arith.constant 0 : index
      %c0_30 = arith.constant 0 : index
      %42 = vector.load %arg6[%c0_29, %c0_30] : memref<512x8xf32, #tpu.memory_space<vmem>>, vector<512x8xf32>
      %43 = vector.broadcast %38 : vector<1x8xf32> to vector<512x8xf32>
      %44 = arith.mulf %42, %43 : vector<512x8xf32>
      %45 = vector.broadcast %41 : vector<1x8xf32> to vector<512x8xf32>
      %46 = arith.addf %44, %45 : vector<512x8xf32>
      %cst_31 = arith.constant 0.000000e+00 : f32
      %47 = vector.broadcast %cst_31 : f32 to vector<512x8xf32>
      %48 = arith.cmpf ogt, %46, %47 : vector<512x8xf32>
      %cst_32 = arith.constant 0.00999999977 : f32
      %49 = vector.broadcast %cst_32 : f32 to vector<512x8xf32>
      %50 = arith.mulf %49, %46 : vector<512x8xf32>
      %51 = arith.select %48, %46, %50 : vector<512x8xi1>, vector<512x8xf32>
      %52 = arith.truncf %51 : vector<512x8xf32> to vector<512x8xbf16>
      %c0_33 = arith.constant 0 : index
      %c0_34 = arith.constant 0 : index
      %53 = vector.load %arg5[%c0_33, %c0_34] : memref<512x8xbf16, #tpu.memory_space<vmem>>, vector<512x8xbf16>
      tpu.vector_store %arg5[%c0_33, %c0_34], %52 {strides = array<i32>} : memref<512x8xbf16, #tpu.memory_space<vmem>>, vector<512x8xbf16>,
    } else {
    }
    return
  }
  func.func @transform_0(%arg0: i32) -> (i32, i32) {
    %c0_i32 = arith.constant 0 : i32
    %c0_i32_0 = arith.constant 0 : i32
    return %arg0, %c0_i32 : i32, i32
  }
  func.func @transform_1(%arg0: i32) -> (i32, i32) {
    %c0_i32 = arith.constant 0 : i32
    %c0_i32_0 = arith.constant 0 : i32
    %c0_i32_1 = arith.constant 0 : i32
    return %c0_i32, %c0_i32_0 : i32, i32
  }
  func.func @transform_2(%arg0: i32) -> (i32, i32) {
    %c0_i32 = arith.constant 0 : i32
    %c0_i32_0 = arith.constant 0 : i32
    %c0_i32_1 = arith.constant 0 : i32
    return %c0_i32, %c0_i32_0 : i32, i32
  }
  func.func @transform_3(%arg0: i32) -> (i32, i32) {
    %c0_i32 = arith.constant 0 : i32
    %c0_i32_0 = arith.constant 0 : i32
    %c0_i32_1 = arith.constant 0 : i32
    return %c0_i32, %c0_i32_0 : i32, i32
  }
  func.func @transform_4(%arg0: i32) -> (i32, i32) {
    %c0_i32 = arith.constant 0 : i32
    %c0_i32_0 = arith.constant 0 : i32
    %c0_i32_1 = arith.constant 0 : i32
    return %c0_i32, %c0_i32_0 : i32, i32
  }
}

module attributes {stable_mosaic.version = 11 : i64} {
  func.func @fused_conv_bn_lrelu_kernel(%arg0: i32, %arg1: memref<128x72xbf16, #tpu.memory_space<vmem>>, %arg2: memref<72x16xbf16, #tpu.memory_space<vmem>>, %arg3: memref<1x16xf32, #tpu.memory_space<vmem>>, %arg4: memref<1x16xf32, #tpu.memory_space<vmem>>, %arg5: memref<128x16xbf16, #tpu.memory_space<vmem>>, %arg6: memref<128x16xf32, #tpu.memory_space<vmem>>, %arg7: memref<1x16xf32, #tpu.memory_space<vmem>>, %arg8: memref<1x16xf32, #tpu.memory_space<vmem>>) attributes {dimension_semantics = [#tpu.dimension_semantics<arbitrary>], iteration_bounds = array<i64: 1>, scalar_prefetch = 0 : i64, scratch_operands = 3 : i64, tpu.core_type = #tpu.core_type<tc>, window_params = [{transform_indices = @transform_0, window_bounds = array<i64: 128, 72>}, {pipeline_mode = #tpu.pipeline_mode<synchronous>, transform_indices = @transform_1, window_bounds = array<i64: 72, 16>}, {pipeline_mode = #tpu.pipeline_mode<synchronous>, transform_indices = @transform_2, window_bounds = array<i64: 1, 16>}, {pipeline_mode = #tpu.pipeline_mode<synchronous>, transform_indices = @transform_3, window_bounds = array<i64: 1, 16>}, {pipeline_mode = #tpu.pipeline_mode<synchronous>, transform_indices = @transform_4, window_bounds = array<i64: 128, 16>}]} {
    %c0 = arith.constant 0 : index
    %c0_0 = arith.constant 0 : index
    %0 = vector.load %arg1[%c0, %c0_0] : memref<128x72xbf16, #tpu.memory_space<vmem>>, vector<128x72xbf16>
    %c0_1 = arith.constant 0 : index
    %c0_2 = arith.constant 0 : index
    %1 = vector.load %arg2[%c0_1, %c0_2] : memref<72x16xbf16, #tpu.memory_space<vmem>>, vector<72x16xbf16>
    %cst = arith.constant dense<0.000000e+00> : vector<128x16xf32>
    %2 = tpu.matmul %0, %1, %cst {dimension_numbers = #tpu.dot_dimension_numbers<[1], [0], [0], [1], [0, 0, 1, 1], [], []>} : vector<128x72xbf16>, vector<72x16xbf16>, vector<128x16xf32> -> vector<128x16xf32>
    %c128_i32 = arith.constant 128 : i32
    %3 = arith.muli %arg0, %c128_i32 : i32
    %4 = tpu.assume_multiple %3, 128 : i32
    %5 = arith.index_cast %4 : i32 to index
    %c0_3 = arith.constant 0 : index
    %6 = vector.load %arg6[%5, %c0_3] : memref<128x16xf32, #tpu.memory_space<vmem>>, vector<128x16xf32>
    tpu.vector_store %arg6[%5, %c0_3], %2 {strides = array<i32>} : memref<128x16xf32, #tpu.memory_space<vmem>>, vector<128x16xf32>,
    %c0_i32 = arith.constant 0 : i32
    %7 = arith.cmpi eq, %arg0, %c0_i32 : i32
    %8 = arith.extui %7 : i1 to i32
    %c0_i32_4 = arith.constant 0 : i32
    %9 = arith.cmpi ne, %8, %c0_i32_4 : i32
    scf.if %9 {
      %cst_17 = arith.constant 0.000000e+00 : f32
      %24 = vector.broadcast %cst_17 : f32 to vector<1x16xf32>
      %c0_18 = arith.constant 0 : index
      %c0_19 = arith.constant 0 : index
      %25 = vector.load %arg7[%c0_18, %c0_19] : memref<1x16xf32, #tpu.memory_space<vmem>>, vector<1x16xf32>
      tpu.vector_store %arg7[%c0_18, %c0_19], %24 {strides = array<i32>} : memref<1x16xf32, #tpu.memory_space<vmem>>, vector<1x16xf32>,
      %cst_20 = arith.constant 0.000000e+00 : f32
      %26 = vector.broadcast %cst_20 : f32 to vector<1x16xf32>
      %c0_21 = arith.constant 0 : index
      %c0_22 = arith.constant 0 : index
      %27 = vector.load %arg8[%c0_21, %c0_22] : memref<1x16xf32, #tpu.memory_space<vmem>>, vector<1x16xf32>
      tpu.vector_store %arg8[%c0_21, %c0_22], %26 {strides = array<i32>} : memref<1x16xf32, #tpu.memory_space<vmem>>, vector<1x16xf32>,
    } else {
    }
    %c0_5 = arith.constant 0 : index
    %c0_6 = arith.constant 0 : index
    %10 = vector.load %arg7[%c0_5, %c0_6] : memref<1x16xf32, #tpu.memory_space<vmem>>, vector<1x16xf32>
    %cst_7 = arith.constant dense<0.000000e+00> : vector<16xf32>
    %11 = vector.multi_reduction <add>, %2, %cst_7 [0] : vector<128x16xf32> to vector<16xf32>
    %12 = vector.shape_cast %11 : vector<16xf32> to vector<1x16xf32>
    %13 = arith.addf %10, %12 : vector<1x16xf32>
    %c0_8 = arith.constant 0 : index
    %c0_9 = arith.constant 0 : index
    %14 = vector.load %arg7[%c0_8, %c0_9] : memref<1x16xf32, #tpu.memory_space<vmem>>, vector<1x16xf32>
    tpu.vector_store %arg7[%c0_8, %c0_9], %13 {strides = array<i32>} : memref<1x16xf32, #tpu.memory_space<vmem>>, vector<1x16xf32>,
    %c0_10 = arith.constant 0 : index
    %c0_11 = arith.constant 0 : index
    %15 = vector.load %arg8[%c0_10, %c0_11] : memref<1x16xf32, #tpu.memory_space<vmem>>, vector<1x16xf32>
    %16 = arith.mulf %2, %2 : vector<128x16xf32>
    %cst_12 = arith.constant dense<0.000000e+00> : vector<16xf32>
    %17 = vector.multi_reduction <add>, %16, %cst_12 [0] : vector<128x16xf32> to vector<16xf32>
    %18 = vector.shape_cast %17 : vector<16xf32> to vector<1x16xf32>
    %19 = arith.addf %15, %18 : vector<1x16xf32>
    %c0_13 = arith.constant 0 : index
    %c0_14 = arith.constant 0 : index
    %20 = vector.load %arg8[%c0_13, %c0_14] : memref<1x16xf32, #tpu.memory_space<vmem>>, vector<1x16xf32>
    tpu.vector_store %arg8[%c0_13, %c0_14], %19 {strides = array<i32>} : memref<1x16xf32, #tpu.memory_space<vmem>>, vector<1x16xf32>,
    %c0_i32_15 = arith.constant 0 : i32
    %21 = arith.cmpi eq, %arg0, %c0_i32_15 : i32
    %22 = arith.extui %21 : i1 to i32
    %c0_i32_16 = arith.constant 0 : i32
    %23 = arith.cmpi ne, %22, %c0_i32_16 : i32
    scf.if %23 {
      %c0_17 = arith.constant 0 : index
      %c0_18 = arith.constant 0 : index
      %24 = vector.load %arg7[%c0_17, %c0_18] : memref<1x16xf32, #tpu.memory_space<vmem>>, vector<1x16xf32>
      %cst_19 = arith.constant 7.812500e-03 : f32
      %25 = vector.broadcast %cst_19 : f32 to vector<1x16xf32>
      %26 = arith.mulf %24, %25 : vector<1x16xf32>
      %c0_20 = arith.constant 0 : index
      %c0_21 = arith.constant 0 : index
      %27 = vector.load %arg8[%c0_20, %c0_21] : memref<1x16xf32, #tpu.memory_space<vmem>>, vector<1x16xf32>
      %cst_22 = arith.constant 7.812500e-03 : f32
      %28 = vector.broadcast %cst_22 : f32 to vector<1x16xf32>
      %29 = arith.mulf %27, %28 : vector<1x16xf32>
      %30 = arith.mulf %26, %26 : vector<1x16xf32>
      %31 = arith.subf %29, %30 : vector<1x16xf32>
      %cst_23 = arith.constant 0.000000e+00 : f32
      %32 = vector.broadcast %cst_23 : f32 to vector<1x16xf32>
      %33 = arith.maximumf %31, %32 : vector<1x16xf32>
      %cst_24 = arith.constant 9.99999974E-6 : f32
      %34 = vector.broadcast %cst_24 : f32 to vector<1x16xf32>
      %35 = arith.addf %33, %34 : vector<1x16xf32>
      %36 = math.rsqrt %35 : vector<1x16xf32>
      %c0_25 = arith.constant 0 : index
      %c0_26 = arith.constant 0 : index
      %37 = vector.load %arg3[%c0_25, %c0_26] : memref<1x16xf32, #tpu.memory_space<vmem>>, vector<1x16xf32>
      %38 = arith.mulf %36, %37 : vector<1x16xf32>
      %c0_27 = arith.constant 0 : index
      %c0_28 = arith.constant 0 : index
      %39 = vector.load %arg4[%c0_27, %c0_28] : memref<1x16xf32, #tpu.memory_space<vmem>>, vector<1x16xf32>
      %40 = arith.mulf %26, %38 : vector<1x16xf32>
      %41 = arith.subf %39, %40 : vector<1x16xf32>
      %c0_29 = arith.constant 0 : index
      %c0_30 = arith.constant 0 : index
      %42 = vector.load %arg6[%c0_29, %c0_30] : memref<128x16xf32, #tpu.memory_space<vmem>>, vector<128x16xf32>
      %43 = vector.broadcast %38 : vector<1x16xf32> to vector<128x16xf32>
      %44 = arith.mulf %42, %43 : vector<128x16xf32>
      %45 = vector.broadcast %41 : vector<1x16xf32> to vector<128x16xf32>
      %46 = arith.addf %44, %45 : vector<128x16xf32>
      %cst_31 = arith.constant 0.000000e+00 : f32
      %47 = vector.broadcast %cst_31 : f32 to vector<128x16xf32>
      %48 = arith.cmpf ogt, %46, %47 : vector<128x16xf32>
      %cst_32 = arith.constant 0.00999999977 : f32
      %49 = vector.broadcast %cst_32 : f32 to vector<128x16xf32>
      %50 = arith.mulf %49, %46 : vector<128x16xf32>
      %51 = arith.select %48, %46, %50 : vector<128x16xi1>, vector<128x16xf32>
      %52 = arith.truncf %51 : vector<128x16xf32> to vector<128x16xbf16>
      %c0_33 = arith.constant 0 : index
      %c0_34 = arith.constant 0 : index
      %53 = vector.load %arg5[%c0_33, %c0_34] : memref<128x16xbf16, #tpu.memory_space<vmem>>, vector<128x16xbf16>
      tpu.vector_store %arg5[%c0_33, %c0_34], %52 {strides = array<i32>} : memref<128x16xbf16, #tpu.memory_space<vmem>>, vector<128x16xbf16>,
    } else {
    }
    return
  }
  func.func @transform_0(%arg0: i32) -> (i32, i32) {
    %c0_i32 = arith.constant 0 : i32
    %c0_i32_0 = arith.constant 0 : i32
    return %arg0, %c0_i32 : i32, i32
  }
  func.func @transform_1(%arg0: i32) -> (i32, i32) {
    %c0_i32 = arith.constant 0 : i32
    %c0_i32_0 = arith.constant 0 : i32
    %c0_i32_1 = arith.constant 0 : i32
    return %c0_i32, %c0_i32_0 : i32, i32
  }
  func.func @transform_2(%arg0: i32) -> (i32, i32) {
    %c0_i32 = arith.constant 0 : i32
    %c0_i32_0 = arith.constant 0 : i32
    %c0_i32_1 = arith.constant 0 : i32
    return %c0_i32, %c0_i32_0 : i32, i32
  }
  func.func @transform_3(%arg0: i32) -> (i32, i32) {
    %c0_i32 = arith.constant 0 : i32
    %c0_i32_0 = arith.constant 0 : i32
    %c0_i32_1 = arith.constant 0 : i32
    return %c0_i32, %c0_i32_0 : i32, i32
  }
  func.func @transform_4(%arg0: i32) -> (i32, i32) {
    %c0_i32 = arith.constant 0 : i32
    %c0_i32_0 = arith.constant 0 : i32
    %c0_i32_1 = arith.constant 0 : i32
    return %c0_i32, %c0_i32_0 : i32, i32
  }
}

module attributes {stable_mosaic.version = 11 : i64} {
  func.func @linear_kernel(%arg0: i32, %arg1: memref<2x1024xbf16, #tpu.memory_space<vmem>>, %arg2: memref<1024x10xbf16, #tpu.memory_space<vmem>>, %arg3: memref<1x10xf32, #tpu.memory_space<vmem>>, %arg4: memref<2x10xf32, #tpu.memory_space<vmem>>) attributes {dimension_semantics = [#tpu.dimension_semantics<arbitrary>], iteration_bounds = array<i64: 1>, scalar_prefetch = 0 : i64, scratch_operands = 0 : i64, tpu.core_type = #tpu.core_type<tc>, window_params = [{pipeline_mode = #tpu.pipeline_mode<synchronous>, transform_indices = @transform_0, window_bounds = array<i64: 2, 1024>}, {pipeline_mode = #tpu.pipeline_mode<synchronous>, transform_indices = @transform_1, window_bounds = array<i64: 1024, 10>}, {pipeline_mode = #tpu.pipeline_mode<synchronous>, transform_indices = @transform_2, window_bounds = array<i64: 1, 10>}, {pipeline_mode = #tpu.pipeline_mode<synchronous>, transform_indices = @transform_3, window_bounds = array<i64: 2, 10>}]} {
    %c0 = arith.constant 0 : index
    %c0_0 = arith.constant 0 : index
    %0 = vector.load %arg1[%c0, %c0_0] : memref<2x1024xbf16, #tpu.memory_space<vmem>>, vector<2x1024xbf16>
    %c0_1 = arith.constant 0 : index
    %c0_2 = arith.constant 0 : index
    %1 = vector.load %arg2[%c0_1, %c0_2] : memref<1024x10xbf16, #tpu.memory_space<vmem>>, vector<1024x10xbf16>
    %cst = arith.constant dense<0.000000e+00> : vector<2x10xf32>
    %2 = tpu.matmul %0, %1, %cst {dimension_numbers = #tpu.dot_dimension_numbers<[1], [0], [0], [1], [0, 0, 1, 1], [], []>} : vector<2x1024xbf16>, vector<1024x10xbf16>, vector<2x10xf32> -> vector<2x10xf32>
    %c0_3 = arith.constant 0 : index
    %c0_4 = arith.constant 0 : index
    %3 = vector.load %arg3[%c0_3, %c0_4] : memref<1x10xf32, #tpu.memory_space<vmem>>, vector<1x10xf32>
    %4 = vector.broadcast %3 : vector<1x10xf32> to vector<2x10xf32>
    %5 = arith.addf %2, %4 : vector<2x10xf32>
    %c0_5 = arith.constant 0 : index
    %c0_6 = arith.constant 0 : index
    %6 = vector.load %arg4[%c0_5, %c0_6] : memref<2x10xf32, #tpu.memory_space<vmem>>, vector<2x10xf32>
    tpu.vector_store %arg4[%c0_5, %c0_6], %5 {strides = array<i32>} : memref<2x10xf32, #tpu.memory_space<vmem>>, vector<2x10xf32>,
    return
  }
  func.func @transform_0(%arg0: i32) -> (i32, i32) {
    %c0_i32 = arith.constant 0 : i32
    %c0_i32_0 = arith.constant 0 : i32
    %c0_i32_1 = arith.constant 0 : i32
    return %c0_i32, %c0_i32_0 : i32, i32
  }
  func.func @transform_1(%arg0: i32) -> (i32, i32) {
    %c0_i32 = arith.constant 0 : i32
    %c0_i32_0 = arith.constant 0 : i32
    %c0_i32_1 = arith.constant 0 : i32
    return %c0_i32, %c0_i32_0 : i32, i32
  }
  func.func @transform_2(%arg0: i32) -> (i32, i32) {
    %c0_i32 = arith.constant 0 : i32
    %c0_i32_0 = arith.constant 0 : i32
    %c0_i32_1 = arith.constant 0 : i32
    return %c0_i32, %c0_i32_0 : i32, i32
  }
  func.func @transform_3(%arg0: i32) -> (i32, i32) {
    %c0_i32 = arith.constant 0 : i32
    %c0_i32_0 = arith.constant 0 : i32
    %c0_i32_1 = arith.constant 0 : i32
    return %c0_i32, %c0_i32_0 : i32, i32
  }
}

</mosaic_0001>

<bundles_post_ra>
// kernel: base_model_forward.3
= control target key start
LH: loop header
LB: loop body
LE: loop exit
PB: predicated region body
PF: predicated region fallthrough
CT: control target
= control target key end

     0   :  { %vm354_vm0 = vcmask 1044480   ;;  %vm355_vm1 = vcmask 1045504   ;;  %vm257_vm2 = vcmask 220160   ;;  %v2137_v1 = vmov 65535   ;;  %s4121_s1 = inlined_call_operand.vmem [shape: bf16[27,8], index: 1, kind: input, shape index: {}]   ;;  %s4122_s0 = inlined_call_operand.vmem [shape: bf16[512,27], index: 0, kind: input, shape index: {}]   ;;  %s4123_s2 = inlined_call_operand.vmem [shape: f32[1,8], index: 2, kind: input, shape index: {}]   ;;  %s4124_s3 = inlined_call_operand.vmem [shape: f32[1,8], index: 3, kind: input, shape index: {}]   ;;  %s4125_s4 = inlined_call_operand.vmem [shape: bf16[512,8], index: 4, kind: output, shape index: {}]  }
   0x1   :  { %v2101_v0 = vld [vmem:[%s4121_s1] sm:$0xff]   ;;  %v356_v2 = vsel %vm354_vm0, 4294967295, %v2137_v1  ;;  %v2102_v3 = vld [vmem:[%s4121_s1 + $0x8] sm:$0x3f]   ;;  %v2105_v8 = vld [vmem:[%s4122_s0 + $0x10] sm:$0xff]   ;;  %vm721_vm3 = vcmask 57344  }
   0x2   :  { %2027 = vmatprep.subr.bf16.mxu0 %v2101_v0  ;;  %v357_v4 = vsel %vm355_vm1, %v356_v2, 0  ;;  %v2103_v5 = vld [vmem:[%s4122_s0] sm:$0xff]   ;;  %2095 = vmatprep.subr.bf16.mxu1 %v2101_v0  ;;  %v2104_v7 = vld [vmem:[%s4122_s0 + $0x8] sm:$0xff]   ;;  %v2106_v9 = vld [vmem:[%s4122_s0 + $0x18] sm:$0xff]   ;;  %vm652_vm4 = vcmask 64512   ;;  %v2138_v38 = vmov 0.0  }
   0x3   :  { %2028 = vmatpush3.bf16.msra.mxu0 %v2101_v0  ;;  %v359_v6 = vand.u32 %v2102_v3, %v357_v4  ;;  %2097 = vmatpush3.bf16.msra.mxu1 %v2101_v0  ;;  %v2107_v10 = vld [vmem:[%s4122_s0 + $0x20] sm:$0xff]   ;;  %v2120_v12 = vld [vmem:[%s4122_s0 + $0x88] sm:$0xff]   ;;  %v2121_v13 = vld [vmem:[%s4122_s0 + $0x90] sm:$0xff]   ;;  %722 = vst.msk [vmem:[#allocation3] sm:$0x1] %vm721_vm3, %v2138_v38 }
   0x4   :  { %2031 = vmatprep.mubr.msk.bf16.mxu0 %vm257_vm2, %v2103_v5  ;;  %v2119_v11 = vld [vmem:[%s4122_s0 + $0x80] sm:$0xff]   ;;  %v2108_v14 = vld [vmem:[%s4122_s0 + $0x28] sm:$0xff]   ;;  %v2109_v15 = vld [vmem:[%s4122_s0 + $0x30] sm:$0xff]   ;;  %723 = vst.msk [vmem:[#allocation4] sm:$0x1] %vm721_vm3, %v2138_v38 }
   0x5   :  { %2029 = vmatprep.subr.bf16.mxu0 %v359_v6  ;;  %2096 = vmatprep.subr.bf16.mxu1 %v359_v6  ;;  %v2122_v16 = vld [vmem:[%s4122_s0 + $0x98] sm:$0xff]   ;;  %v2123_v17 = vld [vmem:[%s4122_s0 + $0xa0] sm:$0xff]   ;;  %v2124_v20 = vld [vmem:[%s4122_s0 + $0xa8] sm:$0xff]  }
   0x6   :  { %2063 = vmatprep.mubr.msk.bf16.mxu1 %vm257_vm2, %v2119_v11  ;;  %v2110_v18 = vld [vmem:[%s4122_s0 + $0x38] sm:$0xff]   ;;  %v2111_v19 = vld [vmem:[%s4122_s0 + $0x40] sm:$0xff]   ;;  %v2125_v21 = vld [vmem:[%s4122_s0 + $0xb0] sm:$0xff]  }
   0x7   :  { %2030 = vmatpush3.bf16.msra.mxu0 %v359_v6  ;;  %2098 = vmatpush3.bf16.msra.mxu1 %v359_v6  ;;  %v2112_v22 = vld [vmem:[%s4122_s0 + $0x48] sm:$0xff]   ;;  %v2113_v23 = vld [vmem:[%s4122_s0 + $0x50] sm:$0xff]   ;;  %v2126_v24 = vld [vmem:[%s4122_s0 + $0xb8] sm:$0xff]  }
   0x8   :  { %v2127_v25 = vld [vmem:[%s4122_s0 + $0xc0] sm:$0xff]   ;;  %v2114_v26 = vld [vmem:[%s4122_s0 + $0x58] sm:$0xff]   ;;  %v2128_v28 = vld [vmem:[%s4122_s0 + $0xc8] sm:$0xff]  }
   0x9   :  { %v2115_v27 = vld [vmem:[%s4122_s0 + $0x60] sm:$0xff]   ;;  %v2129_v29 = vld [vmem:[%s4122_s0 + $0xd0] sm:$0xff]   ;;  %v2116_v30 = vld [vmem:[%s4122_s0 + $0x68] sm:$0xff]  }
   0xa   :  { %2032 = vmatmul.mubr.msk.bf16.vlgmr.msra.gmra.mrb[0].mxu0 %vm257_vm2, %v2104_v7  ;;  %2064 = vmatmul.mubr.msk.bf16.vlgmr.msra.gmra.mrb[0].mxu1 %vm257_vm2, %v2120_v12  ;;  %v2117_v31 = vld [vmem:[%s4122_s0 + $0x70] sm:$0xff]   ;;  %v2130_v32 = vld [vmem:[%s4122_s0 + $0xd8] sm:$0xff]   ;;  %v2131_v33 = vld [vmem:[%s4122_s0 + $0xe0] sm:$0xff]  }
   0xb   :  { %2035 = vmatprep.mubr.msk.bf16.mxu0 %vm257_vm2, %v2105_v8  ;;  %2067 = vmatprep.mubr.msk.bf16.mxu1 %vm257_vm2, %v2121_v13  ;;  %v2118_v34 = vld [vmem:[%s4122_s0 + $0x78] sm:$0xff]   ;;  %v2132_v35 = vld [vmem:[%s4122_s0 + $0xe8] sm:$0xff]   ;;  %v2133_v36 = vld [vmem:[%s4122_s0 + $0xf0] sm:$0xff]  }
   0xc   :  { %v2134_v37 = vld [vmem:[%s4122_s0 + $0xf8] sm:$0xff]  }
  0x12   :  { %2036 = vmatmul.mubr.msk.bf16.gmra.mrb[4].mxu0 %vm257_vm2, %v2106_v9  ;;  %2068 = vmatmul.mubr.msk.bf16.gmra.mrb[4].mxu1 %vm257_vm2, %v2122_v16 }
  0x13   :  { %2039 = vmatprep.mubr.msk.bf16.mxu0 %vm257_vm2, %v2107_v10  ;;  %2071 = vmatprep.mubr.msk.bf16.mxu1 %vm257_vm2, %v2123_v17 }
  0x1a   :  { %2040 = vmatmul.mubr.msk.bf16.gmra.mrb[8].mxu0 %vm257_vm2, %v2108_v14  ;;  %2072 = vmatmul.mubr.msk.bf16.gmra.mrb[8].mxu1 %vm257_vm2, %v2124_v20 }
  0x1b   :  { %2043 = vmatprep.mubr.msk.bf16.mxu0 %vm257_vm2, %v2109_v15  ;;  %2075 = vmatprep.mubr.msk.bf16.mxu1 %vm257_vm2, %v2125_v21 }
  0x22   :  { %2044 = vmatmul.mubr.msk.bf16.gmra.mrb[12].mxu0 %vm257_vm2, %v2110_v18  ;;  %2076 = vmatmul.mubr.msk.bf16.gmra.mrb[12].mxu1 %vm257_vm2, %v2126_v24 }
  0x23   :  { %2047 = vmatprep.mubr.msk.bf16.mxu0 %vm257_vm2, %v2111_v19  ;;  %2079 = vmatprep.mubr.msk.bf16.mxu1 %vm257_vm2, %v2127_v25 }
  0x2a   :  { %2048 = vmatmul.mubr.msk.bf16.gmra.mrb[16].mxu0 %vm257_vm2, %v2112_v22  ;;  %2080 = vmatmul.mubr.msk.bf16.gmra.mrb[16].mxu1 %vm257_vm2, %v2128_v28 }
  0x2b   :  { %2051 = vmatprep.mubr.msk.bf16.mxu0 %vm257_vm2, %v2113_v23  ;;  %2083 = vmatprep.mubr.msk.bf16.mxu1 %vm257_vm2, %v2129_v29 }
  0x32   :  { %2052 = vmatmul.mubr.msk.bf16.gmra.mrb[20].mxu0 %vm257_vm2, %v2114_v26  ;;  %2084 = vmatmul.mubr.msk.bf16.gmra.mrb[20].mxu1 %vm257_vm2, %v2130_v32 }
  0x33   :  { %2055 = vmatprep.mubr.msk.bf16.mxu0 %vm257_vm2, %v2115_v27  ;;  %2087 = vmatprep.mubr.msk.bf16.mxu1 %vm257_vm2, %v2131_v33 }
  0x3a   :  { %2056 = vmatmul.mubr.msk.bf16.gmra.mrb[24].mxu0 %vm257_vm2, %v2116_v30  ;;  %2088 = vmatmul.mubr.msk.bf16.gmra.mrb[24].mxu1 %vm257_vm2, %v2132_v35 }
  0x3b   :  { %2059 = vmatprep.mubr.msk.bf16.mxu0 %vm257_vm2, %v2117_v31  ;;  %2091 = vmatprep.mubr.msk.bf16.mxu1 %vm257_vm2, %v2133_v36 }
  0x42   :  { %2060 = vmatmul.mubr.msk.bf16.gmra.mrb[28].mxu0 %vm257_vm2, %v2118_v34  ;;  %2092 = vmatmul.mubr.msk.bf16.gmra.mrb[28].mxu1 %vm257_vm2, %v2134_v37 }
  0xdd   :  { %v2033_v39 = vpop.f32.mrb[0].mxu0  ;;  %v2316_v4 = vpop.f32.mrb[0].mxu1 }
  0xde   :  { %655 = vst.msk [vmem:[#allocation2 + $0x10] sm:$0xff] %vm652_vm4, %v2033_v39  ;;  %v395_v40 = vpop.f32.mrb[1].mxu0  ;;  %v864_v44 = vmul.f32 %v2033_v39, %v2033_v39  ;;  %v728_v49 = vsel %vm652_vm4, %v2033_v39, 0.0  ;;  %687 = vst.msk [vmem:[#allocation2 + $0x110] sm:$0xff] %vm652_vm4, %v2316_v4  ;;  %v2323_v9 = vpop.f32.mrb[1].mxu1 }
  0xdf   :  { %653 = vst.msk [vmem:[#allocation2] sm:$0xff] %vm652_vm4, %v395_v40  ;;  %v862_v41 = vmul.f32 %v395_v40, %v395_v40  ;;  %v2034_v42 = vpop.f32.mrb[2].mxu0  ;;  %v725_v45 = vsel %vm652_vm4, %v395_v40, 0.0  ;;  %685 = vst.msk [vmem:[#allocation2 + $0x100] sm:$0xff] %vm652_vm4, %v2323_v9  ;;  %v2327_v12 = vpop.f32.mrb[2].mxu1 }
  0xe0   :  { %656 = vst.msk [vmem:[#allocation2 + $0x18] sm:$0xff] %vm652_vm4, %v2034_v42  ;;  %v398_v43 = vpop.f32.mrb[3].mxu0  ;;  %v865_v51 = vmul.f32 %v2034_v42, %v2034_v42  ;;  %v929_v55 = vsel %vm652_vm4, %v864_v44, 0.0  ;;  %v730_v56 = vsel %vm652_vm4, %v2034_v42, 0.0  ;;  %688 = vst.msk [vmem:[#allocation2 + $0x118] sm:$0xff] %vm652_vm4, %v2327_v12  ;;  %v2333_v16 = vpop.f32.mrb[3].mxu1 }
  0xe1   :  { %654 = vst.msk [vmem:[#allocation2 + $0x8] sm:$0xff] %vm652_vm4, %v398_v43  ;;  %v726_v46 = vsel %vm652_vm4, %v398_v43, 0.0  ;;  %v863_v47 = vmul.f32 %v398_v43, %v398_v43  ;;  %v926_v50 = vsel %vm652_vm4, %v862_v41, 0.0  ;;  %686 = vst.msk [vmem:[#allocation2 + $0x108] sm:$0xff] %vm652_vm4, %v2333_v16 }
  0xe2   :  { %v727_v48 = vadd.f32 %v726_v46, %v725_v45  ;;  %v931_v61 = vsel %vm652_vm4, %v865_v51, 0.0 }
  0xe3   :  { %v927_v52 = vsel %vm652_vm4, %v863_v47, 0.0 }
  0xe4   :  { %v729_v53 = vadd.f32 %v728_v49, %v727_v48  ;;  %v928_v54 = vadd.f32 %v927_v52, %v926_v50 }
  0xe5   :  { %v2037_v57 = vpop.f32.mrb[4].mxu0  ;;  %v2344_v32 = vpop.f32.mrb[4].mxu1 }
  0xe6   :  { %v930_v58 = vadd.f32 %v929_v55, %v928_v54  ;;  %659 = vst.msk [vmem:[#allocation2 + $0x30] sm:$0xff] %vm652_vm4, %v2037_v57  ;;  %v411_v59 = vpop.f32.mrb[5].mxu0  ;;  %v731_v60 = vadd.f32 %v730_v56, %v729_v53  ;;  %v868_v5 = vmul.f32 %v2037_v57, %v2037_v57  ;;  %v736_v13 = vsel %vm652_vm4, %v2037_v57, 0.0  ;;  %691 = vst.msk [vmem:[#allocation2 + $0x130] sm:$0xff] %vm652_vm4, %v2344_v32  ;;  %v2351_v37 = vpop.f32.mrb[5].mxu1 }
  0xe7   :  { %657 = vst.msk [vmem:[#allocation2 + $0x20] sm:$0xff] %vm652_vm4, %v411_v59  ;;  %v732_v62 = vsel %vm652_vm4, %v411_v59, 0.0  ;;  %v866_v63 = vmul.f32 %v411_v59, %v411_v59  ;;  %v2038_v0 = vpop.f32.mrb[6].mxu0  ;;  %689 = vst.msk [vmem:[#allocation2 + $0x120] sm:$0xff] %vm652_vm4, %v2351_v37  ;;  %v2355_v40 = vpop.f32.mrb[6].mxu1 }
  0xe8   :  { %v733_v1 = vadd.f32 %v732_v62, %v731_v60  ;;  %v932_v2 = vadd.f32 %v931_v61, %v930_v58  ;;  %660 = vst.msk [vmem:[#allocation2 + $0x38] sm:$0xff] %vm652_vm4, %v2038_v0  ;;  %v414_v3 = vpop.f32.mrb[7].mxu0  ;;  %v869_v14 = vmul.f32 %v2038_v0, %v2038_v0  ;;  %v937_v19 = vsel %vm652_vm4, %v868_v5, 0.0  ;;  %692 = vst.msk [vmem:[#allocation2 + $0x138] sm:$0xff] %vm652_vm4, %v2355_v40  ;;  %v2361_v44 = vpop.f32.mrb[7].mxu1 }
  0xe9   :  { %v933_v6 = vsel %vm652_vm4, %v866_v63, 0.0  ;;  %658 = vst.msk [vmem:[#allocation2 + $0x28] sm:$0xff] %vm652_vm4, %v414_v3  ;;  %v734_v7 = vsel %vm652_vm4, %v414_v3, 0.0  ;;  %v867_v8 = vmul.f32 %v414_v3, %v414_v3  ;;  %v738_v20 = vsel %vm652_vm4, %v2038_v0, 0.0  ;;  %690 = vst.msk [vmem:[#allocation2 + $0x128] sm:$0xff] %vm652_vm4, %v2361_v44 }
  0xea   :  { %v934_v10 = vadd.f32 %v933_v6, %v932_v2  ;;  %v735_v11 = vadd.f32 %v734_v7, %v733_v1  ;;  %v939_v25 = vsel %vm652_vm4, %v869_v14, 0.0 }
  0xeb   :  { %v935_v15 = vsel %vm652_vm4, %v867_v8, 0.0 }
  0xec   :  { %v737_v17 = vadd.f32 %v736_v13, %v735_v11  ;;  %v936_v18 = vadd.f32 %v935_v15, %v934_v10 }
  0xed   :  { %v2041_v21 = vpop.f32.mrb[8].mxu0  ;;  %v2372_v60 = vpop.f32.mrb[8].mxu1 }
  0xee   :  { %v938_v22 = vadd.f32 %v937_v19, %v936_v18  ;;  %663 = vst.msk [vmem:[#allocation2 + $0x50] sm:$0xff] %vm652_vm4, %v2041_v21  ;;  %v427_v23 = vpop.f32.mrb[9].mxu0  ;;  %v739_v24 = vadd.f32 %v738_v20, %v737_v17  ;;  %v872_v33 = vmul.f32 %v2041_v21, %v2041_v21  ;;  %v744_v41 = vsel %vm652_vm4, %v2041_v21, 0.0  ;;  %695 = vst.msk [vmem:[#allocation2 + $0x150] sm:$0xff] %vm652_vm4, %v2372_v60  ;;  %v2379_v1 = vpop.f32.mrb[9].mxu1 }
  0xef   :  { %661 = vst.msk [vmem:[#allocation2 + $0x40] sm:$0xff] %vm652_vm4, %v427_v23  ;;  %v740_v26 = vsel %vm652_vm4, %v427_v23, 0.0  ;;  %v870_v27 = vmul.f32 %v427_v23, %v427_v23  ;;  %v2042_v28 = vpop.f32.mrb[10].mxu0  ;;  %693 = vst.msk [vmem:[#allocation2 + $0x140] sm:$0xff] %vm652_vm4, %v2379_v1  ;;  %v2383_v5 = vpop.f32.mrb[10].mxu1 }
  0xf0   :  { %v741_v29 = vadd.f32 %v740_v26, %v739_v24  ;;  %v940_v30 = vadd.f32 %v939_v25, %v938_v22  ;;  %664 = vst.msk [vmem:[#allocation2 + $0x58] sm:$0xff] %vm652_vm4, %v2042_v28  ;;  %v430_v31 = vpop.f32.mrb[11].mxu0  ;;  %v873_v42 = vmul.f32 %v2042_v28, %v2042_v28  ;;  %v945_v47 = vsel %vm652_vm4, %v872_v33, 0.0  ;;  %696 = vst.msk [vmem:[#allocation2 + $0x158] sm:$0xff] %vm652_vm4, %v2383_v5  ;;  %v2389_v10 = vpop.f32.mrb[11].mxu1 }
  0xf1   :  { %v941_v34 = vsel %vm652_vm4, %v870_v27, 0.0  ;;  %662 = vst.msk [vmem:[#allocation2 + $0x48] sm:$0xff] %vm652_vm4, %v430_v31  ;;  %v742_v35 = vsel %vm652_vm4, %v430_v31, 0.0  ;;  %v871_v36 = vmul.f32 %v430_v31, %v430_v31  ;;  %v746_v48 = vsel %vm652_vm4, %v2042_v28, 0.0  ;;  %694 = vst.msk [vmem:[#allocation2 + $0x148] sm:$0xff] %vm652_vm4, %v2389_v10 }
  0xf2   :  { %v942_v38 = vadd.f32 %v941_v34, %v940_v30  ;;  %v743_v39 = vadd.f32 %v742_v35, %v741_v29  ;;  %v947_v53 = vsel %vm652_vm4, %v873_v42, 0.0 }
  0xf3   :  { %v943_v43 = vsel %vm652_vm4, %v871_v36, 0.0 }
  0xf4   :  { %v745_v45 = vadd.f32 %v744_v41, %v743_v39  ;;  %v944_v46 = vadd.f32 %v943_v43, %v942_v38 }
  0xf5   :  { %v2045_v49 = vpop.f32.mrb[12].mxu0  ;;  %v2400_v28 = vpop.f32.mrb[12].mxu1 }
  0xf6   :  { %v946_v50 = vadd.f32 %v945_v47, %v944_v46  ;;  %667 = vst.msk [vmem:[#allocation2 + $0x70] sm:$0xff] %vm652_vm4, %v2045_v49  ;;  %v443_v51 = vpop.f32.mrb[13].mxu0  ;;  %v747_v52 = vadd.f32 %v746_v48, %v745_v45  ;;  %v876_v61 = vmul.f32 %v2045_v49, %v2045_v49  ;;  %v752_v6 = vsel %vm652_vm4, %v2045_v49, 0.0  ;;  %699 = vst.msk [vmem:[#allocation2 + $0x170] sm:$0xff] %vm652_vm4, %v2400_v28  ;;  %v2407_v34 = vpop.f32.mrb[13].mxu1 }
  0xf7   :  { %665 = vst.msk [vmem:[#allocation2 + $0x60] sm:$0xff] %vm652_vm4, %v443_v51  ;;  %v748_v54 = vsel %vm652_vm4, %v443_v51, 0.0  ;;  %v874_v55 = vmul.f32 %v443_v51, %v443_v51  ;;  %v2046_v56 = vpop.f32.mrb[14].mxu0  ;;  %697 = vst.msk [vmem:[#allocation2 + $0x160] sm:$0xff] %vm652_vm4, %v2407_v34  ;;  %v2411_v38 = vpop.f32.mrb[14].mxu1 }
  0xf8   :  { %v749_v57 = vadd.f32 %v748_v54, %v747_v52  ;;  %v948_v58 = vadd.f32 %v947_v53, %v946_v50  ;;  %668 = vst.msk [vmem:[#allocation2 + $0x78] sm:$0xff] %vm652_vm4, %v2046_v56  ;;  %v446_v59 = vpop.f32.mrb[15].mxu0  ;;  %v877_v7 = vmul.f32 %v2046_v56, %v2046_v56  ;;  %v953_v14 = vsel %vm652_vm4, %v876_v61, 0.0  ;;  %700 = vst.msk [vmem:[#allocation2 + $0x178] sm:$0xff] %vm652_vm4, %v2411_v38  ;;  %v2417_v43 = vpop.f32.mrb[15].mxu1 }
  0xf9   :  { %v949_v62 = vsel %vm652_vm4, %v874_v55, 0.0  ;;  %666 = vst.msk [vmem:[#allocation2 + $0x68] sm:$0xff] %vm652_vm4, %v446_v59  ;;  %v750_v63 = vsel %vm652_vm4, %v446_v59, 0.0  ;;  %v875_v0 = vmul.f32 %v446_v59, %v446_v59  ;;  %v754_v15 = vsel %vm652_vm4, %v2046_v56, 0.0  ;;  %698 = vst.msk [vmem:[#allocation2 + $0x168] sm:$0xff] %vm652_vm4, %v2417_v43 }
  0xfa   :  { %v950_v2 = vadd.f32 %v949_v62, %v948_v58  ;;  %v751_v3 = vadd.f32 %v750_v63, %v749_v57  ;;  %v955_v21 = vsel %vm652_vm4, %v877_v7, 0.0 }
  0xfb   :  { %v951_v8 = vsel %vm652_vm4, %v875_v0, 0.0 }
  0xfc   :  { %v753_v11 = vadd.f32 %v752_v6, %v751_v3  ;;  %v952_v13 = vadd.f32 %v951_v8, %v950_v2 }
  0xfd   :  { %v2049_v17 = vpop.f32.mrb[16].mxu0  ;;  %v2428_v61 = vpop.f32.mrb[16].mxu1 }
  0xfe   :  { %v954_v18 = vadd.f32 %v953_v14, %v952_v13  ;;  %671 = vst.msk [vmem:[#allocation2 + $0x90] sm:$0xff] %vm652_vm4, %v2049_v17  ;;  %v459_v19 = vpop.f32.mrb[17].mxu0  ;;  %v755_v20 = vadd.f32 %v754_v15, %v753_v11  ;;  %v880_v29 = vmul.f32 %v2049_v17, %v2049_v17  ;;  %v760_v39 = vsel %vm652_vm4, %v2049_v17, 0.0  ;;  %703 = vst.msk [vmem:[#allocation2 + $0x190] sm:$0xff] %vm652_vm4, %v2428_v61  ;;  %v2435_v3 = vpop.f32.mrb[17].mxu1 }
  0xff   :  { %669 = vst.msk [vmem:[#allocation2 + $0x80] sm:$0xff] %vm652_vm4, %v459_v19  ;;  %v756_v22 = vsel %vm652_vm4, %v459_v19, 0.0  ;;  %v878_v23 = vmul.f32 %v459_v19, %v459_v19  ;;  %v2050_v24 = vpop.f32.mrb[18].mxu0  ;;  %701 = vst.msk [vmem:[#allocation2 + $0x180] sm:$0xff] %vm652_vm4, %v2435_v3  ;;  %v2439_v8 = vpop.f32.mrb[18].mxu1 }
 0x100   :  { %v757_v25 = vadd.f32 %v756_v22, %v755_v20  ;;  %v956_v26 = vadd.f32 %v955_v21, %v954_v18  ;;  %672 = vst.msk [vmem:[#allocation2 + $0x98] sm:$0xff] %vm652_vm4, %v2050_v24  ;;  %v462_v27 = vpop.f32.mrb[19].mxu0  ;;  %v881_v41 = vmul.f32 %v2050_v24, %v2050_v24  ;;  %v961_v47 = vsel %vm652_vm4, %v880_v29, 0.0  ;;  %704 = vst.msk [vmem:[#allocation2 + $0x198] sm:$0xff] %vm652_vm4, %v2439_v8  ;;  %v2445_v15 = vpop.f32.mrb[19].mxu1 }
 0x101   :  { %v957_v30 = vsel %vm652_vm4, %v878_v23, 0.0  ;;  %670 = vst.msk [vmem:[#allocation2 + $0x88] sm:$0xff] %vm652_vm4, %v462_v27  ;;  %v758_v31 = vsel %vm652_vm4, %v462_v27, 0.0  ;;  %v879_v33 = vmul.f32 %v462_v27, %v462_v27  ;;  %v762_v48 = vsel %vm652_vm4, %v2050_v24, 0.0  ;;  %702 = vst.msk [vmem:[#allocation2 + $0x188] sm:$0xff] %vm652_vm4, %v2445_v15 }
 0x102   :  { %v958_v35 = vadd.f32 %v957_v30, %v956_v26  ;;  %v759_v36 = vadd.f32 %v758_v31, %v757_v25  ;;  %v963_v53 = vsel %vm652_vm4, %v881_v41, 0.0 }
 0x103   :  { %v959_v42 = vsel %vm652_vm4, %v879_v33, 0.0 }
 0x104   :  { %v761_v45 = vadd.f32 %v760_v39, %v759_v36  ;;  %v960_v46 = vadd.f32 %v959_v42, %v958_v35 }
 0x105   :  { %v2053_v49 = vpop.f32.mrb[20].mxu0  ;;  %v2456_v35 = vpop.f32.mrb[20].mxu1 }
 0x106   :  { %v962_v50 = vadd.f32 %v961_v47, %v960_v46  ;;  %675 = vst.msk [vmem:[#allocation2 + $0xb0] sm:$0xff] %vm652_vm4, %v2053_v49  ;;  %v475_v51 = vpop.f32.mrb[21].mxu0  ;;  %v763_v52 = vadd.f32 %v762_v48, %v761_v45  ;;  %v884_v62 = vmul.f32 %v2053_v49, %v2053_v49  ;;  %v768_v11 = vsel %vm652_vm4, %v2053_v49, 0.0  ;;  %707 = vst.msk [vmem:[#allocation2 + $0x1b0] sm:$0xff] %vm652_vm4, %v2456_v35  ;;  %v2463_v45 = vpop.f32.mrb[21].mxu1 }
 0x107   :  { %673 = vst.msk [vmem:[#allocation2 + $0xa0] sm:$0xff] %vm652_vm4, %v475_v51  ;;  %v764_v54 = vsel %vm652_vm4, %v475_v51, 0.0  ;;  %v882_v55 = vmul.f32 %v475_v51, %v475_v51  ;;  %v2054_v56 = vpop.f32.mrb[22].mxu0  ;;  %705 = vst.msk [vmem:[#allocation2 + $0x1a0] sm:$0xff] %vm652_vm4, %v2463_v45  ;;  %v2467_v48 = vpop.f32.mrb[22].mxu1 }
 0x108   :  { %v765_v57 = vadd.f32 %v764_v54, %v763_v52  ;;  %v964_v58 = vadd.f32 %v963_v53, %v962_v50  ;;  %676 = vst.msk [vmem:[#allocation2 + $0xb8] sm:$0xff] %vm652_vm4, %v2054_v56  ;;  %v478_v59 = vpop.f32.mrb[23].mxu0  ;;  %v885_v13 = vmul.f32 %v2054_v56, %v2054_v56  ;;  %v969_v19 = vsel %vm652_vm4, %v884_v62, 0.0  ;;  %708 = vst.msk [vmem:[#allocation2 + $0x1b8] sm:$0xff] %vm652_vm4, %v2467_v48  ;;  %v2473_v52 = vpop.f32.mrb[23].mxu1 }
 0x109   :  { %v965_v63 = vsel %vm652_vm4, %v882_v55, 0.0  ;;  %674 = vst.msk [vmem:[#allocation2 + $0xa8] sm:$0xff] %vm652_vm4, %v478_v59  ;;  %v766_v0 = vsel %vm652_vm4, %v478_v59, 0.0  ;;  %v883_v2 = vmul.f32 %v478_v59, %v478_v59  ;;  %v770_v20 = vsel %vm652_vm4, %v2054_v56, 0.0  ;;  %706 = vst.msk [vmem:[#allocation2 + $0x1a8] sm:$0xff] %vm652_vm4, %v2473_v52 }
 0x10a   :  { %v966_v6 = vadd.f32 %v965_v63, %v964_v58  ;;  %v767_v7 = vadd.f32 %v766_v0, %v765_v57  ;;  %v971_v25 = vsel %vm652_vm4, %v885_v13, 0.0 }
 0x10b   :  { %v967_v14 = vsel %vm652_vm4, %v883_v2, 0.0 }
 0x10c   :  { %v769_v17 = vadd.f32 %v768_v11, %v767_v7  ;;  %v968_v18 = vadd.f32 %v967_v14, %v966_v6 }
 0x10d   :  { %v2057_v21 = vpop.f32.mrb[24].mxu0  ;;  %v2484_v14 = vpop.f32.mrb[24].mxu1 }
 0x10e   :  { %v970_v22 = vadd.f32 %v969_v19, %v968_v18  ;;  %679 = vst.msk [vmem:[#allocation2 + $0xd0] sm:$0xff] %vm652_vm4, %v2057_v21  ;;  %v491_v23 = vpop.f32.mrb[25].mxu0  ;;  %v771_v24 = vadd.f32 %v770_v20, %v769_v17  ;;  %v888_v36 = vmul.f32 %v2057_v21, %v2057_v21  ;;  %v776_v49 = vsel %vm652_vm4, %v2057_v21, 0.0  ;;  %711 = vst.msk [vmem:[#allocation2 + $0x1d0] sm:$0xff] %vm652_vm4, %v2484_v14  ;;  %v2491_v21 = vpop.f32.mrb[25].mxu1 }
 0x10f   :  { %677 = vst.msk [vmem:[#allocation2 + $0xc0] sm:$0xff] %vm652_vm4, %v491_v23  ;;  %v772_v26 = vsel %vm652_vm4, %v491_v23, 0.0  ;;  %v886_v27 = vmul.f32 %v491_v23, %v491_v23  ;;  %v2058_v29 = vpop.f32.mrb[26].mxu0  ;;  %709 = vst.msk [vmem:[#allocation2 + $0x1c0] sm:$0xff] %vm652_vm4, %v2491_v21 }
 0x110   :  { %v773_v30 = vadd.f32 %v772_v26, %v771_v24  ;;  %v972_v31 = vadd.f32 %v971_v25, %v970_v22  ;;  %680 = vst.msk [vmem:[#allocation2 + $0xd8] sm:$0xff] %vm652_vm4, %v2058_v29  ;;  %v494_v33 = vpop.f32.mrb[27].mxu0  ;;  %v889_v50 = vmul.f32 %v2058_v29, %v2058_v29  ;;  %v977_v55 = vsel %vm652_vm4, %v888_v36, 0.0  ;;  %v2495_v24 = vpop.f32.mrb[26].mxu1 }
 0x111   :  { %v973_v39 = vsel %vm652_vm4, %v886_v27, 0.0  ;;  %678 = vst.msk [vmem:[#allocation2 + $0xc8] sm:$0xff] %vm652_vm4, %v494_v33  ;;  %v774_v41 = vsel %vm652_vm4, %v494_v33, 0.0  ;;  %v887_v42 = vmul.f32 %v494_v33, %v494_v33  ;;  %v778_v56 = vsel %vm652_vm4, %v2058_v29, 0.0  ;;  %712 = vst.msk [vmem:[#allocation2 + $0x1d8] sm:$0xff] %vm652_vm4, %v2495_v24 }
 0x112   :  { %v974_v46 = vadd.f32 %v973_v39, %v972_v31  ;;  %v775_v47 = vadd.f32 %v774_v41, %v773_v30  ;;  %v979_v63 = vsel %vm652_vm4, %v889_v50, 0.0  ;;  %v894_v29 = vmul.f32 %v2323_v9, %v2323_v9  ;;  %v2503_v30 = vpop.f32.mrb[27].mxu1 }
 0x113   :  { %v975_v51 = vsel %vm652_vm4, %v887_v42, 0.0  ;;  %710 = vst.msk [vmem:[#allocation2 + $0x1c8] sm:$0xff] %vm652_vm4, %v2503_v30  ;;  %v788_v41 = vsel %vm652_vm4, %v2323_v9, 0.0  ;;  %v895_v50 = vmul.f32 %v2333_v16, %v2333_v16 }
 0x114   :  { %v777_v53 = vadd.f32 %v776_v49, %v775_v47  ;;  %v976_v54 = vadd.f32 %v975_v51, %v974_v46  ;;  %v989_v49 = vsel %vm652_vm4, %v894_v29, 0.0 }
 0x115   :  { %v2061_v57 = vpop.f32.mrb[28].mxu0 }
 0x116   :  { %v978_v58 = vadd.f32 %v977_v55, %v976_v54  ;;  %683 = vst.msk [vmem:[#allocation2 + $0xf0] sm:$0xff] %vm652_vm4, %v2061_v57  ;;  %v507_v59 = vpop.f32.mrb[29].mxu0  ;;  %v779_v62 = vadd.f32 %v778_v56, %v777_v53  ;;  %v892_v17 = vmul.f32 %v2061_v57, %v2061_v57  ;;  %v784_v25 = vsel %vm652_vm4, %v2061_v57, 0.0  ;;  %v2515_v54 = vpop.f32.mrb[28].mxu1 }
 0x117   :  { %681 = vst.msk [vmem:[#allocation2 + $0xe0] sm:$0xff] %vm652_vm4, %v507_v59  ;;  %v780_v0 = vsel %vm652_vm4, %v507_v59, 0.0  ;;  %v890_v2 = vmul.f32 %v507_v59, %v507_v59  ;;  %v2062_v6 = vpop.f32.mrb[30].mxu0  ;;  %v896_v55 = vmul.f32 %v2316_v4, %v2316_v4  ;;  %v790_v56 = vsel %vm652_vm4, %v2333_v16, 0.0  ;;  %715 = vst.msk [vmem:[#allocation2 + $0x1f0] sm:$0xff] %vm652_vm4, %v2515_v54  ;;  %v2523_v9 = vpop.f32.mrb[29].mxu1 }
 0x118   :  { %v781_v7 = vadd.f32 %v780_v0, %v779_v62  ;;  %v980_v11 = vadd.f32 %v979_v63, %v978_v58  ;;  %684 = vst.msk [vmem:[#allocation2 + $0xf8] sm:$0xff] %vm652_vm4, %v2062_v6  ;;  %v510_v13 = vpop.f32.mrb[31].mxu0  ;;  %v893_v26 = vmul.f32 %v2062_v6, %v2062_v6  ;;  %v985_v36 = vsel %vm652_vm4, %v892_v17, 0.0  ;;  %713 = vst.msk [vmem:[#allocation2 + $0x1e0] sm:$0xff] %vm652_vm4, %v2523_v9  ;;  %v2527_v59 = vpop.f32.mrb[30].mxu1 }
 0x119   :  { %v981_v18 = vsel %vm652_vm4, %v890_v2, 0.0  ;;  %682 = vst.msk [vmem:[#allocation2 + $0xe8] sm:$0xff] %vm652_vm4, %v510_v13  ;;  %v782_v19 = vsel %vm652_vm4, %v510_v13, 0.0  ;;  %v891_v20 = vmul.f32 %v510_v13, %v510_v13  ;;  %v786_v39 = vsel %vm652_vm4, %v2062_v6, 0.0  ;;  %716 = vst.msk [vmem:[#allocation2 + $0x1f8] sm:$0xff] %vm652_vm4, %v2527_v59  ;;  %v2538_v2 = vpop.f32.mrb[31].mxu1 }
 0x11a   :  { %v982_v22 = vadd.f32 %v981_v18, %v980_v11  ;;  %v783_v23 = vadd.f32 %v782_v19, %v781_v7  ;;  %v987_v47 = vsel %vm652_vm4, %v893_v26, 0.0  ;;  %v792_v62 = vsel %vm652_vm4, %v2316_v4, 0.0  ;;  %714 = vst.msk [vmem:[#allocation2 + $0x1e8] sm:$0xff] %vm652_vm4, %v2538_v2 }
 0x11b   :  { %v983_v27 = vsel %vm652_vm4, %v891_v20, 0.0  ;;  %v897_v63 = vmul.f32 %v2327_v12, %v2327_v12  ;;  %v991_v16 = vsel %vm652_vm4, %v895_v50, 0.0  ;;  %v898_v0 = vmul.f32 %v2351_v37, %v2351_v37 }
 0x11c   :  { %v785_v31 = vadd.f32 %v784_v25, %v783_v23  ;;  %v984_v33 = vadd.f32 %v983_v27, %v982_v22  ;;  %v993_v4 = vsel %vm652_vm4, %v896_v55, 0.0  ;;  %v794_v11 = vsel %vm652_vm4, %v2327_v12, 0.0 }
 0x11d   :  { %v796_v13 = vsel %vm652_vm4, %v2351_v37, 0.0  ;;  %v995_v19 = vsel %vm652_vm4, %v897_v63, 0.0  ;;  %v997_v20 = vsel %vm652_vm4, %v898_v0, 0.0  ;;  %v899_v22 = vmul.f32 %v2361_v44, %v2361_v44 }
 0x11e   :  { %v986_v42 = vadd.f32 %v985_v36, %v984_v33  ;;  %v787_v46 = vadd.f32 %v786_v39, %v785_v31  ;;  %v900_v26 = vmul.f32 %v2344_v32, %v2344_v32  ;;  %v798_v12 = vsel %vm652_vm4, %v2361_v44, 0.0 }
 0x11f   :  { %v800_v37 = vsel %vm652_vm4, %v2344_v32, 0.0  ;;  %v901_v31 = vmul.f32 %v2355_v40, %v2355_v40  ;;  %v999_v33 = vsel %vm652_vm4, %v899_v22, 0.0  ;;  %v902_v36 = vmul.f32 %v2379_v1, %v2379_v1 }
 0x120   :  { %v789_v51 = vadd.f32 %v788_v41, %v787_v46  ;;  %v988_v53 = vadd.f32 %v987_v47, %v986_v42  ;;  %v1001_v42 = vsel %vm652_vm4, %v900_v26, 0.0  ;;  %v802_v44 = vsel %vm652_vm4, %v2355_v40, 0.0 }
 0x121   :  { %v804_v46 = vsel %vm652_vm4, %v2379_v1, 0.0  ;;  %v1005_v50 = vsel %vm652_vm4, %v902_v36, 0.0  ;;  %v806_v40 = vsel %vm652_vm4, %v2389_v10, 0.0  ;;  %v808_v1 = vsel %vm652_vm4, %v2372_v60, 0.0 }
 0x122   :  { %v990_v57 = vadd.f32 %v989_v49, %v988_v53  ;;  %v791_v58 = vadd.f32 %v790_v56, %v789_v51  ;;  %v1003_v49 = vsel %vm652_vm4, %v901_v31, 0.0  ;;  %v903_v51 = vmul.f32 %v2389_v10, %v2389_v10 }
 0x123   :  { %v904_v56 = vmul.f32 %v2372_v60, %v2372_v60  ;;  %v810_v10 = vsel %vm652_vm4, %v2383_v5, 0.0  ;;  %v908_v22 = vmul.f32 %v2400_v28, %v2400_v28  ;;  %v909_v26 = vmul.f32 %v2411_v38, %v2411_v38 }
 0x124   :  { %v793_v6 = vadd.f32 %v792_v62, %v791_v58  ;;  %v992_v7 = vadd.f32 %v991_v16, %v990_v57  ;;  %v905_v62 = vmul.f32 %v2383_v5, %v2383_v5  ;;  %v1007_v63 = vsel %vm652_vm4, %v903_v51, 0.0 }
 0x125   :  { %v906_v16 = vmul.f32 %v2407_v34, %v2407_v34  ;;  %v814_v5 = vsel %vm652_vm4, %v2417_v43, 0.0  ;;  %v1017_v31 = vsel %vm652_vm4, %v908_v22, 0.0 }
 0x126   :  { %v994_v17 = vadd.f32 %v993_v4, %v992_v7  ;;  %v795_v18 = vadd.f32 %v794_v11, %v793_v6  ;;  %v1009_v7 = vsel %vm652_vm4, %v904_v56, 0.0  ;;  %v812_v4 = vsel %vm652_vm4, %v2407_v34, 0.0 }
 0x127   :  { %v816_v34 = vsel %vm652_vm4, %v2400_v28, 0.0 }
 0x128   :  { %v797_v23 = vadd.f32 %v796_v13, %v795_v18  ;;  %v996_v25 = vadd.f32 %v995_v19, %v994_v17  ;;  %v1011_v13 = vsel %vm652_vm4, %v905_v62, 0.0  ;;  %v1013_v17 = vsel %vm652_vm4, %v906_v16, 0.0 }
 0x129   :  { %v907_v18 = vmul.f32 %v2417_v43, %v2417_v43  ;;  %v818_v43 = vsel %vm652_vm4, %v2411_v38, 0.0  ;;  %v822_v38 = vsel %vm652_vm4, %v2445_v15, 0.0 }
 0x12a   :  { %v998_v27 = vadd.f32 %v997_v20, %v996_v25  ;;  %v799_v29 = vadd.f32 %v798_v12, %v797_v23 }
 0x12b   :  { %v1015_v12 = vsel %vm652_vm4, %v907_v18, 0.0 }
 0x12c   :  { %v801_v39 = vadd.f32 %v800_v37, %v799_v29  ;;  %v1000_v41 = vadd.f32 %v999_v33, %v998_v27  ;;  %v910_v27 = vmul.f32 %v2435_v3, %v2435_v3  ;;  %v820_v33 = vsel %vm652_vm4, %v2435_v3, 0.0 }
 0x12d   :  { %v824_v3 = vsel %vm652_vm4, %v2428_v61, 0.0 }
 0x12e   :  { %v1002_v47 = vadd.f32 %v1001_v42, %v1000_v41  ;;  %v803_v32 = vadd.f32 %v802_v44, %v801_v39  ;;  %v1019_v39 = vsel %vm652_vm4, %v909_v26, 0.0  ;;  %v1021_v41 = vsel %vm652_vm4, %v910_v27, 0.0 }
 0x12f   :  { %v911_v42 = vmul.f32 %v2445_v15, %v2445_v15  ;;  %v826_v15 = vsel %vm652_vm4, %v2439_v8, 0.0  ;;  %v920_v26 = vmul.f32 %v2484_v14, %v2484_v14 }
 0x130   :  { %v805_v53 = vadd.f32 %v804_v46, %v803_v32  ;;  %v1004_v55 = vadd.f32 %v1003_v49, %v1002_v47  ;;  %v912_v47 = vmul.f32 %v2428_v61, %v2428_v61 }
 0x131   :  { %v1023_v51 = vsel %vm652_vm4, %v911_v42, 0.0 }
 0x132   :  { %v1006_v57 = vadd.f32 %v1005_v50, %v1004_v55  ;;  %v807_v58 = vadd.f32 %v806_v40, %v805_v53  ;;  %v913_v50 = vmul.f32 %v2439_v8, %v2439_v8  ;;  %v914_v53 = vmul.f32 %v2463_v45, %v2463_v45 }
 0x133   :  { %v1025_v40 = vsel %vm652_vm4, %v912_v47, 0.0  ;;  %v830_v8 = vsel %vm652_vm4, %v2473_v52, 0.0 }
 0x134   :  { %v809_v0 = vadd.f32 %v808_v1, %v807_v58  ;;  %v1008_v6 = vadd.f32 %v1007_v63, %v1006_v57  ;;  %v828_v57 = vsel %vm652_vm4, %v2463_v45, 0.0  ;;  %v1027_v1 = vsel %vm652_vm4, %v913_v50, 0.0 }
 0x135   :  { %v1029_v62 = vsel %vm652_vm4, %v914_v53, 0.0  ;;  %v915_v63 = vmul.f32 %v2473_v52, %v2473_v52  ;;  %v832_v45 = vsel %vm652_vm4, %v2456_v35, 0.0  ;;  %v834_v52 = vsel %vm652_vm4, %v2467_v48, 0.0 }
 0x136   :  { %v1010_v11 = vadd.f32 %v1009_v7, %v1008_v6  ;;  %v811_v60 = vadd.f32 %v810_v10, %v809_v0  ;;  %v916_v6 = vmul.f32 %v2456_v35, %v2456_v35 }
 0x138   :  { %v813_v19 = vadd.f32 %v812_v4, %v811_v60  ;;  %v1012_v20 = vadd.f32 %v1011_v13, %v1010_v11  ;;  %v917_v4 = vmul.f32 %v2467_v48, %v2467_v48  ;;  %v1031_v11 = vsel %vm652_vm4, %v915_v63, 0.0 }
 0x139   :  { %v918_v60 = vmul.f32 %v2491_v21, %v2491_v21  ;;  %v1033_v18 = vsel %vm652_vm4, %v916_v6, 0.0  ;;  %v838_v48 = vsel %vm652_vm4, %v2503_v30, 0.0 }
 0x13a   :  { %v1014_v23 = vadd.f32 %v1013_v17, %v1012_v20  ;;  %v815_v25 = vadd.f32 %v814_v5, %v813_v19  ;;  %v836_v19 = vsel %vm652_vm4, %v2491_v21, 0.0  ;;  %v1035_v22 = vsel %vm652_vm4, %v917_v4, 0.0 }
 0x13b   :  { %v1037_v5 = vsel %vm652_vm4, %v918_v60, 0.0  ;;  %v840_v21 = vsel %vm652_vm4, %v2484_v14, 0.0 }
 0x13c   :  { %v817_v29 = vadd.f32 %v816_v34, %v815_v25  ;;  %v1016_v37 = vadd.f32 %v1015_v12, %v1014_v23  ;;  %v919_v23 = vmul.f32 %v2503_v30, %v2503_v30  ;;  %v842_v30 = vsel %vm652_vm4, %v2495_v24, 0.0 }
 0x13e   :  { %v1018_v36 = vadd.f32 %v1017_v31, %v1016_v37  ;;  %v819_v28 = vadd.f32 %v818_v43, %v817_v29  ;;  %v921_v29 = vmul.f32 %v2495_v24, %v2495_v24  ;;  %v1039_v37 = vsel %vm652_vm4, %v919_v23, 0.0  ;;  %v1073_v23 = vld [vmem:[%s4123_s2] sm:$0x1] }
 0x13f   :  { %v922_v31 = vmul.f32 %v2523_v9, %v2523_v9  ;;  %v846_v24 = vsel %vm652_vm4, %v2538_v2, 0.0 }
 0x140   :  { %v821_v44 = vadd.f32 %v820_v33, %v819_v28  ;;  %v1020_v46 = vadd.f32 %v1019_v39, %v1018_v36  ;;  %v1041_v36 = vsel %vm652_vm4, %v920_v26, 0.0  ;;  %v844_v28 = vsel %vm652_vm4, %v2523_v9, 0.0 }
 0x141   :  { %v1045_v42 = vsel %vm652_vm4, %v922_v31, 0.0  ;;  %v848_v9 = vsel %vm652_vm4, %v2515_v54, 0.0  ;;  %v1079_v31 = vld [vmem:[#allocation2 + $0x8] sm:$0xff] }
 0x142   :  { %v1022_v32 = vadd.f32 %v1021_v41, %v1020_v46  ;;  %v823_v49 = vadd.f32 %v822_v38, %v821_v44  ;;  %v1043_v41 = vsel %vm652_vm4, %v921_v29, 0.0  ;;  %v923_v44 = vmul.f32 %v2538_v2, %v2538_v2  ;;  %v1078_v29 = vld [vmem:[#allocation2] sm:$0xff] }
 0x143   :  { %v924_v38 = vmul.f32 %v2515_v54, %v2515_v54 }
 0x144   :  { %v825_v55 = vadd.f32 %v824_v3, %v823_v49  ;;  %v1024_v56 = vadd.f32 %v1023_v51, %v1022_v32  ;;  %v925_v3 = vmul.f32 %v2527_v59, %v2527_v59  ;;  %v1047_v50 = vsel %vm652_vm4, %v923_v44, 0.0  ;;  %v1092_v44 = vld [vmem:[#allocation2 + $0x70] sm:$0xff] }
 0x146   :  { %v1026_v58 = vadd.f32 %v1025_v40, %v1024_v56  ;;  %v827_v61 = vadd.f32 %v826_v15, %v825_v55  ;;  %v1049_v55 = vsel %vm652_vm4, %v924_v38, 0.0  ;;  %v850_v56 = vsel %vm652_vm4, %v2527_v59, 0.0 }
 0x147   :  { %v1051_v2 = vsel %vm652_vm4, %v925_v3, 0.0  ;;  %v1096_v3 = vld [vmem:[#allocation2 + $0x90] sm:$0xff] }
 0x148   :  { %v829_v16 = vadd.f32 %v828_v57, %v827_v61  ;;  %v1028_v0 = vadd.f32 %v1027_v1, %v1026_v58 }
 0x14a   :  { %v1030_v7 = vadd.f32 %v1029_v62, %v1028_v0  ;;  %v831_v10 = vadd.f32 %v830_v8, %v829_v16  ;;  %v724_v8 = vld [vmem:[#allocation3] sm:$0x1] }
 0x14c   :  { %v833_v13 = vadd.f32 %v832_v45, %v831_v10  ;;  %v1032_v17 = vadd.f32 %v1031_v11, %v1030_v7  ;;  %v861_v45 = vld [vmem:[#allocation4] sm:$0x1] }
 0x14e   :  { %v1034_v20 = vadd.f32 %v1033_v18, %v1032_v17  ;;  %v835_v35 = vadd.f32 %v834_v52, %v833_v13 }
 0x150   :  { %v837_v25 = vadd.f32 %v836_v19, %v835_v35  ;;  %v1036_v34 = vadd.f32 %v1035_v22, %v1034_v20  ;;  %v1143_v22 = vlaneseq }
 0x152   :  { %v1038_v12 = vadd.f32 %v1037_v5, %v1036_v34  ;;  %v839_v27 = vadd.f32 %v838_v48, %v837_v25  ;;  %v2689_v25 = vshrl.u32 %v1143_v22, 7 }
 0x154   :  { %v841_v43 = vadd.f32 %v840_v21, %v839_v27  ;;  %v1040_v33 = vadd.f32 %v1039_v37, %v1038_v12  ;;  %v4126_v26 = vsub.s32 0, %v2689_v25  ;;  %v2697_v12 = vld [vmem:[%s4124_s3] sm:$0x1]  ;;  %v1080_v21 = vld [vmem:[#allocation2 + $0x10] sm:$0xff]  ;;  %v1081_v37 = vld [vmem:[#allocation2 + $0x18] sm:$0xff] }
 0x156   :  { %v1042_v39 = vadd.f32 %v1041_v36, %v1040_v33  ;;  %v843_v14 = vadd.f32 %v842_v30, %v841_v43  ;;  %v1084_v43 = vld [vmem:[#allocation2 + $0x30] sm:$0xff]  ;;  %v1082_v33 = vld [vmem:[#allocation2 + $0x20] sm:$0xff]  ;;  %v1085_v36 = vld [vmem:[#allocation2 + $0x38] sm:$0xff] }
 0x157   :  { %v1083_v30 = vld [vmem:[#allocation2 + $0x28] sm:$0xff] }
 0x158   :  { %v845_v46 = vadd.f32 %v844_v28, %v843_v14  ;;  %v1044_v47 = vadd.f32 %v1043_v41, %v1042_v39  ;;  %v1088_v28 = vld [vmem:[#allocation2 + $0x50] sm:$0xff]  ;;  %v1086_v39 = vld [vmem:[#allocation2 + $0x40] sm:$0xff]  ;;  %v1089_v14 = vld [vmem:[#allocation2 + $0x58] sm:$0xff] }
 0x159   :  { %v1130_v41 = vld [vmem:[#allocation2 + $0x1a0] sm:$0xff] }
 0x15a   :  { %v1046_v32 = vadd.f32 %v1045_v42, %v1044_v47  ;;  %v847_v49 = vadd.f32 %v846_v24, %v845_v46  ;;  %v1087_v42 = vld [vmem:[#allocation2 + $0x48] sm:$0xff]  ;;  %v1090_v46 = vld [vmem:[#allocation2 + $0x60] sm:$0xff] }
 0x15c   :  { %v849_v51 = vadd.f32 %v848_v9, %v847_v49  ;;  %v1048_v53 = vadd.f32 %v1047_v50, %v1046_v32  ;;  %v1093_v49 = vld [vmem:[#allocation2 + $0x78] sm:$0xff]  ;;  %v1091_v9 = vld [vmem:[#allocation2 + $0x68] sm:$0xff] }
 0x15e   :  { %v851_v40 = vadd.f32 %v850_v56, %v849_v51  ;;  %v1050_v15 = vadd.f32 %v1049_v55, %v1048_v53  ;;  %v1094_v56 = vld [vmem:[#allocation2 + $0x80] sm:$0xff] }
 0x160   :  { %v852_v57 = vrot.slane %v851_v40, 4  ;;  %v1052_v58 = vadd.f32 %v1051_v2, %v1050_v15  ;;  %v1095_v15 = vld [vmem:[#allocation2 + $0x88] sm:$0xff] }
 0x162   :  { %v853_v61 = vadd.f32 %v852_v57, %v851_v40  ;;  %v1053_v54 = vrot.slane %v1052_v58, 4  ;;  %v1097_v40 = vld [vmem:[#allocation2 + $0x98] sm:$0xff] }
 0x164   :  { %v854_v1 = vrot.slane %v853_v61, 2  ;;  %v1054_v62 = vadd.f32 %v1053_v54, %v1052_v58  ;;  %v1100_v54 = vld [vmem:[#allocation2 + $0xb0] sm:$0xff] }
 0x166   :  { %v855_v63 = vadd.f32 %v854_v1, %v853_v61  ;;  %v1055_v16 = vrot.slane %v1054_v62, 2  ;;  %v1098_v1 = vld [vmem:[#allocation2 + $0xa0] sm:$0xff] }
 0x168   :  { %v856_v0 = vrot.slane %v855_v63, 1  ;;  %v1056_v6 = vadd.f32 %v1055_v16, %v1054_v62  ;;  %v1101_v62 = vld [vmem:[#allocation2 + $0xb8] sm:$0xff] }
 0x16a   :  { %v857_v7 = vadd.f32 %v856_v0, %v855_v63  ;;  %v1057_v10 = vrot.slane %v1056_v6, 1 }
 0x16c   :  { %v858_v4 = vadd.f32 %v857_v7, %v724_v8  ;;  %v1058_v59 = vadd.f32 %v1057_v10, %v1056_v6  ;;  %v1099_v8 = vld [vmem:[#allocation2 + $0xa8] sm:$0xff]  ;;  %v1104_v7 = vld [vmem:[#allocation2 + $0xd0] sm:$0xff]  ;;  %v1102_v10 = vld [vmem:[#allocation2 + $0xc0] sm:$0xff] }
 0x16e   :  { %860 = vst.msk [vmem:[#allocation3] sm:$0x1] %vm721_vm3, %v858_v4  ;;  %v1059_v11 = vadd.f32 %v1058_v59, %v861_v45 }
 0x170   :  { %1060 = vst.msk [vmem:[#allocation4] sm:$0x1] %vm721_vm3, %v1059_v11 }
 0x175   :  { %v1064_v60 = vld [vmem:[#allocation3] sm:$0x1] }
 0x176   :  { %v1065_v13 = vmul.f32 0.001953125, %v1064_v60  ;;  %v1105_v60 = vld [vmem:[#allocation2 + $0xd8] sm:$0xff] }
 0x177   :  { %v1066_v17 = vld [vmem:[#allocation4] sm:$0x1] }
 0x178   :  { %v1067_v18 = vmul.f32 0.001953125, %v1066_v17  ;;  %v1068_v52 = vmul.f32 %v1065_v13, %v1065_v13  ;;  %v1108_v17 = vld [vmem:[#allocation2 + $0xf0] sm:$0xff] }
 0x17a   :  { %v1069_v19 = vsub.f32 %v1067_v18, %v1068_v52  ;;  %v1112_v18 = vld [vmem:[#allocation2 + $0x110] sm:$0xff]  ;;  %v1110_v52 = vld [vmem:[#allocation2 + $0x100] sm:$0xff] }
 0x17c   :  { %v1070_v20 = vmax.f32 %v1069_v19, 0.0  ;;  %v1113_v19 = vld [vmem:[#allocation2 + $0x118] sm:$0xff] }
 0x17e   :  { %v1071_v35 = vadd.f32 1e-05, %v1070_v20  ;;  %v1111_v20 = vld [vmem:[#allocation2 + $0x108] sm:$0xff] }
 0x180   :  { %2135 = vrsqrt.f32 %v1071_v35 }
 0x18a   :  { %v2136_v5 = vpop.eup %2135 }
 0x18b   :  { %v1074_v34 = vmul.f32 %v2136_v5, %v1073_v23 }
 0x18d   :  { %v2692_v48 = vmul.f32 %v1074_v34, %v1065_v13  ;;  %v2701_v27 = vrot.slane %v1074_v34, %v4126_v26  ;;  %v1103_v13 = vld [vmem:[#allocation2 + $0xc8] sm:$0xff]  ;;  %v1106_v34 = vld [vmem:[#allocation2 + $0xe0] sm:$0xff] }
 0x18f   :  { %v2706_v47 = vmul.f32 %v2701_v27, %v1078_v29  ;;  %v2709_v38 = vmul.f32 %v2701_v27, %v1079_v31  ;;  %v2712_v24 = vmul.f32 %v2701_v27, %v1080_v21  ;;  %v2715_v32 = vmul.f32 %v2701_v27, %v1081_v37  ;;  %v1109_v21 = vld [vmem:[#allocation2 + $0xf8] sm:$0xff]  ;;  %v1107_v29 = vld [vmem:[#allocation2 + $0xe8] sm:$0xff]  ;;  %v1116_v37 = vld [vmem:[#allocation2 + $0x130] sm:$0xff] }
 0x190   :  { %v2718_v50 = vmul.f32 %v2701_v27, %v1082_v33  ;;  %v2721_v51 = vmul.f32 %v2701_v27, %v1083_v30  ;;  %v2724_v53 = vmul.f32 %v2701_v27, %v1084_v43  ;;  %v2727_v55 = vmul.f32 %v2701_v27, %v1085_v36  ;;  %v1114_v31 = vld [vmem:[#allocation2 + $0x120] sm:$0xff]  ;;  %v1117_v43 = vld [vmem:[#allocation2 + $0x138] sm:$0xff] }
 0x191   :  { %v2730_v2 = vmul.f32 %v2701_v27, %v1086_v39  ;;  %v2733_v57 = vmul.f32 %v2701_v27, %v1087_v42  ;;  %v2736_v58 = vmul.f32 %v2701_v27, %v1088_v28  ;;  %v2739_v61 = vmul.f32 %v2701_v27, %v1089_v14  ;;  %v1115_v39 = vld [vmem:[#allocation2 + $0x128] sm:$0xff]  ;;  %v1120_v14 = vld [vmem:[#allocation2 + $0x150] sm:$0xff]  ;;  %v1118_v42 = vld [vmem:[#allocation2 + $0x140] sm:$0xff] }
 0x192   :  { %v2742_v63 = vmul.f32 %v2701_v27, %v1090_v46  ;;  %v2745_v16 = vmul.f32 %v2701_v27, %v1091_v9  ;;  %v2748_v0 = vmul.f32 %v2701_v27, %v1092_v44  ;;  %v2751_v6 = vmul.f32 %v2701_v27, %v1093_v49 }
 0x193   :  { %v2754_v45 = vmul.f32 %v2701_v27, %v1094_v56  ;;  %v2757_v4 = vmul.f32 %v2701_v27, %v1095_v15  ;;  %v2760_v59 = vmul.f32 %v2701_v27, %v1096_v3  ;;  %v2763_v11 = vmul.f32 %v2701_v27, %v1097_v40  ;;  %v1121_v3 = vld [vmem:[#allocation2 + $0x158] sm:$0xff]  ;;  %v1119_v56 = vld [vmem:[#allocation2 + $0x148] sm:$0xff]  ;;  %v1124_v40 = vld [vmem:[#allocation2 + $0x170] sm:$0xff] }
 0x194   :  { %v2766_v35 = vmul.f32 %v2701_v27, %v1098_v1  ;;  %v2769_v22 = vmul.f32 %v2701_v27, %v1099_v8  ;;  %v2772_v5 = vmul.f32 %v2701_v27, %v1100_v54  ;;  %v2775_v23 = vmul.f32 %v2701_v27, %v1101_v62  ;;  %v1122_v8 = vld [vmem:[#allocation2 + $0x160] sm:$0xff] }
 0x195   :  { %v2778_v33 = vmul.f32 %v2701_v27, %v1102_v10  ;;  %v2781_v36 = vmul.f32 %v2701_v27, %v1103_v13  ;;  %v2784_v30 = vmul.f32 %v2701_v27, %v1104_v7  ;;  %v2787_v28 = vmul.f32 %v2701_v27, %v1105_v60  ;;  %v1125_v7 = vld [vmem:[#allocation2 + $0x178] sm:$0xff]  ;;  %v1123_v10 = vld [vmem:[#allocation2 + $0x168] sm:$0xff] }
 0x196   :  { %v2790_v44 = vmul.f32 %v2701_v27, %v1106_v34  ;;  %v2793_v46 = vmul.f32 %v2701_v27, %v1107_v29  ;;  %v2796_v49 = vmul.f32 %v2701_v27, %v1108_v17  ;;  %v2799_v9 = vmul.f32 %v2701_v27, %v1109_v21  ;;  %v1129_v34 = vld [vmem:[#allocation2 + $0x198] sm:$0xff] }
 0x197   :  { %v2802_v15 = vmul.f32 %v2701_v27, %v1110_v52  ;;  %v2805_v54 = vmul.f32 %v2701_v27, %v1111_v20  ;;  %v2808_v1 = vmul.f32 %v2701_v27, %v1112_v18  ;;  %v2811_v62 = vmul.f32 %v2701_v27, %v1113_v19  ;;  %v1128_v18 = vld [vmem:[#allocation2 + $0x190] sm:$0xff]  ;;  %v1126_v20 = vld [vmem:[#allocation2 + $0x180] sm:$0xff] }
 0x198   :  { %v2814_v60 = vmul.f32 %v2701_v27, %v1114_v31  ;;  %v2817_v13 = vmul.f32 %v2701_v27, %v1115_v39  ;;  %v2820_v17 = vmul.f32 %v2701_v27, %v1116_v37  ;;  %v2823_v52 = vmul.f32 %v2701_v27, %v1117_v43  ;;  %v1127_v37 = vld [vmem:[#allocation2 + $0x188] sm:$0xff]  ;;  %v1132_v39 = vld [vmem:[#allocation2 + $0x1b0] sm:$0xff] }
 0x199   :  { %v2826_v19 = vmul.f32 %v2701_v27, %v1118_v42  ;;  %v2829_v21 = vmul.f32 %v2701_v27, %v1119_v56  ;;  %v2832_v29 = vmul.f32 %v2701_v27, %v1120_v14  ;;  %v2835_v31 = vmul.f32 %v2701_v27, %v1121_v3  ;;  %v1133_v14 = vld [vmem:[#allocation2 + $0x1b8] sm:$0xff] }
 0x19a   :  { %v2838_v43 = vmul.f32 %v2701_v27, %v1122_v8  ;;  %v2841_v26 = vmul.f32 %v2701_v27, %v1123_v10  ;;  %v2844_v42 = vmul.f32 %v2701_v27, %v1124_v40  ;;  %v2847_v56 = vmul.f32 %v2701_v27, %v1125_v7  ;;  %v1134_v7 = vld [vmem:[#allocation2 + $0x1c0] sm:$0xff] }
 0x19b   :  { %4160 = vst [vmem:[#allocation5_spill] sm:$0xff] %v2829_v21  ;;  %4161 = vst [vmem:[#allocation6_spill] sm:$0xff] %v2832_v29  ;;  %v1131_v29 = vld [vmem:[#allocation2 + $0x1a8] sm:$0xff]  ;;  %v1136_v21 = vld [vmem:[#allocation2 + $0x1d0] sm:$0xff]  ;;  %v2850_v3 = vmul.f32 %v2701_v27, %v1126_v20  ;;  %v2856_v8 = vmul.f32 %v2701_v27, %v1128_v18  ;;  %v4168_v10 = vsub.s32 0, %v2689_v25  ;;  %v4169_v40 = vsub.f32 %v2697_v12, %v2692_v48 }
 0x19c   :  { %4162 = vst [vmem:[#allocation7_spill] sm:$0xff] %v2835_v31  ;;  %4163 = vst [vmem:[#allocation8_spill] sm:$0xff] %v2838_v43  ;;  %v2853_v31 = vmul.f32 %v2701_v27, %v1127_v37  ;;  %v2866_v43 = vmul.f32 %v2701_v27, %v1129_v34  ;;  %v2869_v20 = vmul.f32 %v2701_v27, %v1130_v41  ;;  %v1140_v25 = vld [vmem:[#allocation2 + $0x1f0] sm:$0xff]  ;;  %v1139_v48 = vld [vmem:[#allocation2 + $0x1e8] sm:$0xff] }
 0x19d   :  { %4164 = vst [vmem:[#allocation9_spill] sm:$0xff] %v2841_v26  ;;  %4165 = vst [vmem:[#allocation10_spill] sm:$0xff] %v2844_v42  ;;  %v2863_v42 = vrot.slane %v4169_v40, %v4168_v10  ;;  %v1135_v26 = vld [vmem:[#allocation2 + $0x1c8] sm:$0xff]  ;;  %v2872_v37 = vmul.f32 %v2701_v27, %v1131_v29  ;;  %v2875_v18 = vmul.f32 %v2701_v27, %v1132_v39  ;;  %v1141_v29 = vld [vmem:[#allocation2 + $0x1f8] sm:$0xff] }
 0x19e   :  { %4166 = vst [vmem:[#allocation11_spill] sm:$0xff] %v2847_v56  ;;  %4167 = vst [vmem:[#allocation12_spill] sm:$0xff] %v2856_v8  ;;  %v1137_v56 = vld [vmem:[#allocation2 + $0x1d8] sm:$0xff]  ;;  %v1138_v8 = vld [vmem:[#allocation2 + $0x1e0] sm:$0xff]  ;;  %v2878_v12 = vmul.f32 %v2701_v27, %v1133_v14  ;;  %v2881_v10 = vmul.f32 %v2701_v27, %v1134_v7  ;;  %v2884_v34 = vmul.f32 %v2701_v27, %v1135_v26 }
 0x19f   :  { %4170 = vst [vmem:[#allocation13_spill] sm:$0xff] %v2875_v18  ;;  %v2887_v41 = vmul.f32 %v2701_v27, %v1136_v21  ;;  %v2890_v40 = vmul.f32 %v2701_v27, %v1137_v56  ;;  %v2893_v39 = vmul.f32 %v2701_v27, %v1138_v8  ;;  %v2896_v18 = vmul.f32 %v2701_v27, %v1139_v48 }
 0x1a0   :  { %v2899_v14 = vmul.f32 %v2701_v27, %v1140_v25  ;;  %v2902_v7 = vmul.f32 %v2701_v27, %v1141_v29  ;;  %v2906_v26 = vadd.f32 %v2863_v42, %v2706_v47  ;;  %v2910_v21 = vadd.f32 %v2863_v42, %v2709_v38 }
 0x1a1   :  { %v2914_v56 = vadd.f32 %v2863_v42, %v2712_v24  ;;  %v2918_v8 = vadd.f32 %v2863_v42, %v2715_v32  ;;  %v2922_v27 = vadd.f32 %v2863_v42, %v2718_v50  ;;  %v2926_v47 = vadd.f32 %v2863_v42, %v2721_v51 }
 0x1a2   :  { %v2930_v38 = vadd.f32 %v2863_v42, %v2724_v53  ;;  %v2934_v24 = vadd.f32 %v2863_v42, %v2727_v55  ;;  %v2938_v32 = vadd.f32 %v2863_v42, %v2730_v2  ;;  %v2942_v50 = vadd.f32 %v2863_v42, %v2733_v57  ;;  %v4174_v25 = vld [vmem:[#allocation5_spill] sm:$0xff]  ;;  %v4176_v48 = vld [vmem:[#allocation6_spill] sm:$0xff] }
 0x1a3   :  { %v2946_v51 = vadd.f32 %v2863_v42, %v2736_v58  ;;  %v2950_v53 = vadd.f32 %v2863_v42, %v2739_v61  ;;  %v2954_v55 = vadd.f32 %v2863_v42, %v2742_v63  ;;  %v2958_v2 = vadd.f32 %v2863_v42, %v2745_v16  ;;  %v4177_v29 = vld [vmem:[#allocation7_spill] sm:$0xff] }
 0x1a4   :  { %v2962_v57 = vadd.f32 %v2863_v42, %v2748_v0  ;;  %v2966_v58 = vadd.f32 %v2863_v42, %v2751_v6  ;;  %v2970_v61 = vadd.f32 %v2863_v42, %v2754_v45  ;;  %v2974_v63 = vadd.f32 %v2863_v42, %v2757_v4 }
 0x1a5   :  { %v2978_v16 = vadd.f32 %v2863_v42, %v2760_v59  ;;  %v2982_v0 = vadd.f32 %v2863_v42, %v2763_v11  ;;  %v2986_v6 = vadd.f32 %v2863_v42, %v2766_v35  ;;  %v2990_v45 = vadd.f32 %v2863_v42, %v2769_v22 }
 0x1a6   :  { %v2994_v4 = vadd.f32 %v2863_v42, %v2772_v5  ;;  %v2998_v59 = vadd.f32 %v2863_v42, %v2775_v23  ;;  %v3002_v11 = vadd.f32 %v2863_v42, %v2778_v33  ;;  %v3006_v35 = vadd.f32 %v2863_v42, %v2781_v36 }
 0x1a7   :  { %v3010_v22 = vadd.f32 %v2863_v42, %v2784_v30  ;;  %v3014_v5 = vadd.f32 %v2863_v42, %v2787_v28  ;;  %v3018_v23 = vadd.f32 %v2863_v42, %v2790_v44  ;;  %v3022_v33 = vadd.f32 %v2863_v42, %v2793_v46 }
 0x1a8   :  { %v3026_v36 = vadd.f32 %v2863_v42, %v2796_v49  ;;  %v3030_v30 = vadd.f32 %v2863_v42, %v2799_v9  ;;  %v3034_v28 = vadd.f32 %v2863_v42, %v2802_v15  ;;  %v3038_v44 = vadd.f32 %v2863_v42, %v2805_v54 }
 0x1a9   :  { %v3042_v46 = vadd.f32 %v2863_v42, %v2808_v1  ;;  %v3046_v49 = vadd.f32 %v2863_v42, %v2811_v62  ;;  %v3050_v9 = vadd.f32 %v2863_v42, %v2814_v60  ;;  %v3054_v15 = vadd.f32 %v2863_v42, %v2817_v13 }
 0x1aa   :  { %v3058_v54 = vadd.f32 %v2863_v42, %v2820_v17  ;;  %v3062_v1 = vadd.f32 %v2863_v42, %v2823_v52  ;;  %v3066_v62 = vadd.f32 %v2863_v42, %v2826_v19  ;;  %v3070_v60 = vadd.f32 %v2863_v42, %v4174_v25 }
 0x1ab   :  { %v3074_v13 = vadd.f32 %v2863_v42, %v4176_v48  ;;  %v3078_v17 = vadd.f32 %v2863_v42, %v4177_v29  ;;  %v3098_v29 = vadd.f32 %v2863_v42, %v2850_v3  ;;  %v3118_v3 = vadd.f32 %v2863_v42, %v2872_v37 }
 0x1ac   :  { %4171 = vst [vmem:[#allocation14_spill] sm:$0xff] %v3058_v54  ;;  %4172 = vst [vmem:[#allocation15_spill] sm:$0xff] %v3062_v1  ;;  %v4178_v54 = vld [vmem:[#allocation8_spill] sm:$0xff]  ;;  %v4180_v1 = vld [vmem:[#allocation9_spill] sm:$0xff]  ;;  %v3138_v37 = vadd.f32 %v2863_v42, %v2887_v41  ;;  %vm1282_vm5 = vcmp.gt.f32.partialorder %v2906_v26, 0.0  ;;  %vm1283_vm6 = vcmp.gt.f32.partialorder %v2910_v21, 0.0 }
 0x1ad   :  { %4173 = vst [vmem:[#allocation16_spill] sm:$0xff] %v3066_v62  ;;  %4175 = vst [vmem:[#allocation5_spill] sm:$0xff] %v3070_v60  ;;  %v3082_v52 = vadd.f32 %v2863_v42, %v4178_v54  ;;  %v3086_v19 = vadd.f32 %v2863_v42, %v4180_v1  ;;  %v4181_v62 = vld [vmem:[#allocation10_spill] sm:$0xff]  ;;  %v4182_v60 = vld [vmem:[#allocation11_spill] sm:$0xff]  ;;  %v3102_v54 = vadd.f32 %v2863_v42, %v2853_v31  ;;  %vm1284_vm7 = vcmp.gt.f32.partialorder %v2914_v56, 0.0 }
 0x1ae   :  { %v3090_v25 = vadd.f32 %v2863_v42, %v4181_v62  ;;  %v3094_v48 = vadd.f32 %v2863_v42, %v4182_v60  ;;  %4183 = vst [vmem:[#allocation7_spill] sm:$0xff] %v3098_v29  ;;  %v3110_v62 = vadd.f32 %v2863_v42, %v2866_v43  ;;  %v3114_v60 = vadd.f32 %v2863_v42, %v2869_v20  ;;  %v4190_v29 = vld [vmem:[#allocation13_spill] sm:$0xff] }
 0x1af   :  { %4179 = vst [vmem:[#allocation6_spill] sm:$0xff] %v3082_v52  ;;  %4184 = vst [vmem:[#allocation8_spill] sm:$0xff] %v3102_v54  ;;  %v4185_v52 = vld [vmem:[#allocation12_spill] sm:$0xff]  ;;  %v3122_v31 = vadd.f32 %v2863_v42, %v4190_v29  ;;  %v3130_v43 = vadd.f32 %v2863_v42, %v2881_v10  ;;  %v3134_v20 = vadd.f32 %v2863_v42, %v2884_v34  ;;  %vm1285_vm8 = vcmp.gt.f32.partialorder %v2918_v8, 0.0 }
 0x1b0   :  { %v3106_v1 = vadd.f32 %v2863_v42, %v4185_v52  ;;  %4187 = vst [vmem:[#allocation10_spill] sm:$0xff] %v3110_v62  ;;  %4188 = vst [vmem:[#allocation11_spill] sm:$0xff] %v3114_v60  ;;  %v3126_v52 = vadd.f32 %v2863_v42, %v2878_v12  ;;  %v3142_v29 = vadd.f32 %v2863_v42, %v2890_v40  ;;  %vm1286_vm9 = vcmp.gt.f32.partialorder %v2922_v27, 0.0 }
 0x1b1   :  { %4189 = vst [vmem:[#allocation12_spill] sm:$0xff] %v3118_v3  ;;  %4191 = vst [vmem:[#allocation13_spill] sm:$0xff] %v3122_v31  ;;  %v3146_v12 = vadd.f32 %v2863_v42, %v2893_v39  ;;  %v3150_v10 = vadd.f32 %v2863_v42, %v2896_v18  ;;  %vm1287_vm10 = vcmp.gt.f32.partialorder %v2926_v47, 0.0  ;;  %vm1288_vm11 = vcmp.gt.f32.partialorder %v2930_v38, 0.0 }
 0x1b2   :  { %4186 = vst [vmem:[#allocation9_spill] sm:$0xff] %v3106_v1  ;;  %4192 = vst [vmem:[#allocation17_spill] sm:$0xff] %v3126_v52  ;;  %vm1289_vm12 = vcmp.gt.f32.partialorder %v2934_v24, 0.0  ;;  %vm1290_vm13 = vcmp.gt.f32.partialorder %v2938_v32, 0.0  ;;  %v3163_v18 = vadd.f32 %v2863_v42, %v2899_v14  ;;  %vm1291_vm14 = vcmp.gt.f32.partialorder %v2942_v50, 0.0 }
 0x1b3   :  { %4193 = vst [vmem:[#allocation18_spill] sm:$0xff] %v3130_v43  ;;  %4194 = vst [vmem:[#allocation19_spill] sm:$0xff] %v3134_v20  ;;  %v1346_v34 = vmul.f32 0.01, %v2906_v26  ;;  %v1347_v41 = vmul.f32 0.01, %v2910_v21  ;;  %v3171_v39 = vadd.f32 %v2863_v42, %v2902_v7 }
 0x1b4   :  { %4195 = vst [vmem:[#allocation20_spill] sm:$0xff] %v3138_v37  ;;  %4196 = vst [vmem:[#allocation21_spill] sm:$0xff] %v3142_v29  ;;  %v1348_v40 = vmul.f32 0.01, %v2914_v56  ;;  %vm1292_vm15 = vcmp.gt.f32.partialorder %v2946_v51, 0.0  ;;  %vm1293_vm0 = vcmp.gt.f32.partialorder %v2950_v53, 0.0 }
 0x1b5   :  { %4197 = vst [vmem:[#allocation22_spill] sm:$0xff] %v3146_v12  ;;  %4198 = vst [vmem:[#allocation23_spill] sm:$0xff] %v3150_v10  ;;  %v1349_v10 = vmul.f32 0.01, %v2918_v8  ;;  %v1350_v12 = vmul.f32 0.01, %v2922_v27  ;;  %v3184_v42 = vsel %vm1282_vm5, %v2906_v26, %v1346_v34  ;;  %v3195_v43 = vsel %vm1283_vm6, %v2910_v21, %v1347_v41 }
 0x1b6   :  { %4199 = vst [vmem:[#allocation24_spill] sm:$0xff] %v3163_v18  ;;  %4200 = vst [vmem:[#allocation25_spill] sm:$0xff] %v3171_v39  ;;  %v1351_v14 = vmul.f32 0.01, %v2926_v47  ;;  %v1352_v18 = vmul.f32 0.01, %v2930_v38 }
 0x1b7   :  { %v1353_v29 = vmul.f32 0.01, %v2934_v24  ;;  %v1354_v37 = vmul.f32 0.01, %v2938_v32  ;;  %4201 = vst [vmem:[#allocation26_spill] sm:$0xff] %v3184_v42  ;;  %vm1294_vm1 = vcmp.gt.f32.partialorder %v2954_v55, 0.0  ;;  %v3210_v42 = vsel %vm1284_vm7, %v2914_v56, %v1348_v40 }
 0x1b8   :  { %v1355_v7 = vmul.f32 0.01, %v2942_v50  ;;  %v1356_v39 = vmul.f32 0.01, %v2946_v51  ;;  %v3190_v20 = vmul.f32 0.01, %v2950_v53  ;;  %v3225_v31 = vsel %vm1285_vm8, %v2918_v8, %v1349_v10 }
 0x1b9   :  { %4202 = vst [vmem:[#allocation27_spill] sm:$0xff] %v3195_v43  ;;  %vm1295_vm2 = vcmp.gt.f32.partialorder %v2958_v2, 0.0  ;;  %v3199_v52 = vmul.f32 0.01, %v2954_v55  ;;  %v3202_v26 = vmul.f32 0.01, %v2958_v2 }
 0x1ba   :  { %v3205_v34 = vmul.f32 0.01, %v2962_v57  ;;  %4203 = vst [vmem:[#allocation28_spill] sm:$0xff] %v3210_v42  ;;  %vm1296_vm3 = vcmp.gt.f32.partialorder %v2962_v57, 0.0  ;;  %v3214_v21 = vmul.f32 0.01, %v2966_v58 }
 0x1bb   :  { %v3217_v41 = vmul.f32 0.01, %v2970_v61  ;;  %v3220_v43 = vmul.f32 0.01, %v2974_v63  ;;  %4205 = vst [vmem:[#allocation30_spill] sm:$0xff] %v3225_v31  ;;  %vm1297_vm4 = vcmp.gt.f32.partialorder %v2966_v58, 0.0 }
 0x1bc   :  { %v3229_v56 = vmul.f32 0.01, %v2978_v16  ;;  %v3232_v40 = vmul.f32 0.01, %v2982_v0  ;;  %v3235_v42 = vmul.f32 0.01, %v2986_v6 }
 0x1bd   :  { %4204 = vst [vmem:[#allocation29_spill] sm:$0xff] %v3220_v43  ;;  %v3240_v43 = vsel %vm1286_vm9, %v2922_v27, %v1350_v12  ;;  %vm1298_vm5 = vcmp.gt.f32.partialorder %v2970_v61, 0.0  ;;  %v3244_v8 = vmul.f32 0.01, %v2990_v45  ;;  %v3247_v10 = vmul.f32 0.01, %v2994_v4 }
 0x1be   :  { %4206 = vst [vmem:[#allocation31_spill] sm:$0xff] %v3235_v42  ;;  %4207 = vst [vmem:[#allocation32_spill] sm:$0xff] %v3240_v43  ;;  %v3250_v31 = vmul.f32 0.01, %v2998_v59  ;;  %v3255_v42 = vsel %vm1287_vm10, %v2926_v47, %v1351_v14  ;;  %vm1299_vm6 = vcmp.gt.f32.partialorder %v2974_v63, 0.0  ;;  %vm1300_vm7 = vcmp.gt.f32.partialorder %v2978_v16, 0.0 }
 0x1bf   :  { %4209 = vst [vmem:[#allocation34_spill] sm:$0xff] %v3255_v42  ;;  %v3259_v27 = vmul.f32 0.01, %v3002_v11  ;;  %v3262_v12 = vmul.f32 0.01, %v3006_v35  ;;  %vm1301_vm8 = vcmp.gt.f32.partialorder %v2982_v0, 0.0 }
 0x1c0   :  { %4208 = vst [vmem:[#allocation33_spill] sm:$0xff] %v3250_v31  ;;  %v3265_v43 = vmul.f32 0.01, %v3010_v22  ;;  %v3270_v31 = vsel %vm1288_vm11, %v2930_v38, %v1352_v18  ;;  %v3274_v47 = vmul.f32 0.01, %v3014_v5  ;;  %vm1304_vm11 = vcmp.gt.f32.partialorder %v2994_v4, 0.0 }
 0x1c1   :  { %4211 = vst [vmem:[#allocation36_spill] sm:$0xff] %v3270_v31  ;;  %v3277_v14 = vmul.f32 0.01, %v3018_v23  ;;  %v3280_v42 = vmul.f32 0.01, %v3022_v33 }
 0x1c2   :  { %4210 = vst [vmem:[#allocation35_spill] sm:$0xff] %v3265_v43  ;;  %v3285_v43 = vsel %vm1289_vm12, %v2934_v24, %v1353_v29  ;;  %v3291_v38 = vmul.f32 0.01, %v3026_v36  ;;  %v3294_v18 = vmul.f32 0.01, %v3030_v30  ;;  %v3302_v24 = vsel %vm1290_vm13, %v2938_v32, %v1354_v37 }
 0x1c3   :  { %4212 = vst [vmem:[#allocation37_spill] sm:$0xff] %v3285_v43  ;;  %v3297_v31 = vmul.f32 0.01, %v3034_v28  ;;  %4214 = vst [vmem:[#allocation39_spill] sm:$0xff] %v3302_v24  ;;  %v3309_v29 = vmul.f32 0.01, %v3038_v44  ;;  %v3320_v32 = vsel %vm1291_vm14, %v2942_v50, %v1355_v7  ;;  %v3338_v50 = vsel %vm1292_vm15, %v2946_v51, %v1356_v39 }
 0x1c4   :  { %v3312_v43 = vmul.f32 0.01, %v3042_v46  ;;  %4218 = vst [vmem:[#allocation43_spill] sm:$0xff] %v3320_v32  ;;  %vm1308_vm13 = vcmp.gt.f32.partialorder %v3010_v22, 0.0  ;;  %v3327_v37 = vmul.f32 0.01, %v3050_v9  ;;  %v3357_v51 = vsel %vm1293_vm0, %v2950_v53, %v3190_v20 }
 0x1c5   :  { %4213 = vst [vmem:[#allocation38_spill] sm:$0xff] %v3297_v31  ;;  %4215 = vst [vmem:[#allocation40_spill] sm:$0xff] %v3309_v29  ;;  %v3315_v31 = vmul.f32 0.01, %v3046_v49  ;;  %v3330_v24 = vmul.f32 0.01, %v3054_v15  ;;  %v3376_v53 = vsel %vm1294_vm1, %v2954_v55, %v3199_v52  ;;  %v3395_v55 = vsel %vm1295_vm2, %v2958_v2, %v3202_v26 }
 0x1c6   :  { %4216 = vst [vmem:[#allocation41_spill] sm:$0xff] %v3312_v43  ;;  %4219 = vst [vmem:[#allocation44_spill] sm:$0xff] %v3327_v37  ;;  %vm1312_vm14 = vcmp.gt.f32.partialorder %v3026_v36, 0.0  ;;  %v4224_v7 = vld [vmem:[#allocation15_spill] sm:$0xff]  ;;  %vm1316_vm15 = vcmp.gt.f32.partialorder %v3042_v46, 0.0  ;;  %vm1324_vm1 = vcmp.gt.f32.partialorder %v3074_v13, 0.0  ;;  %v3414_v2 = vsel %vm1296_vm3, %v2962_v57, %v3205_v34 }
 0x1c7   :  { %4217 = vst [vmem:[#allocation42_spill] sm:$0xff] %v3315_v31  ;;  %4220 = vst [vmem:[#allocation45_spill] sm:$0xff] %v3330_v24  ;;  %v4221_v31 = vld [vmem:[#allocation14_spill] sm:$0xff]  ;;  %v3345_v32 = vmul.f32 0.01, %v4224_v7  ;;  %v4225_v24 = vld [vmem:[#allocation16_spill] sm:$0xff]  ;;  %v3433_v57 = vsel %vm1297_vm4, %v2966_v58, %v3214_v21  ;;  %v3446_v58 = vsel %vm1298_vm5, %v2970_v61, %v3217_v41 }
 0x1c8   :  { %v3333_v43 = vmul.f32 0.01, %v4221_v31  ;;  %4223 = vst [vmem:[#allocation46_spill] sm:$0xff] %v3338_v50  ;;  %v3348_v37 = vmul.f32 0.01, %v4225_v24  ;;  %4232 = vst [vmem:[#allocation47_spill] sm:$0xff] %v3376_v53 }
 0x1c9   :  { %v3364_v39 = vmul.f32 0.01, %v3074_v13  ;;  %v3367_v50 = vmul.f32 0.01, %v3078_v17  ;;  %vm1320_vm0 = vcmp.gt.f32.partialorder %v4221_v31, 0.0  ;;  %4235 = vst [vmem:[#allocation50_spill] sm:$0xff] %v3395_v55 }
 0x1ca   :  { %4222 = vst [vmem:[#allocation14_spill] sm:$0xff] %v3333_v43  ;;  %4226 = vst [vmem:[#allocation15_spill] sm:$0xff] %v3348_v37  ;;  %v4227_v43 = vld [vmem:[#allocation5_spill] sm:$0xff]  ;;  %v3383_v20 = vmul.f32 0.01, %v3086_v19  ;;  %v4236_v52 = vld [vmem:[#allocation7_spill] sm:$0xff] }
 0x1cb   :  { %v3351_v29 = vmul.f32 0.01, %v4227_v43  ;;  %4229 = vst [vmem:[#allocation5_spill] sm:$0xff] %v3357_v51  ;;  %v3386_v51 = vmul.f32 0.01, %v3090_v25  ;;  %4239 = vst [vmem:[#allocation52_spill] sm:$0xff] %v3414_v2 }
 0x1cc   :  { %v3402_v53 = vmul.f32 0.01, %v4236_v52  ;;  %vm1328_vm2 = vcmp.gt.f32.partialorder %v3090_v25, 0.0  ;;  %v3421_v26 = vmul.f32 0.01, %v3110_v62  ;;  %4243 = vst [vmem:[#allocation56_spill] sm:$0xff] %v3433_v57 }
 0x1cd   :  { %4228 = vst [vmem:[#allocation16_spill] sm:$0xff] %v3351_v29  ;;  %v4230_v29 = vld [vmem:[#allocation6_spill] sm:$0xff]  ;;  %4233 = vst [vmem:[#allocation48_spill] sm:$0xff] %v3386_v51  ;;  %v3405_v51 = vmul.f32 0.01, %v3102_v54  ;;  %vm1332_vm3 = vcmp.gt.f32.partialorder %v3106_v1, 0.0 }
 0x1ce   :  { %v3370_v37 = vmul.f32 0.01, %v4230_v29  ;;  %4240 = vst [vmem:[#allocation53_spill] sm:$0xff] %v3421_v26  ;;  %v3424_v55 = vmul.f32 0.01, %v3114_v60  ;;  %v4244_v34 = vld [vmem:[#allocation13_spill] sm:$0xff] }
 0x1cf   :  { %4237 = vst [vmem:[#allocation7_spill] sm:$0xff] %v3405_v51  ;;  %v1400_v2 = vmul.f32 0.01, %v4244_v34  ;;  %v4246_v54 = vld [vmem:[#allocation18_spill] sm:$0xff]  ;;  %4247 = vst [vmem:[#allocation57_spill] sm:$0xff] %v3446_v58  ;;  %vm1336_vm4 = vcmp.gt.f32.partialorder %v4244_v34, 0.0 }
 0x1d0   :  { %4231 = vst [vmem:[#allocation6_spill] sm:$0xff] %v3370_v37  ;;  %v3389_v37 = vmul.f32 0.01, %v3094_v48  ;;  %4241 = vst [vmem:[#allocation54_spill] sm:$0xff] %v3424_v55  ;;  %v4245_v55 = vld [vmem:[#allocation17_spill] sm:$0xff]  ;;  %v4248_v21 = vld [vmem:[#allocation19_spill] sm:$0xff] }
 0x1d1   :  { %v1401_v26 = vmul.f32 0.01, %v4245_v55  ;;  %v1403_v57 = vmul.f32 0.01, %v4248_v21  ;;  %v4250_v62 = vld [vmem:[#allocation21_spill] sm:$0xff]  ;;  %v4253_v41 = vld [vmem:[#allocation22_spill] sm:$0xff] }
 0x1d2   :  { %4234 = vst [vmem:[#allocation49_spill] sm:$0xff] %v3389_v37  ;;  %v3408_v37 = vmul.f32 0.01, %v3106_v1  ;;  %v1405_v1 = vmul.f32 0.01, %v4250_v62  ;;  %v4251_v51 = vld [vmem:[#allocation29_spill] sm:$0xff] }
 0x1d3   :  { %v3459_v61 = vsel %vm1299_vm6, %v2974_v63, %v4251_v51  ;;  %vm1342_vm9 = vcmp.gt.f32.partialorder %v4253_v41, 0.0  ;;  %v4254_v58 = vld [vmem:[#allocation23_spill] sm:$0xff]  ;;  %v1406_v21 = vmul.f32 0.01, %v4253_v41  ;;  %v4255_v55 = vld [vmem:[#allocation24_spill] sm:$0xff]  ;;  %v3472_v63 = vsel %vm1300_vm7, %v2978_v16, %v3229_v56  ;;  %v4256_v51 = vld [vmem:[#allocation25_spill] sm:$0xff] }
 0x1d4   :  { %4238 = vst [vmem:[#allocation51_spill] sm:$0xff] %v3408_v37  ;;  %v3427_v37 = vmul.f32 0.01, %v3118_v3  ;;  %v4249_v3 = vld [vmem:[#allocation20_spill] sm:$0xff]  ;;  %v1408_v34 = vmul.f32 0.01, %v4255_v55  ;;  %v3481_v41 = vsel %vm1301_vm8, %v2982_v0, %v3232_v40  ;;  %v3499_v56 = vsel %vm1304_vm11, %v2994_v4, %v3247_v10 }
 0x1d5   :  { %v1404_v60 = vmul.f32 0.01, %v4249_v3  ;;  %4252 = vst [vmem:[#allocation20_spill] sm:$0xff] %v3459_v61  ;;  %vm1340_vm5 = vcmp.gt.f32.partialorder %v4249_v3, 0.0  ;;  %vm1344_vm6 = vcmp.gt.f32.partialorder %v4255_v55, 0.0  ;;  %vm1345_vm10 = vcmp.gt.f32.partialorder %v4256_v51, 0.0 }
 0x1d6   :  { %4242 = vst [vmem:[#allocation55_spill] sm:$0xff] %v3427_v37  ;;  %v1402_v37 = vmul.f32 0.01, %v4246_v54  ;;  %v1407_v54 = vmul.f32 0.01, %v4254_v58  ;;  %v4257_v58 = vld [vmem:[#allocation31_spill] sm:$0xff] }
 0x1d7   :  { %v1409_v61 = vmul.f32 0.01, %v4256_v51  ;;  %vm4258_vm12 = vcmp.gt.f32.partialorder %v2986_v6, 0.0  ;;  %vm4259_vm7 = vcmp.gt.f32.partialorder %v2990_v45, 0.0  ;;  %v4260_v0 = vld [vmem:[#allocation33_spill] sm:$0xff]  ;;  %vm4261_vm8 = vcmp.gt.f32.partialorder %v2998_v59, 0.0 }
 0x1d8   :  { %v3487_v62 = vsel %vm4258_vm12, %v2986_v6, %v4257_v58  ;;  %v3493_v16 = vsel %vm4259_vm7, %v2990_v45, %v3244_v8  ;;  %v3505_v40 = vsel %vm4261_vm8, %v2998_v59, %v4260_v0  ;;  %vm4262_vm12 = vcmp.gt.f32.partialorder %v3002_v11, 0.0  ;;  %v4264_v4 = vld [vmem:[#allocation35_spill] sm:$0xff] }
 0x1d9   :  { %v3511_v6 = vsel %vm4262_vm12, %v3002_v11, %v3259_v27  ;;  %vm4263_vm7 = vcmp.gt.f32.partialorder %v3006_v35, 0.0  ;;  %v3523_v8 = vsel %vm1308_vm13, %v3010_v22, %v4264_v4  ;;  %vm4265_vm11 = vcmp.gt.f32.partialorder %v3014_v5, 0.0  ;;  %v4298_v4 = vld [vmem:[#allocation9_spill] sm:$0xff] }
 0x1da   :  { %v3517_v45 = vsel %vm4263_vm7, %v3006_v35, %v3262_v12  ;;  %v3529_v59 = vsel %vm4265_vm11, %v3014_v5, %v3274_v47  ;;  %vm4266_vm8 = vcmp.gt.f32.partialorder %v3018_v23, 0.0  ;;  %vm4267_vm12 = vcmp.gt.f32.partialorder %v3022_v33, 0.0 }
 0x1db   :  { %v3535_v11 = vsel %vm4266_vm8, %v3018_v23, %v3277_v14  ;;  %v3541_v35 = vsel %vm4267_vm12, %v3022_v33, %v3280_v42  ;;  %vm1730_vm13 = vcmask 60416   ;;  %v3547_v22 = vsel %vm1312_vm14, %v3026_v36, %v3291_v38  ;;  %v4269_v23 = vld [vmem:[#allocation38_spill] sm:$0xff]  ;;  %v4271_v33 = vld [vmem:[#allocation40_spill] sm:$0xff]  ;;  %v4273_v36 = vld [vmem:[#allocation41_spill] sm:$0xff] }
 0x1dc   :  { %vm4268_vm7 = vcmp.gt.f32.partialorder %v3030_v30, 0.0  ;;  %vm4270_vm11 = vcmp.gt.f32.partialorder %v3034_v28, 0.0  ;;  %vm4272_vm8 = vcmp.gt.f32.partialorder %v3038_v44, 0.0  ;;  %v3571_v27 = vsel %vm1316_vm15, %v3042_v46, %v4273_v36  ;;  %v4280_v46 = vld [vmem:[#allocation14_spill] sm:$0xff] }
 0x1dd   :  { %v3553_v5 = vsel %vm4268_vm7, %v3030_v30, %v3294_v18  ;;  %v3559_v10 = vsel %vm4270_vm11, %v3034_v28, %v4269_v23  ;;  %v3565_v42 = vsel %vm4272_vm8, %v3038_v44, %v4271_v33  ;;  %v4274_v30 = vld [vmem:[#allocation42_spill] sm:$0xff]  ;;  %vm4275_vm14 = vcmp.gt.f32.partialorder %v3046_v49, 0.0  ;;  %v4276_v28 = vld [vmem:[#allocation44_spill] sm:$0xff]  ;;  %v4278_v44 = vld [vmem:[#allocation45_spill] sm:$0xff] }
 0x1de   :  { %v3577_v12 = vsel %vm4275_vm14, %v3046_v49, %v4274_v30  ;;  %vm4277_vm12 = vcmp.gt.f32.partialorder %v3050_v9, 0.0  ;;  %vm4279_vm7 = vcmp.gt.f32.partialorder %v3054_v15, 0.0  ;;  %v3595_v38 = vsel %vm1320_vm0, %v4221_v31, %v4280_v46  ;;  %v4300_v33 = vld [vmem:[#allocation10_spill] sm:$0xff] }
 0x1df   :  { %v3583_v47 = vsel %vm4277_vm12, %v3050_v9, %v4276_v28  ;;  %v3589_v14 = vsel %vm4279_vm7, %v3054_v15, %v4278_v44  ;;  %vm4281_vm15 = vcmp.gt.f32.partialorder %v4224_v7, 0.0  ;;  %v4282_v9 = vld [vmem:[#allocation15_spill] sm:$0xff]  ;;  %vm4283_vm11 = vcmp.gt.f32.partialorder %v4225_v24, 0.0  ;;  %v4284_v15 = vld [vmem:[#allocation16_spill] sm:$0xff] }
 0x1e0   :  { %v3601_v49 = vsel %vm4281_vm15, %v4224_v7, %v3345_v32  ;;  %v3607_v18 = vsel %vm4283_vm11, %v4225_v24, %v4282_v9  ;;  %vm4285_vm8 = vcmp.gt.f32.partialorder %v4227_v43, 0.0  ;;  %v3619_v31 = vsel %vm1324_vm1, %v3074_v13, %v3364_v39  ;;  %v4287_v24 = vld [vmem:[#allocation6_spill] sm:$0xff]  ;;  %v4290_v13 = vld [vmem:[#allocation48_spill] sm:$0xff]  ;;  %v4305_v28 = vld [vmem:[#allocation55_spill] sm:$0xff] }
 0x1e1   :  { %v3613_v58 = vsel %vm4285_vm8, %v4227_v43, %v4284_v15  ;;  %vm4286_vm0 = vcmp.gt.f32.partialorder %v3078_v17, 0.0  ;;  %vm4288_vm14 = vcmp.gt.f32.partialorder %v4230_v29, 0.0  ;;  %vm4289_vm12 = vcmp.gt.f32.partialorder %v3086_v19, 0.0  ;;  %v4306_v44 = vld [vmem:[#allocation12_spill] sm:$0xff]  ;;  %v4308_v9 = vld [vmem:[#allocation13_spill] sm:$0xff] }
 0x1e2   :  { %v3625_v32 = vsel %vm4286_vm0, %v3078_v17, %v3367_v50  ;;  %v3631_v7 = vsel %vm4288_vm14, %v4230_v29, %v4287_v24  ;;  %v3637_v43 = vsel %vm4289_vm12, %v3086_v19, %v3383_v20  ;;  %v3643_v39 = vsel %vm1328_vm2, %v3090_v25, %v4290_v13  ;;  %v4291_v17 = vld [vmem:[#allocation49_spill] sm:$0xff]  ;;  %v4294_v19 = vld [vmem:[#allocation7_spill] sm:$0xff]  ;;  %v4295_v20 = vld [vmem:[#allocation8_spill] sm:$0xff] }
 0x1e3   :  { %vm4292_vm1 = vcmp.gt.f32.partialorder %v3094_v48, 0.0  ;;  %vm4293_vm7 = vcmp.gt.f32.partialorder %v4236_v52, 0.0  ;;  %vm4296_vm15 = vcmp.gt.f32.partialorder %v4295_v20, 0.0  ;;  %v4297_v25 = vld [vmem:[#allocation51_spill] sm:$0xff]  ;;  %vm4301_vm2 = vcmp.gt.f32.partialorder %v4300_v33, 0.0  ;;  %v4309_v24 = vld [vmem:[#allocation17_spill] sm:$0xff] }
 0x1e4   :  { %v3649_v50 = vsel %vm4292_vm1, %v3094_v48, %v4291_v17  ;;  %v3655_v29 = vsel %vm4293_vm7, %v4236_v52, %v3402_v53  ;;  %v3661_v0 = vsel %vm4296_vm15, %v4295_v20, %v4294_v19  ;;  %v3667_v23 = vsel %vm1332_vm3, %v4298_v4, %v4297_v25  ;;  %v4299_v48 = vld [vmem:[#allocation53_spill] sm:$0xff]  ;;  %v4302_v53 = vld [vmem:[#allocation54_spill] sm:$0xff]  ;;  %v4303_v52 = vld [vmem:[#allocation11_spill] sm:$0xff] }
 0x1e5   :  { %v3673_v36 = vsel %vm4301_vm2, %v4300_v33, %v4299_v48  ;;  %vm4304_vm11 = vcmp.gt.f32.partialorder %v4303_v52, 0.0  ;;  %vm4307_vm8 = vcmp.gt.f32.partialorder %v4306_v44, 0.0  ;;  %v3690_v15 = vsel %vm1336_vm4, %v4308_v9, %v1400_v2  ;;  %v4311_v17 = vld [vmem:[#allocation18_spill] sm:$0xff]  ;;  %v4313_v20 = vld [vmem:[#allocation19_spill] sm:$0xff]  ;;  %v4315_v4 = vld [vmem:[#allocation21_spill] sm:$0xff] }
 0x1e6   :  { %v3679_v30 = vsel %vm4304_vm11, %v4303_v52, %v4302_v53  ;;  %v3685_v46 = vsel %vm4307_vm8, %v4306_v44, %v4305_v28  ;;  %vm4310_vm3 = vcmp.gt.f32.partialorder %v4309_v24, 0.0  ;;  %vm4312_vm0 = vcmp.gt.f32.partialorder %v4311_v17, 0.0  ;;  %v4317_v48 = vld [vmem:[#allocation22_spill] sm:$0xff]  ;;  %v4318_v33 = vld [vmem:[#allocation23_spill] sm:$0xff]  ;;  %v4322_v28 = vld [vmem:[#allocation28_spill] sm:$0xff] }
 0x1e7   :  { %v3695_v13 = vsel %vm4310_vm3, %v4309_v24, %v1401_v26  ;;  %v3700_v19 = vsel %vm4312_vm0, %v4311_v17, %v1402_v37  ;;  %vm4314_vm14 = vcmp.gt.f32.partialorder %v4313_v20, 0.0  ;;  %v3710_v2 = vsel %vm1340_vm5, %v4249_v3, %v1404_v60  ;;  %v4320_v3 = vld [vmem:[#allocation26_spill] sm:$0xff]  ;;  %v4324_v24 = vld [vmem:[#allocation32_spill] sm:$0xff] }
 0x1e8   :  { %v3705_v25 = vsel %vm4314_vm14, %v4313_v20, %v1403_v57  ;;  %vm4316_vm4 = vcmp.gt.f32.partialorder %v4315_v4, 0.0  ;;  %v3720_v37 = vsel %vm1342_vm9, %v4317_v48, %v1406_v21  ;;  %vm4319_vm12 = vcmp.gt.f32.partialorder %v4318_v33, 0.0  ;;  %v4321_v21 = vld [vmem:[#allocation27_spill] sm:$0xff]  ;;  %v4323_v44 = vld [vmem:[#allocation30_spill] sm:$0xff]  ;;  %v4327_v20 = vld [vmem:[#allocation37_spill] sm:$0xff] }
 0x1e9   :  { %v3715_v26 = vsel %vm4316_vm4, %v4315_v4, %v1405_v1  ;;  %v3725_v57 = vsel %vm4319_vm12, %v4318_v33, %v1407_v54  ;;  %v3730_v60 = vsel %vm1344_vm6, %v4255_v55, %v1408_v34  ;;  %v3735_v1 = vsel %vm1345_vm10, %v4256_v51, %v1409_v61  ;;  %v4325_v34 = vld [vmem:[#allocation34_spill] sm:$0xff]  ;;  %v4326_v61 = vld [vmem:[#allocation36_spill] sm:$0xff]  ;;  %v4328_v48 = vld [vmem:[#allocation39_spill] sm:$0xff] }
 0x1ea   :  { %v1929_v53 = vpack.c.bf16 %v4320_v3, %v4320_v3  ;;  %v1930_v52 = vpack.c.bf16 %v4321_v21, %v4321_v21  ;;  %v1931_v54 = vpack.c.bf16 %v4322_v28, %v4322_v28  ;;  %v1932_v9 = vpack.c.bf16 %v4323_v44, %v4323_v44  ;;  %v4329_v3 = vld [vmem:[#allocation43_spill] sm:$0xff]  ;;  %v4330_v28 = vld [vmem:[#allocation46_spill] sm:$0xff] }
 0x1eb   :  { %v1933_v55 = vpack.c.bf16 %v4324_v24, %v4324_v24  ;;  %v1934_v17 = vpack.c.bf16 %v4325_v34, %v4325_v34  ;;  %v1935_v51 = vpack.c.bf16 %v4326_v61, %v4326_v61  ;;  %v1936_v4 = vpack.c.bf16 %v4327_v20, %v4327_v20  ;;  %v4331_v24 = vld [vmem:[#allocation5_spill] sm:$0xff]  ;;  %v4332_v61 = vld [vmem:[#allocation47_spill] sm:$0xff] }
 0x1ec   :  { %v1937_v33 = vpack.c.bf16 %v4328_v48, %v4328_v48  ;;  %v1938_v21 = vpack.c.bf16 %v4329_v3, %v4329_v3  ;;  %1731 = vst.msk [vmem:[%s4125_s4] sm:$0xf] %vm1730_vm13, %v1929_v53  ;;  %1732 = vst.msk [vmem:[%s4125_s4 + $0x4] sm:$0xf] %vm1730_vm13, %v1930_v52  ;;  %v1939_v44 = vpack.c.bf16 %v4330_v28, %v4330_v28  ;;  %v4333_v48 = vld [vmem:[#allocation50_spill] sm:$0xff]  ;;  %v4334_v53 = vld [vmem:[#allocation52_spill] sm:$0xff] }
 0x1ed   :  { %v1940_v34 = vpack.c.bf16 %v4331_v24, %v4331_v24  ;;  %v1941_v20 = vpack.c.bf16 %v4332_v61, %v4332_v61  ;;  %v1942_v3 = vpack.c.bf16 %v4333_v48, %v4333_v48  ;;  %1733 = vst.msk [vmem:[%s4125_s4 + $0x8] sm:$0xf] %vm1730_vm13, %v1931_v54  ;;  %1734 = vst.msk [vmem:[%s4125_s4 + $0xc] sm:$0xf] %vm1730_vm13, %v1932_v9  ;;  %v4335_v28 = vld [vmem:[#allocation56_spill] sm:$0xff]  ;;  %v4336_v24 = vld [vmem:[#allocation57_spill] sm:$0xff] }
 0x1ee   :  { %1735 = vst.msk [vmem:[%s4125_s4 + $0x10] sm:$0xf] %vm1730_vm13, %v1933_v55  ;;  %1736 = vst.msk [vmem:[%s4125_s4 + $0x14] sm:$0xf] %vm1730_vm13, %v1934_v17  ;;  %v1943_v52 = vpack.c.bf16 %v4334_v53, %v4334_v53  ;;  %v1944_v54 = vpack.c.bf16 %v4335_v28, %v4335_v28  ;;  %v1945_v61 = vpack.c.bf16 %v4336_v24, %v4336_v24  ;;  %v4337_v9 = vld [vmem:[#allocation20_spill] sm:$0xff] }
 0x1ef   :  { %v1946_v48 = vpack.c.bf16 %v4337_v9, %v4337_v9  ;;  %1737 = vst.msk [vmem:[%s4125_s4 + $0x18] sm:$0xf] %vm1730_vm13, %v1935_v51  ;;  %1738 = vst.msk [vmem:[%s4125_s4 + $0x1c] sm:$0xf] %vm1730_vm13, %v1936_v4  ;;  %v1947_v55 = vpack.c.bf16 %v3472_v63, %v3472_v63  ;;  %v1948_v17 = vpack.c.bf16 %v3481_v41, %v3481_v41 }
 0x1f0   :  { %1739 = vst.msk [vmem:[%s4125_s4 + $0x20] sm:$0xf] %vm1730_vm13, %v1937_v33  ;;  %1740 = vst.msk [vmem:[%s4125_s4 + $0x24] sm:$0xf] %vm1730_vm13, %v1938_v21  ;;  %v1949_v51 = vpack.c.bf16 %v3487_v62, %v3487_v62  ;;  %v1950_v4 = vpack.c.bf16 %v3493_v16, %v3493_v16  ;;  %v1951_v62 = vpack.c.bf16 %v3499_v56, %v3499_v56 }
 0x1f1   :  { %1741 = vst.msk [vmem:[%s4125_s4 + $0x28] sm:$0xf] %vm1730_vm13, %v1939_v44  ;;  %1742 = vst.msk [vmem:[%s4125_s4 + $0x2c] sm:$0xf] %vm1730_vm13, %v1940_v34  ;;  %v1952_v41 = vpack.c.bf16 %v3505_v40, %v3505_v40  ;;  %v1953_v63 = vpack.c.bf16 %v3511_v6, %v3511_v6  ;;  %v1954_v16 = vpack.c.bf16 %v3517_v45, %v3517_v45 }
 0x1f2   :  { %1743 = vst.msk [vmem:[%s4125_s4 + $0x30] sm:$0xf] %vm1730_vm13, %v1941_v20  ;;  %1744 = vst.msk [vmem:[%s4125_s4 + $0x34] sm:$0xf] %vm1730_vm13, %v1942_v3  ;;  %v1955_v56 = vpack.c.bf16 %v3523_v8, %v3523_v8  ;;  %v1956_v40 = vpack.c.bf16 %v3529_v59, %v3529_v59  ;;  %v1957_v6 = vpack.c.bf16 %v3535_v11, %v3535_v11 }
 0x1f3   :  { %1745 = vst.msk [vmem:[%s4125_s4 + $0x38] sm:$0xf] %vm1730_vm13, %v1943_v52  ;;  %1746 = vst.msk [vmem:[%s4125_s4 + $0x3c] sm:$0xf] %vm1730_vm13, %v1944_v54  ;;  %v1958_v45 = vpack.c.bf16 %v3541_v35, %v3541_v35  ;;  %v1959_v8 = vpack.c.bf16 %v3547_v22, %v3547_v22  ;;  %v1960_v59 = vpack.c.bf16 %v3553_v5, %v3553_v5 }
 0x1f4   :  { %1747 = vst.msk [vmem:[%s4125_s4 + $0x40] sm:$0xf] %vm1730_vm13, %v1945_v61  ;;  %1748 = vst.msk [vmem:[%s4125_s4 + $0x44] sm:$0xf] %vm1730_vm13, %v1946_v48  ;;  %v1961_v11 = vpack.c.bf16 %v3559_v10, %v3559_v10  ;;  %v1962_v35 = vpack.c.bf16 %v3565_v42, %v3565_v42  ;;  %v1963_v22 = vpack.c.bf16 %v3571_v27, %v3571_v27 }
 0x1f5   :  { %1749 = vst.msk [vmem:[%s4125_s4 + $0x48] sm:$0xf] %vm1730_vm13, %v1947_v55  ;;  %1750 = vst.msk [vmem:[%s4125_s4 + $0x4c] sm:$0xf] %vm1730_vm13, %v1948_v17  ;;  %v1964_v5 = vpack.c.bf16 %v3577_v12, %v3577_v12  ;;  %v1965_v10 = vpack.c.bf16 %v3583_v47, %v3583_v47  ;;  %v1966_v42 = vpack.c.bf16 %v3589_v14, %v3589_v14 }
 0x1f6   :  { %1751 = vst.msk [vmem:[%s4125_s4 + $0x50] sm:$0xf] %vm1730_vm13, %v1949_v51  ;;  %1752 = vst.msk [vmem:[%s4125_s4 + $0x54] sm:$0xf] %vm1730_vm13, %v1950_v4  ;;  %v1967_v27 = vpack.c.bf16 %v3595_v38, %v3595_v38  ;;  %v1968_v12 = vpack.c.bf16 %v3601_v49, %v3601_v49  ;;  %v1969_v47 = vpack.c.bf16 %v3607_v18, %v3607_v18 }
 0x1f7   :  { %1753 = vst.msk [vmem:[%s4125_s4 + $0x58] sm:$0xf] %vm1730_vm13, %v1951_v62  ;;  %1754 = vst.msk [vmem:[%s4125_s4 + $0x5c] sm:$0xf] %vm1730_vm13, %v1952_v41  ;;  %v1970_v14 = vpack.c.bf16 %v3613_v58, %v3613_v58  ;;  %v1971_v38 = vpack.c.bf16 %v3619_v31, %v3619_v31  ;;  %v1972_v49 = vpack.c.bf16 %v3625_v32, %v3625_v32 }
 0x1f8   :  { %1755 = vst.msk [vmem:[%s4125_s4 + $0x60] sm:$0xf] %vm1730_vm13, %v1953_v63  ;;  %1756 = vst.msk [vmem:[%s4125_s4 + $0x64] sm:$0xf] %vm1730_vm13, %v1954_v16  ;;  %v1973_v18 = vpack.c.bf16 %v3631_v7, %v3631_v7  ;;  %v1974_v58 = vpack.c.bf16 %v3637_v43, %v3637_v43  ;;  %v1975_v31 = vpack.c.bf16 %v3643_v39, %v3643_v39 }
 0x1f9   :  { %1757 = vst.msk [vmem:[%s4125_s4 + $0x68] sm:$0xf] %vm1730_vm13, %v1955_v56  ;;  %1758 = vst.msk [vmem:[%s4125_s4 + $0x6c] sm:$0xf] %vm1730_vm13, %v1956_v40  ;;  %v1976_v32 = vpack.c.bf16 %v3649_v50, %v3649_v50  ;;  %v1977_v7 = vpack.c.bf16 %v3655_v29, %v3655_v29  ;;  %v1978_v43 = vpack.c.bf16 %v3661_v0, %v3661_v0 }
 0x1fa   :  { %1759 = vst.msk [vmem:[%s4125_s4 + $0x70] sm:$0xf] %vm1730_vm13, %v1957_v6  ;;  %1760 = vst.msk [vmem:[%s4125_s4 + $0x74] sm:$0xf] %vm1730_vm13, %v1958_v45  ;;  %v1979_v39 = vpack.c.bf16 %v3667_v23, %v3667_v23  ;;  %v1980_v50 = vpack.c.bf16 %v3673_v36, %v3673_v36  ;;  %v1981_v29 = vpack.c.bf16 %v3679_v30, %v3679_v30 }
 0x1fb   :  { %1761 = vst.msk [vmem:[%s4125_s4 + $0x78] sm:$0xf] %vm1730_vm13, %v1959_v8  ;;  %1762 = vst.msk [vmem:[%s4125_s4 + $0x7c] sm:$0xf] %vm1730_vm13, %v1960_v59  ;;  %v1982_v0 = vpack.c.bf16 %v3685_v46, %v3685_v46  ;;  %v1983_v23 = vpack.c.bf16 %v3690_v15, %v3690_v15  ;;  %v1984_v36 = vpack.c.bf16 %v3695_v13, %v3695_v13 }
 0x1fc   :  { %1763 = vst.msk [vmem:[%s4125_s4 + $0x80] sm:$0xf] %vm1730_vm13, %v1961_v11  ;;  %1764 = vst.msk [vmem:[%s4125_s4 + $0x84] sm:$0xf] %vm1730_vm13, %v1962_v35  ;;  %v1985_v30 = vpack.c.bf16 %v3700_v19, %v3700_v19  ;;  %v1986_v46 = vpack.c.bf16 %v3705_v25, %v3705_v25  ;;  %v1987_v15 = vpack.c.bf16 %v3710_v2, %v3710_v2 }
 0x1fd   :  { %1765 = vst.msk [vmem:[%s4125_s4 + $0x88] sm:$0xf] %vm1730_vm13, %v1963_v22  ;;  %1766 = vst.msk [vmem:[%s4125_s4 + $0x8c] sm:$0xf] %vm1730_vm13, %v1964_v5  ;;  %v1988_v13 = vpack.c.bf16 %v3715_v26, %v3715_v26  ;;  %v1989_v19 = vpack.c.bf16 %v3720_v37, %v3720_v37  ;;  %v1990_v25 = vpack.c.bf16 %v3725_v57, %v3725_v57 }
 0x1fe   :  { %1767 = vst.msk [vmem:[%s4125_s4 + $0x90] sm:$0xf] %vm1730_vm13, %v1965_v10  ;;  %1768 = vst.msk [vmem:[%s4125_s4 + $0x94] sm:$0xf] %vm1730_vm13, %v1966_v42  ;;  %v1991_v2 = vpack.c.bf16 %v3730_v60, %v3730_v60  ;;  %v1992_v26 = vpack.c.bf16 %v3735_v1, %v3735_v1 }
 0x1ff   :  { %1769 = vst.msk [vmem:[%s4125_s4 + $0x98] sm:$0xf] %vm1730_vm13, %v1967_v27  ;;  %1770 = vst.msk [vmem:[%s4125_s4 + $0x9c] sm:$0xf] %vm1730_vm13, %v1968_v12 }
 0x200   :  { %1771 = vst.msk [vmem:[%s4125_s4 + $0xa0] sm:$0xf] %vm1730_vm13, %v1969_v47  ;;  %1772 = vst.msk [vmem:[%s4125_s4 + $0xa4] sm:$0xf] %vm1730_vm13, %v1970_v14 }
 0x201   :  { %1773 = vst.msk [vmem:[%s4125_s4 + $0xa8] sm:$0xf] %vm1730_vm13, %v1971_v38  ;;  %1774 = vst.msk [vmem:[%s4125_s4 + $0xac] sm:$0xf] %vm1730_vm13, %v1972_v49 }
 0x202   :  { %1775 = vst.msk [vmem:[%s4125_s4 + $0xb0] sm:$0xf] %vm1730_vm13, %v1973_v18  ;;  %1776 = vst.msk [vmem:[%s4125_s4 + $0xb4] sm:$0xf] %vm1730_vm13, %v1974_v58 }
 0x203   :  { %1777 = vst.msk [vmem:[%s4125_s4 + $0xb8] sm:$0xf] %vm1730_vm13, %v1975_v31  ;;  %1778 = vst.msk [vmem:[%s4125_s4 + $0xbc] sm:$0xf] %vm1730_vm13, %v1976_v32 }
 0x204   :  { %1779 = vst.msk [vmem:[%s4125_s4 + $0xc0] sm:$0xf] %vm1730_vm13, %v1977_v7  ;;  %1780 = vst.msk [vmem:[%s4125_s4 + $0xc4] sm:$0xf] %vm1730_vm13, %v1978_v43 }
 0x205   :  { %1781 = vst.msk [vmem:[%s4125_s4 + $0xc8] sm:$0xf] %vm1730_vm13, %v1979_v39  ;;  %1782 = vst.msk [vmem:[%s4125_s4 + $0xcc] sm:$0xf] %vm1730_vm13, %v1980_v50 }
 0x206   :  { %1783 = vst.msk [vmem:[%s4125_s4 + $0xd0] sm:$0xf] %vm1730_vm13, %v1981_v29  ;;  %1784 = vst.msk [vmem:[%s4125_s4 + $0xd4] sm:$0xf] %vm1730_vm13, %v1982_v0 }
 0x207   :  { %1785 = vst.msk [vmem:[%s4125_s4 + $0xd8] sm:$0xf] %vm1730_vm13, %v1983_v23  ;;  %1786 = vst.msk [vmem:[%s4125_s4 + $0xdc] sm:$0xf] %vm1730_vm13, %v1984_v36 }
 0x208   :  { %1787 = vst.msk [vmem:[%s4125_s4 + $0xe0] sm:$0xf] %vm1730_vm13, %v1985_v30  ;;  %1788 = vst.msk [vmem:[%s4125_s4 + $0xe4] sm:$0xf] %vm1730_vm13, %v1986_v46 }
 0x209   :  { %1789 = vst.msk [vmem:[%s4125_s4 + $0xe8] sm:$0xf] %vm1730_vm13, %v1987_v15  ;;  %1790 = vst.msk [vmem:[%s4125_s4 + $0xec] sm:$0xf] %vm1730_vm13, %v1988_v13 }
 0x20a   :  { %1791 = vst.msk [vmem:[%s4125_s4 + $0xf0] sm:$0xf] %vm1730_vm13, %v1989_v19  ;;  %1792 = vst.msk [vmem:[%s4125_s4 + $0xf4] sm:$0xf] %vm1730_vm13, %v1990_v25 }
 0x20b   :  { %1793 = vst.msk [vmem:[%s4125_s4 + $0xf8] sm:$0xf] %vm1730_vm13, %v1991_v2  ;;  %1794 = vst.msk [vmem:[%s4125_s4 + $0xfc] sm:$0xf] %vm1730_vm13, %v1992_v26 }

// kernel: base_model_forward.4
= control target key start
LH: loop header
LB: loop body
LE: loop exit
PB: predicated region body
PF: predicated region fallthrough
CT: control target
= control target key end

     0   :  { %vm110_vm0 = vcmask 588800   ;;  %vm135_vm1 = vcmask 1043456   ;;  %vm259_vm2 = vcmask 122880   ;;  %v689_v14 = vmov 0.0   ;;  %s918_s1 = inlined_call_operand.vmem [shape: bf16[72,16], index: 1, kind: input, shape index: {}]   ;;  %s919_s0 = inlined_call_operand.vmem [shape: bf16[128,72], index: 0, kind: input, shape index: {}]   ;;  %s920_s2 = inlined_call_operand.vmem [shape: f32[1,16], index: 2, kind: input, shape index: {}]   ;;  %s921_s3 = inlined_call_operand.vmem [shape: f32[1,16], index: 3, kind: input, shape index: {}]   ;;  %s922_s4 = inlined_call_operand.vmem [shape: bf16[128,16], index: 4, kind: output, shape index: {}]  }
   0x1   :  { %v674_v0 = vld [vmem:[%s918_s1] sm:$0xff]   ;;  %v675_v1 = vld [vmem:[%s918_s1 + $0x8] sm:$0xff]   ;;  %v676_v2 = vld [vmem:[%s918_s1 + $0x10] sm:$0xff]   ;;  %260 = vst.msk [vmem:[#allocation3] sm:$0x1] %vm259_vm2, %v689_v14  ;;  %vm238_vm3 = vcmask 130048  }
   0x2   :  { %635 = vmatprep.subr.bf16.mxu0 %v674_v0  ;;  %661 = vmatprep.subr.bf16.mxu1 %v674_v0  ;;  %v679_v3 = vld [vmem:[%s919_s0] sm:$0xff]   ;;  %v677_v4 = vld [vmem:[%s918_s1 + $0x18] sm:$0xff]   ;;  %v680_v8 = vld [vmem:[%s919_s0 + $0x8] sm:$0xff]   ;;  %261 = vst.msk [vmem:[#allocation4] sm:$0x1] %vm259_vm2, %v689_v14 }
   0x3   :  { %636 = vmatpush3.bf16.msra.mxu0 %v674_v0  ;;  %666 = vmatpush3.bf16.msra.mxu1 %v674_v0  ;;  %v683_v5 = vld [vmem:[%s919_s0 + $0x20] sm:$0xff]   ;;  %v684_v9 = vld [vmem:[%s919_s0 + $0x28] sm:$0xff]   ;;  %v681_v10 = vld [vmem:[%s919_s0 + $0x10] sm:$0xff]  }
   0x4   :  { %637 = vmatprep.subr.bf16.mxu0 %v675_v1  ;;  %662 = vmatprep.subr.bf16.mxu1 %v675_v1  ;;  %v678_v6 = vld [vmem:[%s918_s1 + $0x20] ss:$0 sps:$4 sm:$0xff]   ;;  %v685_v11 = vld [vmem:[%s919_s0 + $0x30] sm:$0xff]   ;;  %v682_v12 = vld [vmem:[%s919_s0 + $0x18] sm:$0xff]  }
   0x5   :  { %645 = vmatprep.mubr.msk.bf16.mxu0 %vm110_vm0, %v679_v3  ;;  %653 = vmatprep.mubr.msk.bf16.mxu1 %vm110_vm0, %v683_v5  ;;  %v137_v7 = vsel %vm135_vm1, %v678_v6, 0  ;;  %v686_v13 = vld [vmem:[%s919_s0 + $0x38] sm:$0xff]  }
   0x7   :  { %638 = vmatpush3.bf16.msra.mxu0 %v675_v1  ;;  %667 = vmatpush3.bf16.msra.mxu1 %v675_v1 }
   0x8   :  { %639 = vmatprep.subr.bf16.mxu0 %v676_v2  ;;  %663 = vmatprep.subr.bf16.mxu1 %v676_v2 }
   0xb   :  { %640 = vmatpush3.bf16.msra.mxu0 %v676_v2  ;;  %668 = vmatpush3.bf16.msra.mxu1 %v676_v2 }
   0xc   :  { %641 = vmatprep.subr.bf16.mxu0 %v677_v4  ;;  %664 = vmatprep.subr.bf16.mxu1 %v677_v4 }
   0xf   :  { %642 = vmatpush3.bf16.msra.mxu0 %v677_v4  ;;  %669 = vmatpush3.bf16.msra.mxu1 %v677_v4 }
  0x10   :  { %671 = vmatprep.subr.msk.bf16.mxu0 %vm135_vm1, %v678_v6  ;;  %672 = vmatprep.subr.msk.bf16.mxu1 %vm135_vm1, %v678_v6 }
  0x13   :  { %644 = vmatpush3.bf16.msra.mxu0 %v137_v7  ;;  %670 = vmatpush3.bf16.msra.mxu1 %v137_v7 }
  0x16   :  { %646 = vmatmul.mubr.msk.bf16.vlgmr.msra.gmra.mrb[0].mxu0 %vm110_vm0, %v680_v8  ;;  %654 = vmatmul.mubr.msk.bf16.vlgmr.msra.gmra.mrb[0].mxu1 %vm110_vm0, %v684_v9 }
  0x17   :  { %649 = vmatprep.mubr.msk.bf16.mxu0 %vm110_vm0, %v681_v10  ;;  %657 = vmatprep.mubr.msk.bf16.mxu1 %vm110_vm0, %v685_v11 }
  0x1e   :  { %650 = vmatmul.mubr.msk.bf16.gmra.mrb[4].mxu0 %vm110_vm0, %v682_v12  ;;  %658 = vmatmul.mubr.msk.bf16.gmra.mrb[4].mxu1 %vm110_vm0, %v686_v13 }
  0xe9   :  { %v647_v15 = vpop.f32.mrb[0].mxu0  ;;  %v764_v16 = vpop.f32.mrb[0].mxu1 }
  0xea   :  { %241 = vst.msk [vmem:[#allocation2 + $0x10] sm:$0xff] %vm238_vm3, %v647_v15  ;;  %v173_v17 = vpop.f32.mrb[1].mxu0  ;;  %249 = vst.msk [vmem:[#allocation2 + $0x50] sm:$0xff] %vm238_vm3, %v764_v16  ;;  %v205_v18 = vpop.f32.mrb[1].mxu1  ;;  %v306_v24 = vmul.f32 %v647_v15, %v647_v15  ;;  %v266_v29 = vsel %vm238_vm3, %v647_v15, 0.0  ;;  %v314_v10 = vmul.f32 %v764_v16, %v764_v16  ;;  %v282_v14 = vsel %vm238_vm3, %v764_v16, 0.0 }
  0xeb   :  { %239 = vst.msk [vmem:[#allocation2] sm:$0xff] %vm238_vm3, %v173_v17  ;;  %v304_v19 = vmul.f32 %v173_v17, %v173_v17  ;;  %v648_v20 = vpop.f32.mrb[2].mxu0  ;;  %247 = vst.msk [vmem:[#allocation2 + $0x40] sm:$0xff] %vm238_vm3, %v205_v18  ;;  %v771_v21 = vpop.f32.mrb[2].mxu1  ;;  %v263_v25 = vsel %vm238_vm3, %v173_v17, 0.0  ;;  %v312_v61 = vmul.f32 %v205_v18, %v205_v18  ;;  %v278_v2 = vsel %vm238_vm3, %v205_v18, 0.0 }
  0xec   :  { %242 = vst.msk [vmem:[#allocation2 + $0x18] sm:$0xff] %vm238_vm3, %v648_v20  ;;  %v176_v22 = vpop.f32.mrb[3].mxu0  ;;  %250 = vst.msk [vmem:[#allocation2 + $0x58] sm:$0xff] %vm238_vm3, %v771_v21  ;;  %v208_v23 = vpop.f32.mrb[3].mxu1  ;;  %v307_v31 = vmul.f32 %v648_v20, %v648_v20  ;;  %v323_v35 = vsel %vm238_vm3, %v306_v24, 0.0  ;;  %v268_v36 = vsel %vm238_vm3, %v648_v20, 0.0  ;;  %v315_v15 = vmul.f32 %v771_v21, %v771_v21 }
  0xed   :  { %240 = vst.msk [vmem:[#allocation2 + $0x8] sm:$0xff] %vm238_vm3, %v176_v22  ;;  %v264_v26 = vsel %vm238_vm3, %v176_v22, 0.0  ;;  %v305_v27 = vmul.f32 %v176_v22, %v176_v22  ;;  %248 = vst.msk [vmem:[#allocation2 + $0x48] sm:$0xff] %vm238_vm3, %v208_v23  ;;  %v320_v30 = vsel %vm238_vm3, %v304_v19, 0.0  ;;  %v335_v6 = vsel %vm238_vm3, %v312_v61, 0.0 }
  0xee   :  { %v265_v28 = vadd.f32 %v264_v26, %v263_v25  ;;  %v325_v43 = vsel %vm238_vm3, %v307_v31, 0.0  ;;  %v313_v7 = vmul.f32 %v208_v23, %v208_v23  ;;  %v280_v11 = vsel %vm238_vm3, %v208_v23, 0.0 }
  0xef   :  { %v321_v32 = vsel %vm238_vm3, %v305_v27, 0.0  ;;  %v339_v22 = vsel %vm238_vm3, %v314_v10, 0.0  ;;  %v284_v24 = vsel %vm238_vm3, %v771_v21, 0.0  ;;  %v341_v27 = vsel %vm238_vm3, %v315_v15, 0.0 }
  0xf0   :  { %v267_v33 = vadd.f32 %v266_v29, %v265_v28  ;;  %v322_v34 = vadd.f32 %v321_v32, %v320_v30  ;;  %v337_v17 = vsel %vm238_vm3, %v313_v7, 0.0  ;;  %v371_v7 = vld [vmem:[%s920_s2] sm:$0x1] }
  0xf1   :  { %v651_v37 = vpop.f32.mrb[4].mxu0  ;;  %v785_v38 = vpop.f32.mrb[4].mxu1 }
  0xf2   :  { %v324_v39 = vadd.f32 %v323_v35, %v322_v34  ;;  %245 = vst.msk [vmem:[#allocation2 + $0x30] sm:$0xff] %vm238_vm3, %v651_v37  ;;  %v189_v40 = vpop.f32.mrb[5].mxu0  ;;  %v269_v41 = vadd.f32 %v268_v36, %v267_v33  ;;  %253 = vst.msk [vmem:[#allocation2 + $0x70] sm:$0xff] %vm238_vm3, %v785_v38  ;;  %v221_v42 = vpop.f32.mrb[5].mxu1  ;;  %v310_v52 = vmul.f32 %v651_v37, %v651_v37  ;;  %v274_v58 = vsel %vm238_vm3, %v651_v37, 0.0  ;;  %v376_v15 = vld [vmem:[#allocation2] sm:$0xff] }
  0xf3   :  { %243 = vst.msk [vmem:[#allocation2 + $0x20] sm:$0xff] %vm238_vm3, %v189_v40  ;;  %v270_v44 = vsel %vm238_vm3, %v189_v40, 0.0  ;;  %v308_v45 = vmul.f32 %v189_v40, %v189_v40  ;;  %v652_v46 = vpop.f32.mrb[6].mxu0  ;;  %251 = vst.msk [vmem:[#allocation2 + $0x60] sm:$0xff] %vm238_vm3, %v221_v42  ;;  %v660_v47 = vpop.f32.mrb[6].mxu1  ;;  %v316_v18 = vmul.f32 %v221_v42, %v221_v42  ;;  %v286_v23 = vsel %vm238_vm3, %v221_v42, 0.0 }
  0xf4   :  { %v271_v48 = vadd.f32 %v270_v44, %v269_v41  ;;  %v326_v49 = vadd.f32 %v325_v43, %v324_v39  ;;  %246 = vst.msk [vmem:[#allocation2 + $0x38] sm:$0xff] %vm238_vm3, %v652_v46  ;;  %v192_v50 = vpop.f32.mrb[7].mxu0  ;;  %254 = vst.msk [vmem:[#allocation2 + $0x78] sm:$0xff] %vm238_vm3, %v660_v47  ;;  %v224_v51 = vpop.f32.mrb[7].mxu1  ;;  %v311_v59 = vmul.f32 %v652_v46, %v652_v46  ;;  %v331_v0 = vsel %vm238_vm3, %v310_v52, 0.0 }
  0xf5   :  { %v327_v53 = vsel %vm238_vm3, %v308_v45, 0.0  ;;  %244 = vst.msk [vmem:[#allocation2 + $0x28] sm:$0xff] %vm238_vm3, %v192_v50  ;;  %v272_v54 = vsel %vm238_vm3, %v192_v50, 0.0  ;;  %v309_v55 = vmul.f32 %v192_v50, %v192_v50  ;;  %252 = vst.msk [vmem:[#allocation2 + $0x68] sm:$0xff] %vm238_vm3, %v224_v51  ;;  %v276_v1 = vsel %vm238_vm3, %v652_v46, 0.0 }
  0xf6   :  { %v328_v56 = vadd.f32 %v327_v53, %v326_v49  ;;  %v273_v57 = vadd.f32 %v272_v54, %v271_v48  ;;  %v333_v5 = vsel %vm238_vm3, %v311_v59, 0.0  ;;  %v343_v16 = vsel %vm238_vm3, %v316_v18, 0.0 }
  0xf7   :  { %v329_v60 = vsel %vm238_vm3, %v309_v55, 0.0  ;;  %v317_v28 = vmul.f32 %v224_v51, %v224_v51  ;;  %v318_v31 = vmul.f32 %v785_v38, %v785_v38  ;;  %v288_v32 = vsel %vm238_vm3, %v224_v51, 0.0  ;;  %v262_v55 = vld [vmem:[#allocation3] sm:$0x1] }
  0xf8   :  { %v275_v62 = vadd.f32 %v274_v58, %v273_v57  ;;  %v330_v63 = vadd.f32 %v329_v60, %v328_v56  ;;  %v290_v21 = vsel %vm238_vm3, %v785_v38, 0.0  ;;  %v319_v35 = vmul.f32 %v660_v47, %v660_v47  ;;  %v303_v58 = vld [vmem:[#allocation4] sm:$0x1] }
  0xf9   :  { %v345_v36 = vsel %vm238_vm3, %v317_v28, 0.0  ;;  %v347_v40 = vsel %vm238_vm3, %v318_v31, 0.0  ;;  %v292_v41 = vsel %vm238_vm3, %v660_v47, 0.0  ;;  %v387_v31 = vld [vmem:[#allocation2 + $0x58] sm:$0xff] }
  0xfa   :  { %v332_v3 = vadd.f32 %v331_v0, %v330_v63  ;;  %v277_v4 = vadd.f32 %v276_v1, %v275_v62  ;;  %v349_v44 = vsel %vm238_vm3, %v319_v35, 0.0 }
  0xfc   :  { %v279_v8 = vadd.f32 %v278_v2, %v277_v4  ;;  %v334_v9 = vadd.f32 %v333_v5, %v332_v3  ;;  %v393_v5 = vlaneseq }
  0xfe   :  { %v336_v12 = vadd.f32 %v335_v6, %v334_v9  ;;  %v281_v13 = vadd.f32 %v280_v11, %v279_v8  ;;  %v394_v6 = vshrl.u32 %v393_v5, 7  ;;  %v373_v11 = vld [vmem:[%s921_s3] sm:$0x1] }
 0x100   :  { %v283_v19 = vadd.f32 %v282_v14, %v281_v13  ;;  %v338_v20 = vadd.f32 %v337_v17, %v336_v12  ;;  %v395_v8 = vsub.s32 0, %v394_v6  ;;  %v378_v14 = vld [vmem:[#allocation2 + $0x10] sm:$0xff]  ;;  %v384_v17 = vld [vmem:[#allocation2 + $0x40] sm:$0xff] }
 0x102   :  { %v340_v25 = vadd.f32 %v339_v22, %v338_v20  ;;  %v285_v26 = vadd.f32 %v284_v24, %v283_v19  ;;  %v379_v19 = vld [vmem:[#allocation2 + $0x18] sm:$0xff]  ;;  %v377_v20 = vld [vmem:[#allocation2 + $0x8] sm:$0xff]  ;;  %v380_v22 = vld [vmem:[#allocation2 + $0x20] sm:$0xff] }
 0x103   :  { %v386_v24 = vld [vmem:[#allocation2 + $0x50] sm:$0xff] }
 0x104   :  { %v287_v29 = vadd.f32 %v286_v23, %v285_v26  ;;  %v342_v30 = vadd.f32 %v341_v27, %v340_v25  ;;  %v382_v25 = vld [vmem:[#allocation2 + $0x30] sm:$0xff]  ;;  %v383_v26 = vld [vmem:[#allocation2 + $0x38] sm:$0xff]  ;;  %v381_v27 = vld [vmem:[#allocation2 + $0x28] sm:$0xff] }
 0x106   :  { %v344_v33 = vadd.f32 %v343_v16, %v342_v30  ;;  %v289_v34 = vadd.f32 %v288_v32, %v287_v29  ;;  %v385_v32 = vld [vmem:[#allocation2 + $0x48] sm:$0xff] }
 0x108   :  { %v291_v37 = vadd.f32 %v290_v21, %v289_v34  ;;  %v346_v39 = vadd.f32 %v345_v36, %v344_v33  ;;  %v390_v33 = vld [vmem:[#allocation2 + $0x70] sm:$0xff] }
 0x10a   :  { %v293_v42 = vadd.f32 %v292_v41, %v291_v37  ;;  %v348_v43 = vadd.f32 %v347_v40, %v346_v39  ;;  %v388_v37 = vld [vmem:[#allocation2 + $0x60] sm:$0xff]  ;;  %v391_v39 = vld [vmem:[#allocation2 + $0x78] sm:$0xff]  ;;  %v389_v40 = vld [vmem:[#allocation2 + $0x68] sm:$0xff] }
 0x10c   :  { %v294_v45 = vrot.slane %v293_v42, 4  ;;  %v350_v46 = vadd.f32 %v349_v44, %v348_v43 }
 0x10e   :  { %v295_v48 = vadd.f32 %v294_v45, %v293_v42  ;;  %v351_v49 = vrot.slane %v350_v46, 4 }
 0x110   :  { %v296_v50 = vrot.slane %v295_v48, 2  ;;  %v352_v51 = vadd.f32 %v351_v49, %v350_v46 }
 0x112   :  { %v297_v38 = vadd.f32 %v296_v50, %v295_v48  ;;  %v353_v52 = vrot.slane %v352_v51, 2 }
 0x114   :  { %v298_v53 = vrot.slane %v297_v38, 1  ;;  %v354_v54 = vadd.f32 %v353_v52, %v352_v51 }
 0x116   :  { %v299_v56 = vadd.f32 %v298_v53, %v297_v38  ;;  %v355_v57 = vrot.slane %v354_v54, 1 }
 0x118   :  { %v300_v59 = vadd.f32 %v299_v56, %v262_v55  ;;  %v356_v47 = vadd.f32 %v355_v57, %v354_v54 }
 0x11a   :  { %302 = vst.msk [vmem:[#allocation3] sm:$0x1] %vm259_vm2, %v300_v59  ;;  %v357_v60 = vadd.f32 %v356_v47, %v303_v58 }
 0x11c   :  { %358 = vst.msk [vmem:[#allocation4] sm:$0x1] %vm259_vm2, %v357_v60 }
 0x121   :  { %v362_v61 = vld [vmem:[#allocation3] sm:$0x1] }
 0x122   :  { %v363_v62 = vmul.f32 0.0078125, %v362_v61 }
 0x123   :  { %v364_v63 = vld [vmem:[#allocation4] sm:$0x1] }
 0x124   :  { %v365_v0 = vmul.f32 0.0078125, %v364_v63  ;;  %v366_v1 = vmul.f32 %v363_v62, %v363_v62 }
 0x126   :  { %v367_v2 = vsub.f32 %v365_v0, %v366_v1 }
 0x128   :  { %v368_v3 = vmax.f32 %v367_v2, 0.0 }
 0x12a   :  { %v369_v4 = vadd.f32 1e-05, %v368_v3 }
 0x12c   :  { %687 = vrsqrt.f32 %v369_v4 }
 0x136   :  { %v688_v9 = vpop.eup %687 }
 0x137   :  { %v372_v10 = vmul.f32 %v688_v9, %v371_v7 }
 0x139   :  { %v374_v12 = vmul.f32 %v372_v10, %v363_v62  ;;  %v396_v13 = vrot.slane %v372_v10, %v395_v8 }
 0x13b   :  { %v375_v18 = vsub.f32 %v373_v11, %v374_v12  ;;  %v398_v23 = vmul.f32 %v396_v13, %v376_v15  ;;  %v399_v16 = vmul.f32 %v396_v13, %v377_v20  ;;  %v400_v28 = vmul.f32 %v396_v13, %v378_v14 }
 0x13c   :  { %v401_v29 = vmul.f32 %v396_v13, %v379_v19  ;;  %v402_v30 = vmul.f32 %v396_v13, %v380_v22  ;;  %v403_v34 = vmul.f32 %v396_v13, %v381_v27  ;;  %v404_v21 = vmul.f32 %v396_v13, %v382_v25 }
 0x13d   :  { %v405_v35 = vmul.f32 %v396_v13, %v383_v26  ;;  %v406_v36 = vmul.f32 %v396_v13, %v384_v17  ;;  %v407_v41 = vmul.f32 %v396_v13, %v385_v32  ;;  %v408_v42 = vmul.f32 %v396_v13, %v386_v24 }
 0x13e   :  { %v409_v43 = vmul.f32 %v396_v13, %v387_v31  ;;  %v418_v44 = vrot.slane %v375_v18, %v395_v8  ;;  %v410_v45 = vmul.f32 %v396_v13, %v388_v37  ;;  %v411_v46 = vmul.f32 %v396_v13, %v389_v40 }
 0x13f   :  { %v412_v48 = vmul.f32 %v396_v13, %v390_v33  ;;  %v413_v49 = vmul.f32 %v396_v13, %v391_v39 }
 0x140   :  { %v420_v50 = vadd.f32 %v418_v44, %v398_v23  ;;  %v421_v51 = vadd.f32 %v418_v44, %v399_v16  ;;  %v422_v38 = vadd.f32 %v418_v44, %v400_v28  ;;  %v423_v52 = vadd.f32 %v418_v44, %v401_v29 }
 0x141   :  { %v424_v53 = vadd.f32 %v418_v44, %v402_v30  ;;  %v425_v54 = vadd.f32 %v418_v44, %v403_v34  ;;  %v426_v55 = vadd.f32 %v418_v44, %v404_v21  ;;  %v427_v56 = vadd.f32 %v418_v44, %v405_v35 }
 0x142   :  { %v428_v57 = vadd.f32 %v418_v44, %v406_v36  ;;  %v429_v58 = vadd.f32 %v418_v44, %v407_v41  ;;  %v430_v59 = vadd.f32 %v418_v44, %v408_v42  ;;  %v431_v47 = vadd.f32 %v418_v44, %v409_v43 }
 0x143   :  { %v432_v60 = vadd.f32 %v418_v44, %v410_v45  ;;  %v433_v61 = vadd.f32 %v418_v44, %v411_v46  ;;  %v434_v62 = vadd.f32 %v418_v44, %v412_v48  ;;  %v435_v63 = vadd.f32 %v418_v44, %v413_v49 }
 0x144   :  { %vm437_vm5 = vcmp.gt.f32.partialorder %v421_v51, 0.0  ;;  %vm438_vm6 = vcmp.gt.f32.partialorder %v422_v38, 0.0  ;;  %vm439_vm7 = vcmp.gt.f32.partialorder %v423_v52, 0.0  ;;  %vm440_vm8 = vcmp.gt.f32.partialorder %v424_v53, 0.0 }
 0x145   :  { %vm441_vm9 = vcmp.gt.f32.partialorder %v425_v54, 0.0  ;;  %vm443_vm11 = vcmp.gt.f32.partialorder %v427_v56, 0.0  ;;  %vm444_vm12 = vcmp.gt.f32.partialorder %v428_v57, 0.0  ;;  %vm445_vm13 = vcmp.gt.f32.partialorder %v429_v58, 0.0 }
 0x146   :  { %vm446_vm14 = vcmp.gt.f32.partialorder %v430_v59, 0.0  ;;  %vm447_vm15 = vcmp.gt.f32.partialorder %v431_v47, 0.0  ;;  %vm448_vm0 = vcmp.gt.f32.partialorder %v432_v60, 0.0  ;;  %vm449_vm1 = vcmp.gt.f32.partialorder %v433_v61, 0.0 }
 0x147   :  { %vm450_vm2 = vcmp.gt.f32.partialorder %v434_v62, 0.0  ;;  %vm451_vm3 = vcmp.gt.f32.partialorder %v435_v63, 0.0  ;;  %v452_v0 = vmul.f32 0.01, %v420_v50  ;;  %v453_v1 = vmul.f32 0.01, %v421_v51 }
 0x148   :  { %v454_v2 = vmul.f32 0.01, %v422_v38  ;;  %v455_v3 = vmul.f32 0.01, %v423_v52  ;;  %v456_v4 = vmul.f32 0.01, %v424_v53 }
 0x149   :  { %v457_v5 = vmul.f32 0.01, %v425_v54  ;;  %v458_v6 = vmul.f32 0.01, %v426_v55  ;;  %v459_v7 = vmul.f32 0.01, %v427_v56  ;;  %v469_v13 = vsel %vm437_vm5, %v421_v51, %v453_v1 }
 0x14a   :  { %v460_v8 = vmul.f32 0.01, %v428_v57  ;;  %vm923_vm10 = vcmp.gt.f32.partialorder %v420_v50, 0.0  ;;  %v461_v10 = vmul.f32 0.01, %v429_v58  ;;  %v470_v18 = vsel %vm438_vm6, %v422_v38, %v454_v2 }
 0x14b   :  { %v468_v9 = vsel %vm923_vm10, %v420_v50, %v452_v0  ;;  %v462_v11 = vmul.f32 0.01, %v430_v59  ;;  %v463_v12 = vmul.f32 0.01, %v431_v47  ;;  %v464_v14 = vmul.f32 0.01, %v432_v60 }
 0x14c   :  { %v465_v15 = vmul.f32 0.01, %v433_v61  ;;  %v466_v17 = vmul.f32 0.01, %v434_v62  ;;  %v467_v19 = vmul.f32 0.01, %v435_v63  ;;  %v471_v20 = vsel %vm439_vm7, %v423_v52, %v455_v3 }
 0x14d   :  { %v472_v22 = vsel %vm440_vm8, %v424_v53, %v456_v4  ;;  %v473_v24 = vsel %vm441_vm9, %v425_v54, %v457_v5  ;;  %vm924_vm4 = vcmp.gt.f32.partialorder %v426_v55, 0.0  ;;  %v475_v25 = vsel %vm443_vm11, %v427_v56, %v459_v7 }
 0x14e   :  { %v474_v23 = vsel %vm924_vm4, %v426_v55, %v458_v6  ;;  %v476_v26 = vsel %vm444_vm12, %v428_v57, %v460_v8  ;;  %v477_v27 = vsel %vm445_vm13, %v429_v58, %v461_v10  ;;  %v478_v16 = vsel %vm446_vm14, %v430_v59, %v462_v11 }
 0x14f   :  { %v479_v28 = vsel %vm447_vm15, %v431_v47, %v463_v12  ;;  %v480_v29 = vsel %vm448_vm0, %v432_v60, %v464_v14  ;;  %v481_v30 = vsel %vm449_vm1, %v433_v61, %v465_v15  ;;  %v482_v31 = vsel %vm450_vm2, %v434_v62, %v466_v17 }
 0x150   :  { %v483_v32 = vsel %vm451_vm3, %v435_v63, %v467_v19  ;;  %v606_v33 = vpack.c.bf16 %v468_v9, %v468_v9  ;;  %v607_v34 = vpack.c.bf16 %v469_v13, %v469_v13  ;;  %v608_v21 = vpack.c.bf16 %v470_v18, %v470_v18 }
 0x151   :  { %v609_v35 = vpack.c.bf16 %v471_v20, %v471_v20  ;;  %v610_v36 = vpack.c.bf16 %v472_v22, %v472_v22  ;;  %v611_v37 = vpack.c.bf16 %v473_v24, %v473_v24  ;;  %v612_v39 = vpack.c.bf16 %v474_v23, %v474_v23 }
 0x152   :  { %v613_v40 = vpack.c.bf16 %v475_v25, %v475_v25  ;;  %v614_v41 = vpack.c.bf16 %v476_v26, %v476_v26  ;;  %v615_v42 = vpack.c.bf16 %v477_v27, %v477_v27  ;;  %vm925_vm4 = vcmask 125952  }
 0x153   :  { %549 = vst.msk [vmem:[%s922_s4] sm:$0xf] %vm925_vm4, %v606_v33  ;;  %vm926_vm5 = vmmov %vm925_vm4  ;;  %v616_v43 = vpack.c.bf16 %v478_v16, %v478_v16  ;;  %v617_v44 = vpack.c.bf16 %v479_v28, %v479_v28  ;;  %v618_v45 = vpack.c.bf16 %v480_v29, %v480_v29  ;;  %v619_v46 = vpack.c.bf16 %v481_v30, %v481_v30 }
 0x154   :  { %550 = vst.msk [vmem:[%s922_s4 + $0x4] sm:$0xf] %vm926_vm5, %v607_v34  ;;  %vm927_vm6 = vmmov %vm925_vm4  ;;  %v620_v48 = vpack.c.bf16 %v482_v31, %v482_v31  ;;  %v621_v49 = vpack.c.bf16 %v483_v32, %v483_v32 }
 0x155   :  { %551 = vst.msk [vmem:[%s922_s4 + $0x8] sm:$0xf] %vm927_vm6, %v608_v21  ;;  %vm928_vm7 = vmmov %vm925_vm4 }
 0x156   :  { %552 = vst.msk [vmem:[%s922_s4 + $0xc] sm:$0xf] %vm928_vm7, %v609_v35  ;;  %vm929_vm8 = vmmov %vm925_vm4 }
 0x157   :  { %553 = vst.msk [vmem:[%s922_s4 + $0x10] sm:$0xf] %vm929_vm8, %v610_v36  ;;  %vm930_vm9 = vmmov %vm925_vm4 }
 0x158   :  { %554 = vst.msk [vmem:[%s922_s4 + $0x14] sm:$0xf] %vm930_vm9, %v611_v37  ;;  %vm931_vm10 = vmmov %vm925_vm4 }
 0x159   :  { %555 = vst.msk [vmem:[%s922_s4 + $0x18] sm:$0xf] %vm931_vm10, %v612_v39  ;;  %vm932_vm11 = vmmov %vm925_vm4 }
 0x15a   :  { %556 = vst.msk [vmem:[%s922_s4 + $0x1c] sm:$0xf] %vm932_vm11, %v613_v40  ;;  %vm933_vm12 = vmmov %vm925_vm4 }
 0x15b   :  { %557 = vst.msk [vmem:[%s922_s4 + $0x20] sm:$0xf] %vm933_vm12, %v614_v41  ;;  %vm934_vm13 = vmmov %vm925_vm4 }
 0x15c   :  { %558 = vst.msk [vmem:[%s922_s4 + $0x24] sm:$0xf] %vm934_vm13, %v615_v42  ;;  %vm935_vm14 = vmmov %vm925_vm4 }
 0x15d   :  { %559 = vst.msk [vmem:[%s922_s4 + $0x28] sm:$0xf] %vm935_vm14, %v616_v43  ;;  %vm936_vm15 = vmmov %vm925_vm4 }
 0x15e   :  { %560 = vst.msk [vmem:[%s922_s4 + $0x2c] sm:$0xf] %vm936_vm15, %v617_v44  ;;  %vm937_vm0 = vmmov %vm925_vm4 }
 0x15f   :  { %561 = vst.msk [vmem:[%s922_s4 + $0x30] sm:$0xf] %vm937_vm0, %v618_v45  ;;  %vm938_vm1 = vmmov %vm937_vm0 }
 0x160   :  { %562 = vst.msk [vmem:[%s922_s4 + $0x34] sm:$0xf] %vm938_vm1, %v619_v46  ;;  %vm939_vm2 = vmmov %vm937_vm0 }
 0x161   :  { %563 = vst.msk [vmem:[%s922_s4 + $0x38] sm:$0xf] %vm939_vm2, %v620_v48  ;;  %vm940_vm3 = vmmov %vm937_vm0 }
 0x162   :  { %564 = vst.msk [vmem:[%s922_s4 + $0x3c] sm:$0xf] %vm940_vm3, %v621_v49 }

// kernel: base_model_forward.5
= control target key start
LH: loop header
LB: loop body
LE: loop exit
PB: predicated region body
PF: predicated region fallthrough
CT: control target
= control target key end

     0   :  { %v157_v28 = vlaneseq  ;;  %v1014_v36 = vmov 1966171168   ;;  %s1259_s0 = inlined_call_operand.vmem [shape: bf16[2,1024], index: 0, kind: input, shape index: {}]   ;;  %s1260_s1 = inlined_call_operand.vmem [shape: bf16[1024,10], index: 1, kind: input, shape index: {}]   ;;  %s1261_s2 = inlined_call_operand.vmem [shape: f32[1,10], index: 2, kind: input, shape index: {}]   ;;  %s1262_s3 = inlined_call_operand.hbm [shape: f32[2,10], index: 3, kind: output, shape index: {}]  }
   0x1   :  { %v925_v0 = vld [vmem:[%s1260_s1 + $0x40] sm:$0xff]   ;;  %v929_v4 = vld [vmem:[%s1260_s1 + $0x48] sm:$0xff]   ;;  %v933_v8 = vld [vmem:[%s1260_s1 + $0x50] sm:$0xff]   ;;  %v155_v37 = vunpack.c.l.s4 %v1014_v36 }
   0x2   :  { %v926_v1 = vld [vmem:[%s1260_s1 + $0xc0] sm:$0xff]   ;;  %835 = vmatprep.subr.bf16.mxu0 %v925_v0  ;;  %v930_v5 = vld [vmem:[%s1260_s1 + $0xc8] sm:$0xff]   ;;  %v934_v9 = vld [vmem:[%s1260_s1 + $0xd0] sm:$0xff]   ;;  %v158_v33 = vshrl.u32 %v157_v28, 7 }
   0x3   :  { %v927_v2 = vld [vmem:[%s1260_s1] sm:$0xff]   ;;  %857 = vmatprep.subr.bf16.mxu1 %v926_v1  ;;  %v931_v6 = vld [vmem:[%s1260_s1 + $0x8] sm:$0xff]   ;;  %v935_v10 = vld [vmem:[%s1260_s1 + $0x10] sm:$0xff]   ;;  %v156_v40 = vunpack.c.0.s8 %v155_v37 }
   0x4   :  { %v928_v3 = vld [vmem:[%s1260_s1 + $0x80] sm:$0xff]   ;;  %836 = vmatpush3.bf16.msra.mxu0 %v927_v2  ;;  %v932_v7 = vld [vmem:[%s1260_s1 + $0x88] sm:$0xff]   ;;  %v936_v11 = vld [vmem:[%s1260_s1 + $0x90] sm:$0xff]  }
   0x5   :  { %858 = vmatpush3.bf16.msra.mxu1 %v928_v3  ;;  %837 = vmatprep.subr.bf16.mxu0 %v929_v4  ;;  %v937_v12 = vld [vmem:[%s1260_s1 + $0x58] sm:$0xff]   ;;  %v941_v16 = vld [vmem:[%s1260_s1 + $0x60] sm:$0xff]   ;;  %v945_v20 = vld [vmem:[%s1260_s1 + $0x68] sm:$0xff]   ;;  %v1141_v41 = vsub.s32 %v156_v40, %v158_v33 }
   0x6   :  { %859 = vmatprep.subr.bf16.mxu1 %v930_v5  ;;  %v938_v13 = vld [vmem:[%s1260_s1 + $0xd8] sm:$0xff]   ;;  %v942_v17 = vld [vmem:[%s1260_s1 + $0xe0] sm:$0xff]   ;;  %v946_v21 = vld [vmem:[%s1260_s1 + $0xe8] sm:$0xff]  }
   0x7   :  { %v939_v14 = vld [vmem:[%s1260_s1 + $0x18] sm:$0xff]   ;;  %v943_v18 = vld [vmem:[%s1260_s1 + $0x20] sm:$0xff]   ;;  %v947_v22 = vld [vmem:[%s1260_s1 + $0x28] sm:$0xff]  }
   0x8   :  { %838 = vmatpush3.bf16.msra.mxu0 %v931_v6  ;;  %v940_v15 = vld [vmem:[%s1260_s1 + $0x98] sm:$0xff]   ;;  %v944_v19 = vld [vmem:[%s1260_s1 + $0xa0] sm:$0xff]   ;;  %v948_v23 = vld [vmem:[%s1260_s1 + $0xa8] sm:$0xff]  }
   0x9   :  { %860 = vmatpush3.bf16.msra.mxu1 %v932_v7  ;;  %839 = vmatprep.subr.bf16.mxu0 %v933_v8  ;;  %v949_v24 = vld [vmem:[%s1260_s1 + $0x70] sm:$0xff]   ;;  %v953_v29 = vld [vmem:[%s1260_s1 + $0x78] sm:$0xff]   ;;  %v16_v34 = vld [vmem:[%s1259_s0] sm:$0xff] }
   0xa   :  { %861 = vmatprep.subr.bf16.mxu1 %v934_v9  ;;  %v950_v25 = vld [vmem:[%s1260_s1 + $0xf0] sm:$0xff]   ;;  %v954_v30 = vld [vmem:[%s1260_s1 + $0xf8] sm:$0xff]   ;;  %v958_v35 = vld [vmem:[%s1260_s1 + $0x140] sm:$0xff]   ;;  %v153_v39 = vcombine.high %v16_v34, %v16_v34  ;;  %v160_v42 = vrot.slane %v16_v34, %v1141_v41 }
   0xb   :  { %v951_v26 = vld [vmem:[%s1260_s1 + $0x30] sm:$0xff]   ;;  %v955_v31 = vld [vmem:[%s1260_s1 + $0x38] sm:$0xff]   ;;  %v959_v38 = vld [vmem:[%s1260_s1 + $0x1c0] sm:$0xff]  }
   0xc   :  { %840 = vmatpush3.bf16.msra.mxu0 %v935_v10  ;;  %v952_v27 = vld [vmem:[%s1260_s1 + $0xb0] sm:$0xff]   ;;  %v956_v32 = vld [vmem:[%s1260_s1 + $0xb8] sm:$0xff]   ;;  %v1145_v43 = vrot.slane %v153_v39, %v1141_v41  ;;  %v168_v44 = vcombine.high %v160_v42, %v160_v42  ;;  %v176_v45 = vrot.slane %v160_v42, %v1141_v41  ;;  %v960_v48 = vld [vmem:[%s1260_s1 + $0x100] sm:$0xff]  }
   0xd   :  { %862 = vmatpush3.bf16.msra.mxu1 %v936_v11  ;;  %841 = vmatprep.subr.bf16.mxu0 %v937_v12  ;;  %v962_v51 = vld [vmem:[%s1260_s1 + $0x148] sm:$0xff]   ;;  %v961_v53 = vld [vmem:[%s1260_s1 + $0x180] sm:$0xff]   ;;  %v966_v57 = vld [vmem:[%s1260_s1 + $0x150] sm:$0xff]  }
   0xe   :  { %863 = vmatprep.subr.bf16.mxu1 %v938_v13  ;;  %v169_v46 = vcombine.high %v1145_v43, %v1145_v43  ;;  %v190_v47 = vrot.slane %v168_v44, %v1141_v41  ;;  %v198_v50 = vcombine.high %v176_v45, %v176_v45  ;;  %v963_v54 = vld [vmem:[%s1260_s1 + $0x1c8] sm:$0xff]   ;;  %v967_v59 = vld [vmem:[%s1260_s1 + $0x1d0] sm:$0xff]   ;;  %v970_v61 = vld [vmem:[%s1260_s1 + $0x158] sm:$0xff]  }
   0xf   :  { %v964_v56 = vld [vmem:[%s1260_s1 + $0x108] sm:$0xff]   ;;  %v968_v60 = vld [vmem:[%s1260_s1 + $0x110] sm:$0xff]   ;;  %v971_v63 = vld [vmem:[%s1260_s1 + $0x1d8] sm:$0xff]  }
  0x10   :  { %842 = vmatpush3.bf16.msra.mxu0 %v939_v14  ;;  %v197_v49 = vrot.slane %v169_v46, %v1141_v41  ;;  %626 = vmatprep.mubr.bf16.mxu0 %v190_v47  ;;  %v200_v52 = vcombine.high %v190_v47, %v190_v47  ;;  %v965_v58 = vld [vmem:[%s1260_s1 + $0x188] sm:$0xff]   ;;  %v969_v62 = vld [vmem:[%s1260_s1 + $0x190] sm:$0xff]   ;;  %v972_v0 = vld [vmem:[%s1260_s1 + $0x118] sm:$0xff]  }
  0x11   :  { %864 = vmatpush3.bf16.msra.mxu1 %v940_v15  ;;  %843 = vmatprep.subr.bf16.mxu0 %v941_v16  ;;  %v974_v1 = vld [vmem:[%s1260_s1 + $0x160] sm:$0xff]   ;;  %v973_v2 = vld [vmem:[%s1260_s1 + $0x198] sm:$0xff]   ;;  %v978_v5 = vld [vmem:[%s1260_s1 + $0x168] sm:$0xff]  }
  0x12   :  { %865 = vmatprep.subr.bf16.mxu1 %v942_v17  ;;  %v201_v55 = vcombine.high %v197_v49, %v197_v49  ;;  %666 = vmatprep.mubr.bf16.mxu1 %v200_v52  ;;  %v975_v3 = vld [vmem:[%s1260_s1 + $0x1e0] sm:$0xff]   ;;  %v979_v7 = vld [vmem:[%s1260_s1 + $0x1e8] sm:$0xff]   ;;  %v982_v9 = vld [vmem:[%s1260_s1 + $0x170] sm:$0xff]  }
  0x13   :  { %v976_v4 = vld [vmem:[%s1260_s1 + $0x120] sm:$0xff]   ;;  %v980_v8 = vld [vmem:[%s1260_s1 + $0x128] sm:$0xff]  }
  0x14   :  { %844 = vmatpush3.bf16.msra.mxu0 %v943_v18  ;;  %v977_v6 = vld [vmem:[%s1260_s1 + $0x1a0] sm:$0xff]  }
  0x15   :  { %866 = vmatpush3.bf16.msra.mxu1 %v944_v19  ;;  %845 = vmatprep.subr.bf16.mxu0 %v945_v20 }
  0x16   :  { %867 = vmatprep.subr.bf16.mxu1 %v946_v21 }
  0x18   :  { %846 = vmatpush3.bf16.msra.mxu0 %v947_v22 }
  0x19   :  { %868 = vmatpush3.bf16.msra.mxu1 %v948_v23  ;;  %847 = vmatprep.subr.bf16.mxu0 %v949_v24 }
  0x1a   :  { %869 = vmatprep.subr.bf16.mxu1 %v950_v25 }
  0x1c   :  { %848 = vmatpush3.bf16.msra.mxu0 %v951_v26 }
  0x1d   :  { %870 = vmatpush3.bf16.msra.mxu1 %v952_v27  ;;  %849 = vmatprep.subr.bf16.mxu0 %v953_v29 }
  0x1e   :  { %871 = vmatprep.subr.bf16.mxu1 %v954_v30 }
  0x20   :  { %850 = vmatpush3.bf16.msra.mxu0 %v955_v31 }
  0x21   :  { %872 = vmatpush3.bf16.msra.mxu1 %v956_v32  ;;  %879 = vmatprep.subr.bf16.mxu0 %v958_v35 }
  0x22   :  { %901 = vmatprep.subr.bf16.mxu1 %v959_v38 }
  0x23   :  { %627 = vmatmul.mubr.bf16.vlgmr.msra.gmra.mrb[0].mxu0 %v176_v45 }
  0x24   :  { %880 = vmatpush3.bf16.msra.mxu0 %v960_v48  ;;  %667 = vmatmul.mubr.bf16.vlgmr.msra.gmra.mrb[0].mxu1 %v198_v50 }
  0x25   :  { %881 = vmatprep.subr.bf16.mxu0 %v962_v51  ;;  %902 = vmatpush3.bf16.msra.mxu1 %v961_v53 }
  0x26   :  { %706 = vmatprep.mubr.bf16.mxu0 %v197_v49  ;;  %903 = vmatprep.subr.bf16.mxu1 %v963_v54 }
  0x27   :  { %746 = vmatprep.mubr.bf16.mxu1 %v201_v55 }
  0x28   :  { %882 = vmatpush3.bf16.msra.mxu0 %v964_v56 }
  0x29   :  { %883 = vmatprep.subr.bf16.mxu0 %v966_v57  ;;  %904 = vmatpush3.bf16.msra.mxu1 %v965_v58 }
  0x2a   :  { %905 = vmatprep.subr.bf16.mxu1 %v967_v59 }
  0x2c   :  { %884 = vmatpush3.bf16.msra.mxu0 %v968_v60 }
  0x2d   :  { %885 = vmatprep.subr.bf16.mxu0 %v970_v61  ;;  %906 = vmatpush3.bf16.msra.mxu1 %v969_v62 }
  0x2e   :  { %907 = vmatprep.subr.bf16.mxu1 %v971_v63 }
  0x30   :  { %886 = vmatpush3.bf16.msra.mxu0 %v972_v0 }
  0x31   :  { %887 = vmatprep.subr.bf16.mxu0 %v974_v1  ;;  %908 = vmatpush3.bf16.msra.mxu1 %v973_v2 }
  0x32   :  { %909 = vmatprep.subr.bf16.mxu1 %v975_v3 }
  0x34   :  { %888 = vmatpush3.bf16.msra.mxu0 %v976_v4 }
  0x35   :  { %889 = vmatprep.subr.bf16.mxu0 %v978_v5 }
  0x36   :  { %8 = vsyncpa [#allocation3], 0  ;;  %910 = vmatpush3.bf16.msra.mxu1 %v977_v6  ;;  %v981_v10 = vld [vmem:[%s1260_s1 + $0x1a8] sm:$0xff]   ;;  %v983_v11 = vld [vmem:[%s1260_s1 + $0x1f0] sm:$0xff]   ;;  %v183_v17 = vrot.slane %v1145_v43, %v1141_v41  ;;  %vm754_vm0 = vcmask 74752  }
  0x37   :  { %911 = vmatprep.subr.bf16.mxu1 %v979_v7  ;;  %v984_v12 = vld [vmem:[%s1260_s1 + $0x130] sm:$0xff]   ;;  %v986_v13 = vld [vmem:[%s1260_s1 + $0x178] sm:$0xff]   ;;  %v770_v21 = vld [vmem:[%s1261_s2] ss:$0 sm:$0xff] }
  0x38   :  { %890 = vmatpush3.bf16.msra.mxu0 %v980_v8  ;;  %v985_v14 = vld [vmem:[%s1260_s1 + $0x1b0] sm:$0xff]   ;;  %v987_v15 = vld [vmem:[%s1260_s1 + $0x1f8] sm:$0xff]   ;;  %v199_v19 = vcombine.high %v183_v17, %v183_v17 }
  0x39   :  { %891 = vmatprep.subr.bf16.mxu0 %v982_v9  ;;  %v988_v16 = vld [vmem:[%s1260_s1 + $0x138] sm:$0xff]  }
  0x3a   :  { %912 = vmatpush3.bf16.msra.mxu1 %v981_v10  ;;  %v989_v18 = vld [vmem:[%s1260_s1 + $0x1b8] sm:$0xff]   ;;  %s1015_s1 = smov [#allocation2]  }
  0x3b   :  { %913 = vmatprep.subr.bf16.mxu1 %v983_v11  ;;  %s762_s2 = sshll.u32 %s1015_s1, 4  ;;  %s763_s2 = int_to_ptr.vmem [resolvable:$true] %s762_s2 }
  0x3c   :  { %892 = vmatpush3.bf16.msra.mxu0 %v984_v12  ;;  %s990_s6 = scalar_lea.vmem %s763_s2, 32  ;;  %p995_p1 = scmp.lt.s32.totalorder %s763_s2, %s763_s2 }
  0x3d   :  { %893 = vmatprep.subr.bf16.mxu0 %v986_v13  ;;  %p991_p0 = scmp.ne.s32.totalorder %s763_s2, %s990_s6  ;;  %p996_p2 = scmp.lt.s32.totalorder %s990_s6, %s990_s6 }
  0x3e   :  { %914 = vmatpush3.bf16.msra.mxu1 %v985_v14 }
  0x3f   :  { %915 = vmatprep.subr.bf16.mxu1 %v987_v15  ;;  %p997_p3 = por %p996_p2, %p995_p1 }
  0x40   :  { %894 = vmatpush3.bf16.msra.mxu0 %v988_v16 }
  0x41   :  { %p998_p4 = pnand %p997_p3, %p991_p0 }
  0x42   :  { %916 = vmatpush3.bf16.msra.mxu1 %v989_v18 }
  0x43   :  { %707 = vmatmul.mubr.bf16.vlgmr.msra.gmra.mrb[4].mxu0 %v183_v17 }
  0x45   :  { %747 = vmatmul.mubr.bf16.vlgmr.msra.gmra.mrb[4].mxu1 %v199_v19 }
  0xf6   :  { %v851_v20 = vpop.f32.mrb[0].mxu0 }
  0xf7   :  { %v852_v22 = vpop.f32.mrb[1].mxu0  ;;  %v873_v23 = vpop.f32.mrb[0].mxu1 }
  0xf8   :  { %v853_v24 = vadd.f32 %v852_v22, %v851_v20  ;;  %v854_v25 = vpop.f32.mrb[2].mxu0  ;;  %v874_v26 = vpop.f32.mrb[1].mxu1 }
  0xf9   :  { %v855_v27 = vpop.f32.mrb[3].mxu0  ;;  %v875_v29 = vadd.f32 %v874_v26, %v873_v23  ;;  %v876_v30 = vpop.f32.mrb[2].mxu1 }
  0xfa   :  { %v629_v28 = vadd.f32 %v853_v24, %v770_v21  ;;  %v877_v31 = vpop.f32.mrb[3].mxu1 }
  0xfc   :  { %v669_v32 = vadd.f32 %v875_v29, %v629_v28 }
 0x116   :  { %v895_v33 = vpop.f32.mrb[4].mxu0 }
 0x117   :  { %v896_v34 = vpop.f32.mrb[5].mxu0 }
 0x118   :  { %v917_v35 = vpop.f32.mrb[4].mxu1  ;;  %v897_v36 = vadd.f32 %v896_v34, %v895_v33  ;;  %v898_v37 = vpop.f32.mrb[6].mxu0 }
 0x119   :  { %v918_v38 = vpop.f32.mrb[5].mxu1  ;;  %v899_v39 = vpop.f32.mrb[7].mxu0 }
 0x11a   :  { %v709_v40 = vadd.f32 %v897_v36, %v669_v32  ;;  %v919_v41 = vadd.f32 %v918_v38, %v917_v35  ;;  %v920_v42 = vpop.f32.mrb[6].mxu1 }
 0x11b   :  { %v921_v43 = vpop.f32.mrb[7].mxu1 }
 0x11c   :  { %v749_v44 = vadd.f32 %v919_v41, %v709_v40 }
 0x11e   :  { %755 = vst.msk [vmem:[#allocation2] sm:$0x3] %vm754_vm0, %v749_v44 }
 0x11f   :  { %1001 = shalt.err (!%p998_p4)
}
 0x120   :  { %s1002_s9 = scalar_lea.hbm %s1262_s3, 32 }
 0x121   :  { %p1003_p5 = scmp.ne.s32.totalorder %s1262_s3, %s1002_s9  ;;  %p1006_p6 = scmp.lt.u32.totalorder %s1002_s9, %s1262_s3 }
 0x123   :  { %p1008_p7 = pnand %p1006_p6, %p1003_p5 }
 0x125   :  { %1011 = shalt.err (!%p1008_p7)
}
 0x126   :  { %765 = dma.vmem_to_hbm [thread:$0]  %s763_s2, 32, %s1262_s3, [#allocation3]  }
 0x127   :  { %1012 = dma.done.wait [#allocation3], 32  }
 0x128   :  { %1013 = vsyncadd [#allocation3], 4294967264 }
 0x129   :  { %769 = vsyncpa [#allocation3], 1 }

</bundles_post_ra>
